<compile_context>
chip_gen: v5e
topology: v5e:2x2
jax: 0.10.0
libtpu: 0.0.40
codegen_flags: <defaults>
</compile_context>

<pallas_src>
import functools

import jax
import jax.numpy as jnp
from jax import lax
from jax.experimental import pallas as pl
from jax.experimental.pallas import tpu as pltpu

EPS = 1e-5
MAX_STEPS_PER_BLOCK = 8   # evaluations fused per grid step


# ---------------- shared BN(+ReLU) math (used by kernel AND reference) -----
def _bn_relu(z, gamma, beta, axis):
    """Train-mode BatchNorm1d (biased batch stats, eps=1e-5) fused with ReLU.

    One-pass variance + single fused scale/shift. The preceding Linear bias
    is intentionally omitted by callers: the mean subtraction cancels it.
    Statistics are reduced over `axis` (the batch axis of one evaluation).
    """
    inv_b = 1.0 / z.shape[axis]
    mean = jnp.sum(z, axis=axis, keepdims=True) * inv_b
    var = jnp.sum(z * z, axis=axis, keepdims=True) * inv_b - mean * mean
    s = gamma * lax.rsqrt(jnp.maximum(var, 0.0) + EPS)
    return jnp.maximum(z * s + (beta - mean * s), 0.0)


# ------------------------------ Pallas kernel ------------------------------
def _velocity_net_kernel(mm_dtype,
                         t_ref, x_ref,
                         w0t_ref, w0x_ref, g0_ref, be0_ref,
                         w1_ref, g1_ref, be1_ref,
                         w2_ref, g2_ref, be2_ref,
                         w3_ref, b3_ref,
                         o_ref):
    TS, B, dim = x_ref.shape
    t3 = t_ref[...].astype(jnp.float32)          # (TS, B, 1)  f32
    x2 = x_ref[...].reshape(TS * B, dim)         # (TS*B, dim) mm_dtype

    # Layer 0: aligned K=dim matmul over all TS*B rows + rank-1 t FMA.
    z2 = jnp.dot(x2, w0x_ref[...], preferred_element_type=jnp.float32)
    H = z2.shape[-1]
    z3 = z2.reshape(TS, B, H) + t3 * w0t_ref[...]     # broadcast FMA (f32)
    h3 = _bn_relu(z3, g0_ref[...], be0_ref[...], axis=1)

    # Layers 1, 2: Linear (no bias) -> per-evaluation BN -> ReLU.
    for w_ref, g_ref, be_ref in ((w1_ref, g1_ref, be1_ref),
                                 (w2_ref, g2_ref, be2_ref)):
        z2 = jnp.dot(h3.reshape(TS * B, H).astype(mm_dtype), w_ref[...],
                     preferred_element_type=jnp.float32)
        h3 = _bn_relu(z2.reshape(TS, B, H), g_ref[...], be_ref[...], axis=1)

    # Final Linear (bias kept).
    out2 = jnp.dot(h3.reshape(TS * B, H).astype(mm_dtype), w3_ref[...],
                   preferred_element_type=jnp.float32) + b3_ref[...]
    o_ref[...] = out2.reshape(TS, B, dim).astype(o_ref.dtype)


# ------------------------------ param packing ------------------------------
def prepare_kernel_params(params, matmul_dtype=jnp.bfloat16):
    """Split w0 into (t-row, x-rows), cast matmul operands, drop b0/b1/b2."""
    w0 = params["w0"]
    return {
        "w0t": w0[0:1, :].astype(jnp.float32),     # t row kept in f32 (tiny)
        "w0x": w0[1:, :].astype(matmul_dtype),
        "g0": params["g0"].astype(jnp.float32),
        "be0": params["be0"].astype(jnp.float32),
        "w1": params["w1"].astype(matmul_dtype),
        "g1": params["g1"].astype(jnp.float32),
        "be1": params["be1"].astype(jnp.float32),
        "w2": params["w2"].astype(matmul_dtype),
        "g2": params["g2"].astype(jnp.float32),
        "be2": params["be2"].astype(jnp.float32),
        "w3": params["w3"].astype(matmul_dtype),
        "b3": params["b3"].astype(jnp.float32),
    }


def _normalize_inputs(t, x):
    """Normalize to (t3:[S,B,1] f32, x3:[S,B,dim] f32, single_flag) following
    VelocityNet.forward's t broadcast semantics per evaluation."""
    x = jnp.asarray(x, jnp.float32)
    single = x.ndim == 2
    if single:
        x = x[None]
    S, B, _ = x.shape
    t = jnp.asarray(t, jnp.float32)

    if t.ndim == 0:
        t3 = jnp.full((S, B, 1), t, jnp.float32)
    elif single:
        tf = t.reshape(-1)
        if tf.shape[0] == B:                      # per-sample t
            t3 = tf[None, :, None]
        else:                                     # t.repeat(B)[:, None]
            t3 = jnp.full((S, B, 1), tf[0], jnp.float32)
    else:
        if t.ndim == 1 and t.shape[0] == S:       # one scalar t per step
            t3 = jnp.broadcast_to(t[:, None, None], (S, B, 1))
        elif t.shape == (S, B):
            t3 = t[:, :, None]
        elif t.shape == (S, B, 1):
            t3 = t
        elif t.shape in ((S, 1), (S, 1, 1)):
            t3 = jnp.broadcast_to(t.reshape(S, 1, 1), (S, B, 1))
        else:
            raise ValueError(f"unsupported t shape {t.shape} for x {x.shape}")
    return t3.astype(jnp.float32), x, single


# ------------------------------ JAX wrapper --------------------------------
def velocity_net_forward(t, x, params, matmul_dtype=jnp.bfloat16,
                         max_steps_per_block=MAX_STEPS_PER_BLOCK):
    """VelocityNet.forward. x: [B,dim] (single eval) or [S,B,dim] (S
    independent evaluations fused into one pallas_call / blocked grid)."""
    t3, x3, single = _normalize_inputs(t, x)
    S, B, dim = x3.shape
    kp = prepare_kernel_params(params, matmul_dtype)

    # Fuse TS evaluations per grid step; pad S to a multiple of TS.
    TS = max(1, min(S, max_steps_per_block))
    S_pad = pl.cdiv(S, TS) * TS
    if S_pad != S:
        pad = S_pad - S
        t3 = jnp.concatenate([t3, jnp.zeros((pad, B, 1), t3.dtype)], axis=0)
        x3 = jnp.concatenate([x3, jnp.zeros((pad, B, dim), x3.dtype)], axis=0)

    weights = (kp["w0t"], kp["w0x"], kp["g0"], kp["be0"],
               kp["w1"], kp["g1"], kp["be1"],
               kp["w2"], kp["g2"], kp["be2"],
               kp["w3"], kp["b3"])

    def resident(arr):
        # Full-array block, constant index map: DMA'd to VMEM once, then
        # reused (stays resident) for every step of the grid.
        return pl.BlockSpec(arr.shape, lambda s: (0,) * arr.ndim)

    in_specs = [
        pl.BlockSpec((TS, B, 1), lambda s: (s, 0, 0)),    # t  (per block)
        pl.BlockSpec((TS, B, dim), lambda s: (s, 0, 0)),  # x  (per block)
    ] + [resident(w) for w in weights]

    out = pl.pallas_call(
        functools.partial(_velocity_net_kernel, matmul_dtype),
        out_shape=jax.ShapeDtypeStruct((S_pad, B, dim), jnp.float32),
        grid=(S_pad // TS,),
        in_specs=in_specs,
        out_specs=pl.BlockSpec((TS, B, dim), lambda s: (s, 0, 0)),
        compiler_params=pltpu.CompilerParams(
            dimension_semantics=("parallel",)),
    )(t3, x3.astype(matmul_dtype), *weights)

    out = out[:S]
    return out[0] if single else out


# ---------------------- deterministic parameter init -----------------------
def init_params(dim, hidden_dims=(256, 256, 256), seed=0):
    dims = [dim + 1, *hidden_dims, dim]
    key = jax.random.PRNGKey(seed)
    params = {}
    for i in range(len(dims) - 1):
        fan_in, fan_out = dims[i], dims[i + 1]
        key, kw, kb = jax.random.split(key, 3)
        bound = 1.0 / jnp.sqrt(jnp.float32(fan_in))
        # PyTorch nn.Linear default: U(-1/sqrt(fan_in), 1/sqrt(fan_in))
        params[f"w{i}"] = jax.random.uniform(
            kw, (fan_in, fan_out), jnp.float32, -bound, bound)
        params[f"b{i}"] = jax.random.uniform(
            kb, (1, fan_out), jnp.float32, -bound, bound)
        if i < len(dims) - 2:  # hidden layers carry BatchNorm affine params
            params[f"g{i}"] = jnp.ones((1, fan_out), jnp.float32)
            params[f"be{i}"] = jnp.zeros((1, fan_out), jnp.float32)
    return params


# --------------------------- pure-JAX references ---------------------------
def _matched_step(tcol, x, kp, matmul_dtype):
    """Plain-JAX replica of the kernel math (same dtypes / BN formulation)."""
    z = jnp.dot(x.astype(matmul_dtype), kp["w0x"],
                preferred_element_type=jnp.float32) + tcol * kp["w0t"]
    h = _bn_relu(z, kp["g0"], kp["be0"], axis=0)
    for i in (1, 2):
        z = jnp.dot(h.astype(matmul_dtype), kp[f"w{i}"],
                    preferred_element_type=jnp.float32)
        h = _bn_relu(z, kp[f"g{i}"], kp[f"be{i}"], axis=0)
    return jnp.dot(h.astype(matmul_dtype), kp["w3"],
                   preferred_element_type=jnp.float32) + kp["b3"]


def reference_matched(t, x, params, matmul_dtype=jnp.bfloat16):
    t3, x3, single = _normalize_inputs(t, x)
    kp = prepare_kernel_params(params, matmul_dtype)
    out = jnp.stack([_matched_step(t3[s], x3[s], kp, matmul_dtype)
                     for s in range(x3.shape[0])])
    return out[0] if single else out


def _exact_step(tcol, x, params):
    """PyTorch-equivalent f32 math: concat, Linear+bias, train-mode BN, ReLU."""
    h = jnp.concatenate([tcol, x], axis=-1)
    for i in range(3):
        z = h @ params[f"w{i}"] + params[f"b{i}"]
        mean = jnp.mean(z, axis=0, keepdims=True)
        var = jnp.mean((z - mean) ** 2, axis=0, keepdims=True)
        z = (z - mean) / jnp.sqrt(var + EPS)
        h = jnp.maximum(z * params[f"g{i}"] + params[f"be{i}"], 0.0)
    return h @ params["w3"] + params["b3"]


def reference_exact_f32(t, x, params):
    t3, x3, single = _normalize_inputs(t, x)
    out = jnp.stack([_exact_step(t3[s], x3[s], params)
                     for s in range(x3.shape[0])])
    return out[0] if single else out


if __name__ == "__main__":
    B, DIM, S = 8, 16, 10   # S=10 exercises blocking (TS=8) + padding path

    params = init_params(DIM, hidden_dims=(256, 256, 256), seed=0)

    key = jax.random.PRNGKey(0)
    kx, kt, kx1, kt1 = jax.random.split(key, 4)

    # ---- batched path: S evaluations in ONE pallas_call (resident weights) -
    xs = jax.random.normal(kx, (S, B, DIM), jnp.float32)
    ts = jax.random.uniform(kt, (S,), jnp.float32)        # one t per step

    out_bf16 = jax.block_until_ready(velocity_net_forward(ts, xs, params))
    assert out_bf16.shape == (S, B, DIM)
    ref_m = reference_matched(ts, xs, params)
    assert jnp.allclose(out_bf16, ref_m, atol=1e-2, rtol=1e-2), (
        f"bf16 vs matched max abs err = {jnp.max(jnp.abs(out_bf16 - ref_m))}")

    out_f32 = jax.block_until_ready(
        velocity_net_forward(ts, xs, params, matmul_dtype=jnp.float32))
    ref_m32 = reference_matched(ts, xs, params, matmul_dtype=jnp.float32)
    assert jnp.allclose(out_f32, ref_m32, atol=2e-3, rtol=2e-3), (
        f"f32 vs matched max abs err = {jnp.max(jnp.abs(out_f32 - ref_m32))}")
    ref_e = reference_exact_f32(ts, xs, params)
    assert jnp.allclose(out_f32, ref_e, atol=2e-2, rtol=2e-2), (
        f"f32 vs exact max abs err = {jnp.max(jnp.abs(out_f32 - ref_e))}")

    # ---- single-call path: scalar t, [B, dim] x -----------------------------
    x1 = jax.random.normal(kx1, (B, DIM), jnp.float32)
    t1 = jax.random.uniform(kt1, (), jnp.float32)

    out1_f32 = jax.block_until_ready(
        velocity_net_forward(t1, x1, params, matmul_dtype=jnp.float32))
    assert out1_f32.shape == (B, DIM)
    ref1_e = reference_exact_f32(t1, x1, params)
    assert jnp.allclose(out1_f32, ref1_e, atol=2e-2, rtol=2e-2), (
        f"single f32 vs exact max abs err = "
        f"{jnp.max(jnp.abs(out1_f32 - ref1_e))}")

    out1_bf16 = jax.block_until_ready(velocity_net_forward(t1, x1, params))
    ref1_m = reference_matched(t1, x1, params)
    assert jnp.allclose(out1_bf16, ref1_m, atol=1e-2, rtol=1e-2), (
        f"single bf16 vs matched max abs err = "
        f"{jnp.max(jnp.abs(out1_bf16 - ref1_m))}")

    print("KERNEL_OK")
</pallas_src>

<mosaic_0001>
module attributes {stable_mosaic.version = 11 : i64} {
  func.func @_velocity_net_kernel(%arg0: i32, %arg1: memref<8x8x1xf32, #tpu.memory_space<vmem>>, %arg2: memref<8x8x16xbf16, #tpu.memory_space<vmem>>, %arg3: memref<1x256xf32, #tpu.memory_space<vmem>>, %arg4: memref<16x256xbf16, #tpu.memory_space<vmem>>, %arg5: memref<1x256xf32, #tpu.memory_space<vmem>>, %arg6: memref<1x256xf32, #tpu.memory_space<vmem>>, %arg7: memref<256x256xbf16, #tpu.memory_space<vmem>>, %arg8: memref<1x256xf32, #tpu.memory_space<vmem>>, %arg9: memref<1x256xf32, #tpu.memory_space<vmem>>, %arg10: memref<256x256xbf16, #tpu.memory_space<vmem>>, %arg11: memref<1x256xf32, #tpu.memory_space<vmem>>, %arg12: memref<1x256xf32, #tpu.memory_space<vmem>>, %arg13: memref<256x16xbf16, #tpu.memory_space<vmem>>, %arg14: memref<1x16xf32, #tpu.memory_space<vmem>>, %arg15: memref<8x8x16xf32, #tpu.memory_space<vmem>>) attributes {dimension_semantics = [#tpu.dimension_semantics<parallel>], iteration_bounds = array<i64: 2>, scalar_prefetch = 0 : i64, scratch_operands = 0 : i64, tpu.core_type = #tpu.core_type<tc>, window_params = [{transform_indices = @transform_0, window_bounds = array<i64: 8, 8, 1>}, {transform_indices = @transform_1, window_bounds = array<i64: 8, 8, 16>}, {pipeline_mode = #tpu.pipeline_mode<synchronous>, transform_indices = @transform_2, window_bounds = array<i64: 1, 256>}, {pipeline_mode = #tpu.pipeline_mode<synchronous>, transform_indices = @transform_3, window_bounds = array<i64: 16, 256>}, {pipeline_mode = #tpu.pipeline_mode<synchronous>, transform_indices = @transform_4, window_bounds = array<i64: 1, 256>}, {pipeline_mode = #tpu.pipeline_mode<synchronous>, transform_indices = @transform_5, window_bounds = array<i64: 1, 256>}, {pipeline_mode = #tpu.pipeline_mode<synchronous>, transform_indices = @transform_6, window_bounds = array<i64: 256, 256>}, {pipeline_mode = #tpu.pipeline_mode<synchronous>, transform_indices = @transform_7, window_bounds = array<i64: 1, 256>}, {pipeline_mode = #tpu.pipeline_mode<synchronous>, transform_indices = @transform_8, window_bounds = array<i64: 1, 256>}, {pipeline_mode = #tpu.pipeline_mode<synchronous>, transform_indices = @transform_9, window_bounds = array<i64: 256, 256>}, {pipeline_mode = #tpu.pipeline_mode<synchronous>, transform_indices = @transform_10, window_bounds = array<i64: 1, 256>}, {pipeline_mode = #tpu.pipeline_mode<synchronous>, transform_indices = @transform_11, window_bounds = array<i64: 1, 256>}, {pipeline_mode = #tpu.pipeline_mode<synchronous>, transform_indices = @transform_12, window_bounds = array<i64: 256, 16>}, {pipeline_mode = #tpu.pipeline_mode<synchronous>, transform_indices = @transform_13, window_bounds = array<i64: 1, 16>}, {transform_indices = @transform_14, window_bounds = array<i64: 8, 8, 16>}]} {
    %c0 = arith.constant 0 : index
    %c0_0 = arith.constant 0 : index
    %c0_1 = arith.constant 0 : index
    %0 = vector.load %arg1[%c0, %c0_0, %c0_1] : memref<8x8x1xf32, #tpu.memory_space<vmem>>, vector<8x8x1xf32>
    %c0_2 = arith.constant 0 : index
    %c0_3 = arith.constant 0 : index
    %c0_4 = arith.constant 0 : index
    %1 = vector.load %arg2[%c0_2, %c0_3, %c0_4] : memref<8x8x16xbf16, #tpu.memory_space<vmem>>, vector<8x8x16xbf16>
    %2 = vector.shape_cast %1 : vector<8x8x16xbf16> to vector<64x16xbf16>
    %c0_5 = arith.constant 0 : index
    %c0_6 = arith.constant 0 : index
    %3 = vector.load %arg4[%c0_5, %c0_6] : memref<16x256xbf16, #tpu.memory_space<vmem>>, vector<16x256xbf16>
    %cst = arith.constant dense<0.000000e+00> : vector<64x256xf32>
    %4 = tpu.matmul %2, %3, %cst {dimension_numbers = #tpu.dot_dimension_numbers<[1], [0], [0], [1], [0, 0, 1, 1], [], []>} : vector<64x16xbf16>, vector<16x256xbf16>, vector<64x256xf32> -> vector<64x256xf32>
    %5 = vector.shape_cast %4 : vector<64x256xf32> to vector<8x8x256xf32>
    %c0_7 = arith.constant 0 : index
    %c0_8 = arith.constant 0 : index
    %6 = vector.load %arg3[%c0_7, %c0_8] : memref<1x256xf32, #tpu.memory_space<vmem>>, vector<1x256xf32>
    %7 = vector.shape_cast %6 : vector<1x256xf32> to vector<1x1x256xf32>
    %8 = vector.broadcast %0 : vector<8x8x1xf32> to vector<8x8x256xf32>
    %9 = vector.broadcast %7 : vector<1x1x256xf32> to vector<8x8x256xf32>
    %10 = arith.mulf %8, %9 : vector<8x8x256xf32>
    %11 = arith.addf %5, %10 : vector<8x8x256xf32>
    %c0_9 = arith.constant 0 : index
    %c0_10 = arith.constant 0 : index
    %12 = vector.load %arg5[%c0_9, %c0_10] : memref<1x256xf32, #tpu.memory_space<vmem>>, vector<1x256xf32>
    %c0_11 = arith.constant 0 : index
    %c0_12 = arith.constant 0 : index
    %13 = vector.load %arg6[%c0_11, %c0_12] : memref<1x256xf32, #tpu.memory_space<vmem>>, vector<1x256xf32>
    %cst_13 = arith.constant dense<0.000000e+00> : vector<8x256xf32>
    %14 = vector.multi_reduction <add>, %11, %cst_13 [1] : vector<8x8x256xf32> to vector<8x256xf32>
    %15 = vector.shape_cast %14 : vector<8x256xf32> to vector<8x1x256xf32>
    %cst_14 = arith.constant 1.250000e-01 : f32
    %16 = vector.broadcast %cst_14 : f32 to vector<8x1x256xf32>
    %17 = arith.mulf %15, %16 : vector<8x1x256xf32>
    %18 = arith.mulf %11, %11 : vector<8x8x256xf32>
    %cst_15 = arith.constant dense<0.000000e+00> : vector<8x256xf32>
    %19 = vector.multi_reduction <add>, %18, %cst_15 [1] : vector<8x8x256xf32> to vector<8x256xf32>
    %20 = vector.shape_cast %19 : vector<8x256xf32> to vector<8x1x256xf32>
    %cst_16 = arith.constant 1.250000e-01 : f32
    %21 = vector.broadcast %cst_16 : f32 to vector<8x1x256xf32>
    %22 = arith.mulf %20, %21 : vector<8x1x256xf32>
    %23 = arith.mulf %17, %17 : vector<8x1x256xf32>
    %24 = arith.subf %22, %23 : vector<8x1x256xf32>
    %cst_17 = arith.constant 0.000000e+00 : f32
    %25 = vector.broadcast %cst_17 : f32 to vector<8x1x256xf32>
    %26 = arith.maximumf %24, %25 : vector<8x1x256xf32>
    %cst_18 = arith.constant 9.99999974E-6 : f32
    %27 = vector.broadcast %cst_18 : f32 to vector<8x1x256xf32>
    %28 = arith.addf %26, %27 : vector<8x1x256xf32>
    %29 = math.rsqrt %28 : vector<8x1x256xf32>
    %30 = vector.shape_cast %12 : vector<1x256xf32> to vector<1x1x256xf32>
    %31 = vector.broadcast %30 : vector<1x1x256xf32> to vector<8x1x256xf32>
    %32 = arith.mulf %31, %29 : vector<8x1x256xf32>
    %33 = vector.broadcast %32 : vector<8x1x256xf32> to vector<8x8x256xf32>
    %34 = arith.mulf %11, %33 : vector<8x8x256xf32>
    %35 = arith.mulf %17, %32 : vector<8x1x256xf32>
    %36 = vector.shape_cast %13 : vector<1x256xf32> to vector<1x1x256xf32>
    %37 = vector.broadcast %36 : vector<1x1x256xf32> to vector<8x1x256xf32>
    %38 = arith.subf %37, %35 : vector<8x1x256xf32>
    %39 = vector.broadcast %38 : vector<8x1x256xf32> to vector<8x8x256xf32>
    %40 = arith.addf %34, %39 : vector<8x8x256xf32>
    %cst_19 = arith.constant 0.000000e+00 : f32
    %41 = vector.broadcast %cst_19 : f32 to vector<8x8x256xf32>
    %42 = arith.maximumf %40, %41 : vector<8x8x256xf32>
    %43 = vector.shape_cast %42 : vector<8x8x256xf32> to vector<64x256xf32>
    %44 = arith.truncf %43 : vector<64x256xf32> to vector<64x256xbf16>
    %c0_20 = arith.constant 0 : index
    %c0_21 = arith.constant 0 : index
    %45 = vector.load %arg7[%c0_20, %c0_21] : memref<256x256xbf16, #tpu.memory_space<vmem>>, vector<256x256xbf16>
    %cst_22 = arith.constant dense<0.000000e+00> : vector<64x256xf32>
    %46 = tpu.matmul %44, %45, %cst_22 {dimension_numbers = #tpu.dot_dimension_numbers<[1], [0], [0], [1], [0, 0, 1, 1], [], []>} : vector<64x256xbf16>, vector<256x256xbf16>, vector<64x256xf32> -> vector<64x256xf32>
    %47 = vector.shape_cast %46 : vector<64x256xf32> to vector<8x8x256xf32>
    %c0_23 = arith.constant 0 : index
    %c0_24 = arith.constant 0 : index
    %48 = vector.load %arg8[%c0_23, %c0_24] : memref<1x256xf32, #tpu.memory_space<vmem>>, vector<1x256xf32>
    %c0_25 = arith.constant 0 : index
    %c0_26 = arith.constant 0 : index
    %49 = vector.load %arg9[%c0_25, %c0_26] : memref<1x256xf32, #tpu.memory_space<vmem>>, vector<1x256xf32>
    %cst_27 = arith.constant dense<0.000000e+00> : vector<8x256xf32>
    %50 = vector.multi_reduction <add>, %47, %cst_27 [1] : vector<8x8x256xf32> to vector<8x256xf32>
    %51 = vector.shape_cast %50 : vector<8x256xf32> to vector<8x1x256xf32>
    %cst_28 = arith.constant 1.250000e-01 : f32
    %52 = vector.broadcast %cst_28 : f32 to vector<8x1x256xf32>
    %53 = arith.mulf %51, %52 : vector<8x1x256xf32>
    %54 = arith.mulf %47, %47 : vector<8x8x256xf32>
    %cst_29 = arith.constant dense<0.000000e+00> : vector<8x256xf32>
    %55 = vector.multi_reduction <add>, %54, %cst_29 [1] : vector<8x8x256xf32> to vector<8x256xf32>
    %56 = vector.shape_cast %55 : vector<8x256xf32> to vector<8x1x256xf32>
    %cst_30 = arith.constant 1.250000e-01 : f32
    %57 = vector.broadcast %cst_30 : f32 to vector<8x1x256xf32>
    %58 = arith.mulf %56, %57 : vector<8x1x256xf32>
    %59 = arith.mulf %53, %53 : vector<8x1x256xf32>
    %60 = arith.subf %58, %59 : vector<8x1x256xf32>
    %cst_31 = arith.constant 0.000000e+00 : f32
    %61 = vector.broadcast %cst_31 : f32 to vector<8x1x256xf32>
    %62 = arith.maximumf %60, %61 : vector<8x1x256xf32>
    %cst_32 = arith.constant 9.99999974E-6 : f32
    %63 = vector.broadcast %cst_32 : f32 to vector<8x1x256xf32>
    %64 = arith.addf %62, %63 : vector<8x1x256xf32>
    %65 = math.rsqrt %64 : vector<8x1x256xf32>
    %66 = vector.shape_cast %48 : vector<1x256xf32> to vector<1x1x256xf32>
    %67 = vector.broadcast %66 : vector<1x1x256xf32> to vector<8x1x256xf32>
    %68 = arith.mulf %67, %65 : vector<8x1x256xf32>
    %69 = vector.broadcast %68 : vector<8x1x256xf32> to vector<8x8x256xf32>
    %70 = arith.mulf %47, %69 : vector<8x8x256xf32>
    %71 = arith.mulf %53, %68 : vector<8x1x256xf32>
    %72 = vector.shape_cast %49 : vector<1x256xf32> to vector<1x1x256xf32>
    %73 = vector.broadcast %72 : vector<1x1x256xf32> to vector<8x1x256xf32>
    %74 = arith.subf %73, %71 : vector<8x1x256xf32>
    %75 = vector.broadcast %74 : vector<8x1x256xf32> to vector<8x8x256xf32>
    %76 = arith.addf %70, %75 : vector<8x8x256xf32>
    %cst_33 = arith.constant 0.000000e+00 : f32
    %77 = vector.broadcast %cst_33 : f32 to vector<8x8x256xf32>
    %78 = arith.maximumf %76, %77 : vector<8x8x256xf32>
    %79 = vector.shape_cast %78 : vector<8x8x256xf32> to vector<64x256xf32>
    %80 = arith.truncf %79 : vector<64x256xf32> to vector<64x256xbf16>
    %c0_34 = arith.constant 0 : index
    %c0_35 = arith.constant 0 : index
    %81 = vector.load %arg10[%c0_34, %c0_35] : memref<256x256xbf16, #tpu.memory_space<vmem>>, vector<256x256xbf16>
    %cst_36 = arith.constant dense<0.000000e+00> : vector<64x256xf32>
    %82 = tpu.matmul %80, %81, %cst_36 {dimension_numbers = #tpu.dot_dimension_numbers<[1], [0], [0], [1], [0, 0, 1, 1], [], []>} : vector<64x256xbf16>, vector<256x256xbf16>, vector<64x256xf32> -> vector<64x256xf32>
    %83 = vector.shape_cast %82 : vector<64x256xf32> to vector<8x8x256xf32>
    %c0_37 = arith.constant 0 : index
    %c0_38 = arith.constant 0 : index
    %84 = vector.load %arg11[%c0_37, %c0_38] : memref<1x256xf32, #tpu.memory_space<vmem>>, vector<1x256xf32>
    %c0_39 = arith.constant 0 : index
    %c0_40 = arith.constant 0 : index
    %85 = vector.load %arg12[%c0_39, %c0_40] : memref<1x256xf32, #tpu.memory_space<vmem>>, vector<1x256xf32>
    %cst_41 = arith.constant dense<0.000000e+00> : vector<8x256xf32>
    %86 = vector.multi_reduction <add>, %83, %cst_41 [1] : vector<8x8x256xf32> to vector<8x256xf32>
    %87 = vector.shape_cast %86 : vector<8x256xf32> to vector<8x1x256xf32>
    %cst_42 = arith.constant 1.250000e-01 : f32
    %88 = vector.broadcast %cst_42 : f32 to vector<8x1x256xf32>
    %89 = arith.mulf %87, %88 : vector<8x1x256xf32>
    %90 = arith.mulf %83, %83 : vector<8x8x256xf32>
    %cst_43 = arith.constant dense<0.000000e+00> : vector<8x256xf32>
    %91 = vector.multi_reduction <add>, %90, %cst_43 [1] : vector<8x8x256xf32> to vector<8x256xf32>
    %92 = vector.shape_cast %91 : vector<8x256xf32> to vector<8x1x256xf32>
    %cst_44 = arith.constant 1.250000e-01 : f32
    %93 = vector.broadcast %cst_44 : f32 to vector<8x1x256xf32>
    %94 = arith.mulf %92, %93 : vector<8x1x256xf32>
    %95 = arith.mulf %89, %89 : vector<8x1x256xf32>
    %96 = arith.subf %94, %95 : vector<8x1x256xf32>
    %cst_45 = arith.constant 0.000000e+00 : f32
    %97 = vector.broadcast %cst_45 : f32 to vector<8x1x256xf32>
    %98 = arith.maximumf %96, %97 : vector<8x1x256xf32>
    %cst_46 = arith.constant 9.99999974E-6 : f32
    %99 = vector.broadcast %cst_46 : f32 to vector<8x1x256xf32>
    %100 = arith.addf %98, %99 : vector<8x1x256xf32>
    %101 = math.rsqrt %100 : vector<8x1x256xf32>
    %102 = vector.shape_cast %84 : vector<1x256xf32> to vector<1x1x256xf32>
    %103 = vector.broadcast %102 : vector<1x1x256xf32> to vector<8x1x256xf32>
    %104 = arith.mulf %103, %101 : vector<8x1x256xf32>
    %105 = vector.broadcast %104 : vector<8x1x256xf32> to vector<8x8x256xf32>
    %106 = arith.mulf %83, %105 : vector<8x8x256xf32>
    %107 = arith.mulf %89, %104 : vector<8x1x256xf32>
    %108 = vector.shape_cast %85 : vector<1x256xf32> to vector<1x1x256xf32>
    %109 = vector.broadcast %108 : vector<1x1x256xf32> to vector<8x1x256xf32>
    %110 = arith.subf %109, %107 : vector<8x1x256xf32>
    %111 = vector.broadcast %110 : vector<8x1x256xf32> to vector<8x8x256xf32>
    %112 = arith.addf %106, %111 : vector<8x8x256xf32>
    %cst_47 = arith.constant 0.000000e+00 : f32
    %113 = vector.broadcast %cst_47 : f32 to vector<8x8x256xf32>
    %114 = arith.maximumf %112, %113 : vector<8x8x256xf32>
    %115 = vector.shape_cast %114 : vector<8x8x256xf32> to vector<64x256xf32>
    %116 = arith.truncf %115 : vector<64x256xf32> to vector<64x256xbf16>
    %c0_48 = arith.constant 0 : index
    %c0_49 = arith.constant 0 : index
    %117 = vector.load %arg13[%c0_48, %c0_49] : memref<256x16xbf16, #tpu.memory_space<vmem>>, vector<256x16xbf16>
    %cst_50 = arith.constant dense<0.000000e+00> : vector<64x16xf32>
    %118 = tpu.matmul %116, %117, %cst_50 {dimension_numbers = #tpu.dot_dimension_numbers<[1], [0], [0], [1], [0, 0, 1, 1], [], []>} : vector<64x256xbf16>, vector<256x16xbf16>, vector<64x16xf32> -> vector<64x16xf32>
    %c0_51 = arith.constant 0 : index
    %c0_52 = arith.constant 0 : index
    %119 = vector.load %arg14[%c0_51, %c0_52] : memref<1x16xf32, #tpu.memory_space<vmem>>, vector<1x16xf32>
    %120 = vector.broadcast %119 : vector<1x16xf32> to vector<64x16xf32>
    %121 = arith.addf %118, %120 : vector<64x16xf32>
    %122 = vector.shape_cast %121 : vector<64x16xf32> to vector<8x8x16xf32>
    %c0_53 = arith.constant 0 : index
    %c0_54 = arith.constant 0 : index
    %c0_55 = arith.constant 0 : index
    %123 = vector.load %arg15[%c0_53, %c0_54, %c0_55] : memref<8x8x16xf32, #tpu.memory_space<vmem>>, vector<8x8x16xf32>
    tpu.vector_store %arg15[%c0_53, %c0_54, %c0_55], %122 {strides = array<i32>} : memref<8x8x16xf32, #tpu.memory_space<vmem>>, vector<8x8x16xf32>,
    return
  }
  func.func @transform_0(%arg0: i32) -> (i32, i32, i32) {
    %c0_i32 = arith.constant 0 : i32
    %c0_i32_0 = arith.constant 0 : i32
    %c0_i32_1 = arith.constant 0 : i32
    return %arg0, %c0_i32, %c0_i32_0 : i32, i32, i32
  }
  func.func @transform_1(%arg0: i32) -> (i32, i32, i32) {
    %c0_i32 = arith.constant 0 : i32
    %c0_i32_0 = arith.constant 0 : i32
    %c0_i32_1 = arith.constant 0 : i32
    return %arg0, %c0_i32, %c0_i32_0 : i32, i32, i32
  }
  func.func @transform_2(%arg0: i32) -> (i32, i32) {
    %c0_i32 = arith.constant 0 : i32
    %c0_i32_0 = arith.constant 0 : i32
    %c0_i32_1 = arith.constant 0 : i32
    return %c0_i32, %c0_i32_0 : i32, i32
  }
  func.func @transform_3(%arg0: i32) -> (i32, i32) {
    %c0_i32 = arith.constant 0 : i32
    %c0_i32_0 = arith.constant 0 : i32
    %c0_i32_1 = arith.constant 0 : i32
    return %c0_i32, %c0_i32_0 : i32, i32
  }
  func.func @transform_4(%arg0: i32) -> (i32, i32) {
    %c0_i32 = arith.constant 0 : i32
    %c0_i32_0 = arith.constant 0 : i32
    %c0_i32_1 = arith.constant 0 : i32
    return %c0_i32, %c0_i32_0 : i32, i32
  }
  func.func @transform_5(%arg0: i32) -> (i32, i32) {
    %c0_i32 = arith.constant 0 : i32
    %c0_i32_0 = arith.constant 0 : i32
    %c0_i32_1 = arith.constant 0 : i32
    return %c0_i32, %c0_i32_0 : i32, i32
  }
  func.func @transform_6(%arg0: i32) -> (i32, i32) {
    %c0_i32 = arith.constant 0 : i32
    %c0_i32_0 = arith.constant 0 : i32
    %c0_i32_1 = arith.constant 0 : i32
    return %c0_i32, %c0_i32_0 : i32, i32
  }
  func.func @transform_7(%arg0: i32) -> (i32, i32) {
    %c0_i32 = arith.constant 0 : i32
    %c0_i32_0 = arith.constant 0 : i32
    %c0_i32_1 = arith.constant 0 : i32
    return %c0_i32, %c0_i32_0 : i32, i32
  }
  func.func @transform_8(%arg0: i32) -> (i32, i32) {
    %c0_i32 = arith.constant 0 : i32
    %c0_i32_0 = arith.constant 0 : i32
    %c0_i32_1 = arith.constant 0 : i32
    return %c0_i32, %c0_i32_0 : i32, i32
  }
  func.func @transform_9(%arg0: i32) -> (i32, i32) {
    %c0_i32 = arith.constant 0 : i32
    %c0_i32_0 = arith.constant 0 : i32
    %c0_i32_1 = arith.constant 0 : i32
    return %c0_i32, %c0_i32_0 : i32, i32
  }
  func.func @transform_10(%arg0: i32) -> (i32, i32) {
    %c0_i32 = arith.constant 0 : i32
    %c0_i32_0 = arith.constant 0 : i32
    %c0_i32_1 = arith.constant 0 : i32
    return %c0_i32, %c0_i32_0 : i32, i32
  }
  func.func @transform_11(%arg0: i32) -> (i32, i32) {
    %c0_i32 = arith.constant 0 : i32
    %c0_i32_0 = arith.constant 0 : i32
    %c0_i32_1 = arith.constant 0 : i32
    return %c0_i32, %c0_i32_0 : i32, i32
  }
  func.func @transform_12(%arg0: i32) -> (i32, i32) {
    %c0_i32 = arith.constant 0 : i32
    %c0_i32_0 = arith.constant 0 : i32
    %c0_i32_1 = arith.constant 0 : i32
    return %c0_i32, %c0_i32_0 : i32, i32
  }
  func.func @transform_13(%arg0: i32) -> (i32, i32) {
    %c0_i32 = arith.constant 0 : i32
    %c0_i32_0 = arith.constant 0 : i32
    %c0_i32_1 = arith.constant 0 : i32
    return %c0_i32, %c0_i32_0 : i32, i32
  }
  func.func @transform_14(%arg0: i32) -> (i32, i32, i32) {
    %c0_i32 = arith.constant 0 : i32
    %c0_i32_0 = arith.constant 0 : i32
    %c0_i32_1 = arith.constant 0 : i32
    return %arg0, %c0_i32, %c0_i32_0 : i32, i32, i32
  }
}

</mosaic_0001>

<bundles_post_ra>
// kernel: tpu_custom_call.1
= control target key start
LH: loop header
LB: loop body
LE: loop exit
PB: predicated region body
PF: predicated region fallthrough
CT: control target
= control target key end

     0   :  { %s6975_s0 = inlined_call_operand.vmem [shape: f32[16,8,1], index: 0, kind: input, shape index: {}]   ;;  %s6976_s1 = inlined_call_operand.hbm [shape: bf16[16,8,16], index: 1, kind: input, shape index: {}]   ;;  %s6977_s2 = inlined_call_operand.vmem [shape: f32[1,256], index: 2, kind: input, shape index: {}]   ;;  %s6978_s3 = inlined_call_operand.hbm [shape: bf16[16,256], index: 3, kind: input, shape index: {}]   ;;  %s6979_s4 = inlined_call_operand.vmem [shape: f32[1,256], index: 4, kind: input, shape index: {}]   ;;  %s6980_s5 = inlined_call_operand.vmem [shape: f32[1,256], index: 5, kind: input, shape index: {}]   ;;  %s6981_s6 = inlined_call_operand.vmem [shape: bf16[256,256], index: 6, kind: input, shape index: {}]   ;;  %s6982_s7 = inlined_call_operand.vmem [shape: f32[1,256], index: 7, kind: input, shape index: {}]   ;;  %s6983_s8 = inlined_call_operand.vmem [shape: f32[1,256], index: 8, kind: input, shape index: {}]   ;;  %s6984_s9 = inlined_call_operand.hbm [shape: bf16[256,256], index: 9, kind: input, shape index: {}]   ;;  %s6985_s10 = inlined_call_operand.vmem [shape: f32[1,256], index: 10, kind: input, shape index: {}]   ;;  %s6986_s11 = inlined_call_operand.vmem [shape: f32[1,256], index: 11, kind: input, shape index: {}]   ;;  %s6987_s12 = inlined_call_operand.vmem [shape: bf16[256,16], index: 12, kind: input, shape index: {}]   ;;  %s6988_s13 = inlined_call_operand.vmem [shape: f32[1,16], index: 13, kind: input, shape index: {}]   ;;  %s6989_s14 = inlined_call_operand.hbm [shape: f32[16,8,16], index: 14, kind: output, shape index: {}]  }
   0x1   :  { %7045 = sst [smem:[#allocation41_spill]] %s6978_s3 }
   0x2   :  { %7046 = sst [smem:[#allocation42_spill]] %s6984_s9 }
   0x3   :  { %7047 = sst [smem:[#allocation43_spill]] %s6989_s14 }
   0x4   :  { %19 = vsyncpa [#allocation3], 0 }
   0x5   :  { %21 = vsyncpa [#allocation3 + $0x1], 0 }
   0x6   :  { %22 = vsyncpa [#allocation6], 0 }
   0x7   :  { %23 = vsyncpa [#allocation4], 0 }
   0x8   :  { %25 = vsyncpa [#allocation4 + $0x1], 0  ;;  %s4701_s29 = smov 0   ;;  %s4703_s30 = smov 0  }
   0x9   :  { %s4705_s15 = smov 0   ;;  %s4707_s16 = smov 0  }
   0xa LB: > { %7048 = sst [smem:[#allocation12_spill]] %s4603_s29  ;;  %s4722_s17 = sadd.s32 4294967295, %s4615_s16   ;;  %s4615_s16 = sphi %s4707_s16, %s7222_s16   ;;  %s4611_s15 = sphi %s4705_s15, %s7224_s15   ;;  %s4607_s30 = sphi %s4703_s30, %s7226_s30   ;;  %s4603_s29 = sphi %s4701_s29, %s7225_s29  }
   0xb   : > { %7049 = sst [smem:[#allocation13_spill]] %s4611_s15  ;;  %s3820_s18 = sadd.s32 4294967294, %s4615_s16  }
   0xc   : > { %p77_p0 = scmp.ne.s32.totalorder %s4607_s30, %s4603_s29  ;;  %p78_p1 = scmp.eq.s32.totalorder %s4722_s17, 0 }
   0xd   : > { %p353_p2 = scmp.eq.s32.totalorder %s4722_s17, 1  ;;  %p359_p3 = scmp.eq.s32.totalorder %s3820_s18, 1 }
   0xe   : > { %p4731_p4 = por %p78_p1, %p77_p0  ;;  %p3821_p5 = scmp.ge.s32.totalorder %s4615_s16, 1 }
   0xf   : > { %p4736_p6 = por %p359_p3, %p77_p0  ;;  %p366_p7 = scmp.lt.s32.totalorder %s4615_s16, 3 }
  0x10   : > { %s7053_s3 = sld [smem:[#allocation41_spill]]  ;;  %s4617_s25 = smov [#allocation5]  }
  0x11   : > { %s7051_s20 = scalar_select %p4736_p6, 1, 0 }
  0x12   : > { %p4744_p8 = pnand %p3821_p5, %p366_p7  ;;  %s382_s26 = sshll.u32 %s4617_s25, 4  ;;  %s383_s26 = int_to_ptr.vmem [resolvable:$true] %s382_s26 }
  0x13   : > { %7052 = sst [smem:[#allocation14_spill]] %s7051_s20  ;;  %s4618_s21 = smov 128  }
  0x14   : > { %p4292_p9 = pneg %p4744_p8  ;;  %s7055_s9 = sld [smem:[#allocation42_spill]] }
  0x15   : > { %s4619_s22 = smov 8   ;;  %s4620_s25 = smov [#allocation7]  }
  0x16   : > { %s380_s23 = sshll.u32 %s7053_s3, 4  ;;  %p4293_p10 = pnand %p4292_p9, %p78_p1  ;;  %s381_s23 = int_to_ptr.hbm [resolvable:$true] %s380_s23 }
  0x17   : > { %s411_s3 = sshll.u32 %s4620_s25, 4  ;;  %s4757_s20 = sadd.s32 1, %s4615_s16   ;;  %s412_s3 = int_to_ptr.vmem [resolvable:$true] %s411_s3 }
  0x18   : > { %4295 = dma.hbm_to_vmem [thread:$0]  (!%p4293_p10), %s381_s23, 256, %s383_s26, [#allocation6], %s4618_s21, %s4618_s21, %s4619_s22  }
  0x19   : > { %7056 = sst [smem:[#allocation15_spill]] %s4757_s20  ;;  %s64_s29 = sadd.s32 1, %s4611_s15 }
  0x1a   : > { %s409_s18 = sshll.u32 %s7055_s9, 4  ;;  %s61_s14 = ssub.s32 %s4615_s16, %s4757_s20  ;;  %s410_s18 = int_to_ptr.hbm [resolvable:$true] %s409_s18 }
  0x1b   : > { %4298 = dma.hbm_to_vmem [thread:$0]  (!%p4293_p10), %s410_s18, 4096, %s412_s3, [#allocation6], %s4618_s21, %s4618_s21, %s4619_s22  }
  0x1c   : > { %p71_p12 = scmp.ne.s32.totalorder %s4611_s15, %s4607_s30  ;;  %p62_p13 = scmp.eq.s32.totalorder %s61_s14, 0 }
  0x1d   : > { %p72_p0 = scmp.eq.s32.totalorder %s4615_s16, 0  ;;  %p4309_p5 = scmp.lt.s32.totalorder %s4615_s16, 2 }
  0x1e   : > { %p4767_p3 = por %p353_p2, %p71_p12  ;;  %s446_s26 = sand.u32 1, %s4611_s15  }
  0x1f   : > { %s4773_s23 = scalar_select %p62_p13, %s4611_s15, %s64_s29  }
  0x20   : > { %p73_p7 = por %p72_p0, %p71_p12  ;;  %s3825_s28 = sshll.u32 %s446_s26, 5 }
  0x21   : > { %7058 = sst [smem:[#allocation16_spill]] %s4773_s23  ;;  %s4192_s3 = sshll.u32 %s4615_s16, 5 }
  0x22   : > { %s455_s22 = scalar_lea.hbm %s6976_s1, %s4192_s3  ;;  %s450_s25 = scalar_lea.vmem [#allocation2], %s3825_s28 }
  0x23   : > { %s458_s9 = sshll.u32 %s450_s25, 4  ;;  %s456_s14 = sshll.u32 %s455_s22, 4  ;;  %s459_s9 = int_to_ptr.vmem [resolvable:$true] %s458_s9  ;;  %s457_s14 = int_to_ptr.hbm [resolvable:$true] %s456_s14 }
  0x24   : > { %p4780_p2 = pnand %p4309_p5, %p73_p7  ;;  %s447_s29 = scalar_lea.sflag [#allocation3], %s446_s26 }
  0x25   : > { %s4515_s23 = sshra.s32 %s457_s14, 4  ;;  %s4522_s18 = scalar_lea.hbm %s6976_s1, 64  ;;  %s4516_s23 = int_to_ptr.hbm [resolvable:$true] %s4515_s23 }
  0x26   : > { %s4517_s15 = scalar_lea.hbm %s4516_s23, 32  ;;  %p4519_p10 = pneg %p4780_p2 }
  0x27   : > { %p4518_p9 = scmp.ne.s32.totalorder %s4516_s23, %s4517_s15  ;;  %p4523_p0 = scmp.lt.s32.totalorder %s4516_s23, %s6976_s1 }
  0x28   : > { %p4524_p5 = scmp.lt.s32.totalorder %s4522_s18, %s4517_s15 }
  0x29   : > { %p4520_p12 = pnand %p4519_p10, %p4518_p9 }
  0x2a   : > { %p4525_p7 = por %p4524_p5, %p4523_p0 }
  0x2b   : > { %p4521_p13 = pneg %p4520_p12 }
  0x2d   : > { %p4526_p11 = pnand %p4525_p7, %p4521_p13 }
  0x2f   : > { %4529 = shalt.err (!%p4526_p11)
}
  0x30   : > { %s4621_s26 = smov 64   ;;  %s4622_s25 = smov 4  }
  0x31   : > { %4302 = dma.hbm_to_vmem [thread:$0]  (!%p4780_p2), %s457_s14, 512, %s459_s9, %s447_s29, %s4621_s26, %s4621_s26, %s4622_s25  }
  0x32   : > { %470 = sbr.rel (%p4744_p8) target bundleno = 1029 (0x405), region = 76 }
  0x37   : > { %s4797_s3 = sand.u32 1, %s4607_s30  }
  0x38   : > { %s3829_s28 = sshll.u32 %s4797_s3, 5  ;;  %s473_s23 = scalar_lea.sflag [#allocation3], %s4797_s3 }
  0x39   : > { %s4801_s15 = scalar_lea.vmem [#allocation2], %s3829_s28 }
  0x3a   : > { %4590 = dma.done.wait (%p4731_p4), %s473_s23, 512  }
  0x3b   : > { %4592 = vsyncadd (%p4731_p4), %s473_s23, 4294966784 }
  0x3c   : > { %4594 = dma.done.wait (%p78_p1), [#allocation6], 4352  }
  0x3d   : > { %4596 = vsyncadd (%p78_p1), [#allocation6], 4294962944  ;;  %s3833_s9 = sshll.u32 %s4722_s17, 3  ;;  %v4623_v0 = vmov 0   ;;  %v3853_v2 = vld [vmem:[#allocation5] sm:$0xf] }
  0x3e   : > { %4354 = vset.pattern.permute.xlu0 %v4623_v0  ;;  %p538_p8 = scmp.lt.s32.totalorder %s3833_s9, 15  ;;  %4355 = vset.pattern.permute.xlu1 %v4623_v0  ;;  %v4198_v3 = vld [vmem:[#allocation5 + $0x4] sm:$0xf0]  ;;  %v4197_v5 = vld [vmem:[#allocation5 + $0x4] sm:$0xf]  ;;  %vm594_vm0 = vcmask 130048  }
  0x3f   : > { %4356 = vset.pattern.permute.xlu2 %v4623_v0  ;;  %v3854_v4 = vor.u32 %v4198_v3, %v3853_v2  ;;  %v3855_v6 = vld [vmem:[#allocation5 + $0x8] sm:$0xf0]  ;;  %v4193_v8 = vld [vmem:[%s4801_s15] sm:$0xff]  ;;  %v4195_v17 = vld [vmem:[%s4801_s15 + $0x10] sm:$0xff]  ;;  %vm1233_vm8 = vcmask 1040384   ;;  %s4279_s14 = sshll.u32 %s4722_s17, 6 }
  0x40   : > { %s7228_s9 = smov (!%p538_p8, %s3833_s9), 15  ;;  %v3858_v7 = vor.u32 %v4197_v5, %v3855_v6  ;;  %v4194_v14 = vld [vmem:[%s4801_s15 + $0x8] sm:$0xff]  ;;  %v4196_v18 = vld [vmem:[%s4801_s15 + $0x18] sm:$0xff]  ;;  %v665_v19 = vld [vmem:[%s6977_s2] sm:$0x3]  ;;  %s7218_s18 = sld [smem:[#allocation43_spill]] }
  0x41   : > { %s3834_s20 = sshll.u32 %s7228_s9, 3  ;;  %614 = vmatpush.bf16.msra.mxu0 %v3854_v4  ;;  %v4830_v21 = vperm.slane %v665_v19, 0  ;;  %v4832_v22 = vperm.slane %v665_v19, 1  ;;  %v4213_v44 = vld [vmem:[%s6981_s6 + $0x74] sm:$0xf]  ;;  %s3701_s25 = scalar_lea.sflag [#allocation4], %s4797_s3 }
  0x42   : > { %s541_s19 = scalar_lea.vmem %s6975_s0, %s3834_s20  ;;  %643 = vmatpush.bf16.msra.mxu1 %v3858_v7  ;;  %v3927_v45 = vld [vmem:[%s6981_s6 + $0x78] sm:$0xf0]  ;;  %v4229_v50 = vld [vmem:[%s6981_s6 + $0xf4] sm:$0xf]  ;;  %s3832_s20 = sshll.u32 %s4797_s3, 6 }
  0x43   : > { %v546_v1 = vld [vmem:[%s541_s19] sm:$0xff]  ;;  %v548_v9 = vld [vmem:[%s541_s19 + $0x10] sm:$0xff]  ;;  %v547_v10 = vld [vmem:[%s541_s19 + $0x8] sm:$0xff]  ;;  %v3930_v49 = vor.u32 %v4213_v44, %v3927_v45  ;;  %s6923_s24 = scalar_lea.vmem [#allocation8], %s3832_s20 }
  0x44   : > { %668 = vperm.xlu0 %4354, %v546_v1   ;;  %678 = vperm.xlu1 %4355, %v548_v9   ;;  %v549_v11 = vld [vmem:[%s541_s19 + $0x18] sm:$0xff]  ;;  %v552_v12 = vld [vmem:[%s541_s19 + $0x30] sm:$0xff]  ;;  %v550_v15 = vld [vmem:[%s541_s19 + $0x20] sm:$0xff]  ;;  %s3713_s22 = sshll.u32 %s6923_s24, 4  ;;  %s3714_s22 = int_to_ptr.vmem [resolvable:$true] %s3713_s22 }
  0x45   : > { %3859 = vmatmul.msk.bf16.vlgmr.msra.gmra.mxu0 %vm594_vm0, %v4193_v8  ;;  %3863 = vmatmul.msk.bf16.vlgmr.msra.gmra.mxu1 %vm594_vm0, %v4193_v8  ;;  %v553_v13 = vld [vmem:[%s541_s19 + $0x38] sm:$0xff]  ;;  %v551_v16 = vld [vmem:[%s541_s19 + $0x28] sm:$0xff] }
  0x46   : > { %688 = vperm.xlu2 %4356, %v550_v15   ;;  %v3991_v51 = vld [vmem:[%s6981_s6 + $0xf8] sm:$0xf0]  ;;  %1708 = vmatpush.bf16.msrb.mxu0 %v3930_v49  ;;  %s3712_s21 = scalar_lea.hbm %s7218_s18, %s4279_s14  ;;  %s4565_s9 = scalar_lea.hbm %s7218_s18, 128 }
  0x47   : > { %v3994_v56 = vor.u32 %v4229_v50, %v3991_v51  ;;  %s3715_s26 = sshll.u32 %s3712_s21, 4  ;;  %s3716_s26 = int_to_ptr.hbm [resolvable:$true] %s3715_s26 }
  0x48   : > { %s4559_s17 = sshra.s32 %s3716_s26, 4  ;;  %s4560_s17 = int_to_ptr.hbm [resolvable:$true] %s4559_s17 }
  0x49   : > { %1737 = vmatpush.bf16.msrb.mxu1 %v3994_v56  ;;  %s4561_s28 = scalar_lea.hbm %s4560_s17, 64  ;;  %p4566_p2 = scmp.lt.s32.totalorder %s4560_s17, %s7218_s18 }
  0x4a   : > { %p4562_p1 = scmp.ne.s32.totalorder %s4560_s17, %s4561_s28  ;;  %p4567_p9 = scmp.lt.s32.totalorder %s4565_s9, %s4561_s28 }
  0x4c   : > { %673 = vperm.xlu0 %4354, %v547_v10   ;;  %683 = vperm.xlu1 %4355, %v549_v11   ;;  %p4563_p4 = pnand %p4562_p1, %p4767_p3  ;;  %p4568_p10 = por %p4567_p9, %p4566_p2 }
  0x4e   : > { %693 = vperm.xlu2 %4356, %v551_v16   ;;  %p4564_p11 = pneg %p4563_p4 }
  0x50   : > { %p4569_p12 = pnand %p4568_p10, %p4564_p11 }
  0x54   : > { %698 = vperm.xlu0 %4354, %v552_v12   ;;  %703 = vperm.xlu1 %4355, %v553_v13  }
  0x55   : > { %3860 = vmatmul.msk.bf16.gmra.mxu0 %vm594_vm0, %v4194_v14  ;;  %3864 = vmatmul.msk.bf16.gmra.mxu1 %vm594_vm0, %v4194_v14 }
  0x65   : > { %3861 = vmatmul.msk.bf16.gmra.mxu0 %vm594_vm0, %v4195_v17  ;;  %3865 = vmatmul.msk.bf16.gmra.mxu1 %vm594_vm0, %v4195_v17 }
  0x75   : > { %3862 = vmatmul.msk.bf16.gmra.mxu0 %vm594_vm0, %v4196_v18  ;;  %3866 = vmatmul.msk.bf16.gmra.mxu1 %vm594_vm0, %v4196_v18 }
  0xa0   : > { %v689_v1 = vpop.permute.xlu2 %688 }
  0xb6   : > { %v669_v20 = vpop.permute.xlu0 %668  ;;  %v679_v23 = vpop.permute.xlu1 %678 }
  0xb7   : > { %v711_v24 = vmul.f32 %v4830_v21, %v669_v20  ;;  %v712_v25 = vmul.f32 %v4832_v22, %v669_v20  ;;  %v715_v46 = vmul.f32 %v4830_v21, %v679_v23  ;;  %v716_v57 = vmul.f32 %v4832_v22, %v679_v23 }
  0xbe   : > { %v674_v26 = vpop.permute.xlu0 %673  ;;  %v684_v34 = vpop.permute.xlu1 %683 }
  0xbf   : > { %v713_v37 = vmul.f32 %v4830_v21, %v674_v26  ;;  %v714_v40 = vmul.f32 %v4832_v22, %v674_v26  ;;  %v4877_v3 = vmul.f32 %v4830_v21, %v684_v34  ;;  %v4880_v4 = vmul.f32 %v4832_v22, %v684_v34  ;;  %v3919_v34 = vld [vmem:[%s6981_s6 + $0x68] sm:$0xf0] }
  0xc0   : > { %v4897_v26 = vmul.f32 %v4830_v21, %v689_v1 }
  0xc2   : > { %v616_v27 = vpop.f32.mrf.mxu0  ;;  %v645_v29 = vpop.f32.mrf.mxu1 }
  0xc3   : > { %v4836_v28 = vadd.f32 %v711_v24, %v616_v27  ;;  %v4838_v30 = vadd.f32 %v712_v25, %v645_v29 }
  0xc5   : > { %v857_v31 = vmul.f32 %v4836_v28, %v4836_v28  ;;  %v751_v32 = vrot.slane %v4838_v30, 4  ;;  %v858_v33 = vmul.f32 %v4838_v30, %v4838_v30  ;;  %v745_v38 = vrot.slane %v4836_v28, 4 }
  0xc6   : > { %v699_v54 = vpop.permute.xlu0 %698  ;;  %v704_v10 = vpop.permute.xlu1 %703 }
  0xc7   : > { %v752_v35 = vadd.f32 %v751_v32, %v4838_v30  ;;  %v879_v36 = vrot.slane %v858_v33, 4  ;;  %v873_v39 = vrot.slane %v857_v31, 4  ;;  %v746_v58 = vadd.f32 %v745_v38, %v4836_v28 }
  0xc8   : > { %v4874_v2 = vmul.f32 %v4830_v21, %v699_v54  ;;  %v4884_v13 = vmul.f32 %v4832_v22, %v699_v54  ;;  %v4889_v20 = vmul.f32 %v4830_v21, %v704_v10  ;;  %v4892_v23 = vmul.f32 %v4832_v22, %v704_v10 }
  0xc9   : > { %v753_v41 = vrot.slane %v752_v35, 2  ;;  %v880_v42 = vadd.f32 %v879_v36, %v858_v33  ;;  %v874_v59 = vadd.f32 %v873_v39, %v857_v31  ;;  %v747_v11 = vrot.slane %v746_v58, 2  ;;  %v4211_v33 = vld [vmem:[%s6981_s6 + $0x64] sm:$0xf] }
  0xca   : > { %v618_v43 = vpop.f32.mrf.mxu0  ;;  %v647_v48 = vpop.f32.mrf.mxu1  ;;  %v3922_v45 = vor.u32 %v4211_v33, %v3919_v34 }
  0xcb   : > { %v4856_v47 = vadd.f32 %v713_v37, %v618_v43  ;;  %v754_v52 = vadd.f32 %v753_v41, %v752_v35  ;;  %v881_v53 = vrot.slane %v880_v42, 2  ;;  %v4864_v55 = vadd.f32 %v714_v40, %v647_v48 }
  0xcc   : > { %v875_v12 = vrot.slane %v874_v59, 2  ;;  %v4907_v35 = vadd.f32 %v747_v11, %v746_v58  ;;  %1709 = vmatpush.bf16.msrb.mxu0 %v3922_v45 }
  0xcd   : > { %7060 = vst [vmem:[#allocation17_spill] sm:$0xff] %v4864_v55  ;;  %v859_v60 = vmul.f32 %v4856_v47, %v4856_v47  ;;  %v755_v61 = vrot.slane %v754_v52, 1  ;;  %v882_v62 = vadd.f32 %v881_v53, %v880_v42  ;;  %v763_v63 = vrot.slane %v4864_v55, 4 }
  0xce   : > { %v860_v0 = vmul.f32 %v4864_v55, %v4864_v55  ;;  %v876_v36 = vadd.f32 %v875_v12, %v874_v59  ;;  %v757_v37 = vrot.slane %v4856_v47, 4  ;;  %v749_v53 = vrot.slane %v4907_v35, 1 }
  0xcf   : > { %v885_v5 = vrot.slane %v859_v60, 4  ;;  %v756_v6 = vadd.f32 %v755_v61, %v754_v52  ;;  %v883_v7 = vrot.slane %v882_v62, 1  ;;  %v764_v8 = vadd.f32 %v763_v63, %v4864_v55  ;;  %v694_v52 = vpop.permute.xlu2 %693  ;;  %v3983_v63 = vld [vmem:[%s6981_s6 + $0xe8] sm:$0xf0] }
  0xd0   : > { %v891_v9 = vrot.slane %v860_v0, 4  ;;  %v877_v54 = vrot.slane %v876_v36, 1  ;;  %v758_v56 = vadd.f32 %v757_v37, %v4856_v47  ;;  %v4940_v10 = vmul.f32 %v4830_v21, %v694_v52 }
  0xd1   : > { %v886_v14 = vadd.f32 %v885_v5, %v859_v60  ;;  %v4886_v15 = vmul.f32 0.125, %v756_v6  ;;  %v884_v16 = vadd.f32 %v883_v7, %v882_v62  ;;  %v765_v17 = vrot.slane %v764_v8, 2  ;;  %v4227_v62 = vld [vmem:[%s6981_s6 + $0xe4] sm:$0xf] }
  0xd2   : > { %v892_v18 = vadd.f32 %v891_v9, %v860_v0  ;;  %v621_v19 = vpop.f32.mrf.mxu0  ;;  %v650_v25 = vpop.f32.mrf.mxu1  ;;  %v3911_v9 = vld [vmem:[%s6981_s6 + $0x58] sm:$0xf0] }
  0xd3   : > { %v4894_v24 = vadd.f32 %v715_v46, %v621_v19  ;;  %v970_v27 = vmul.f32 0.125, %v884_v16  ;;  %v986_v29 = vmul.f32 %v4886_v15, %v4886_v15  ;;  %v766_v31 = vadd.f32 %v765_v17, %v764_v8  ;;  %v4209_v8 = vld [vmem:[%s6981_s6 + $0x54] sm:$0xf] }
  0xd4   : > { %v893_v32 = vrot.slane %v892_v18, 2  ;;  %v887_v39 = vrot.slane %v886_v14, 2  ;;  %v4912_v42 = vadd.f32 %v716_v57, %v650_v25  ;;  %v4916_v46 = vmul.f32 %v4832_v22, %v689_v1  ;;  %v4225_v17 = vld [vmem:[%s6981_s6 + $0xd4] sm:$0xf] }
  0xd5   : > { %7061 = vst [vmem:[#allocation18_spill] sm:$0xff] %v4894_v24  ;;  %v861_v38 = vmul.f32 %v4894_v24, %v4894_v24  ;;  %v767_v40 = vrot.slane %v766_v31, 1  ;;  %v1002_v43 = vsub.f32 %v970_v27, %v986_v29  ;;  %v769_v44 = vrot.slane %v4894_v24, 4 }
  0xd6   : > { %v894_v41 = vadd.f32 %v893_v32, %v892_v18  ;;  %7062 = vst [vmem:[#allocation19_spill] sm:$0xff] %v4912_v42  ;;  %v775_v51 = vrot.slane %v4912_v42, 4  ;;  %v862_v57 = vmul.f32 %v4912_v42, %v4912_v42  ;;  %v888_v58 = vadd.f32 %v887_v39, %v886_v14  ;;  %v3975_v18 = vld [vmem:[%s6981_s6 + $0xd8] sm:$0xf0] }
  0xd7   : > { %v768_v48 = vadd.f32 %v767_v40, %v766_v31  ;;  %v897_v50 = vrot.slane %v861_v38, 4  ;;  %v1018_v1 = vmax.f32 %v1002_v43, 0.0  ;;  %v770_v5 = vadd.f32 %v769_v44, %v4894_v24 }
  0xd8   : > { %v895_v49 = vrot.slane %v894_v41, 1  ;;  %v776_v61 = vadd.f32 %v775_v51, %v4912_v42  ;;  %v903_v6 = vrot.slane %v862_v57, 4  ;;  %v878_v19 = vadd.f32 %v877_v54, %v876_v36 }
  0xd9   : > { %v4923_v59 = vmul.f32 0.125, %v768_v48  ;;  %v898_v14 = vadd.f32 %v897_v50, %v861_v38  ;;  %v759_v25 = vrot.slane %v758_v56, 2  ;;  %v3986_v29 = vor.u32 %v4227_v62, %v3983_v63 }
  0xda   : > { %v896_v60 = vadd.f32 %v895_v49, %v894_v41  ;;  %v623_v0 = vpop.f32.mrf.mxu0  ;;  %v652_v7 = vpop.f32.mrf.mxu1  ;;  %v777_v16 = vrot.slane %v776_v61, 2  ;;  %v904_v27 = vadd.f32 %v903_v6, %v862_v57  ;;  %v889_v21 = vrot.slane %v888_v58, 1 }
  0xdb   : > { %v988_v12 = vmul.f32 %v4923_v59, %v4923_v59  ;;  %v4951_v32 = vadd.f32 %v4877_v3, %v623_v0  ;;  %v4954_v33 = vadd.f32 %v4880_v4, %v652_v7  ;;  %v4956_v34 = vadd.f32 1e-05, %v1018_v1  ;;  %1738 = vmatpush.bf16.msrb.mxu1 %v3986_v29 }
  0xdc   : > { %v972_v11 = vmul.f32 0.125, %v896_v60  ;;  %v778_v31 = vadd.f32 %v777_v16, %v776_v61  ;;  %v905_v37 = vrot.slane %v904_v27, 2  ;;  %v3914_v38 = vor.u32 %v4209_v8, %v3911_v9 }
  0xdd   : > { %7063 = vst [vmem:[#allocation20_spill] sm:$0xff] %v4951_v32  ;;  %v3978_v39 = vor.u32 %v4225_v17, %v3975_v18  ;;  %v771_v41 = vrot.slane %v770_v5, 2  ;;  %v899_v36 = vrot.slane %v898_v14, 2  ;;  %v863_v43 = vmul.f32 %v4951_v32, %v4951_v32 }
  0xde   : > { %7064 = vst [vmem:[#allocation21_spill] sm:$0xff] %v4954_v33  ;;  %v1004_v40 = vsub.f32 %v972_v11, %v988_v12  ;;  %v779_v44 = vrot.slane %v778_v31, 1  ;;  %v787_v45 = vrot.slane %v4954_v33, 4  ;;  %v864_v3 = vmul.f32 %v4954_v33, %v4954_v33  ;;  %1710 = vmatpush.bf16.msrb.mxu0 %v3914_v38 }
  0xdf   : > { %v4964_v4 = vmul.f32 %v4832_v22, %v694_v52  ;;  %v4966_v48 = vadd.f32 %v759_v25, %v758_v56  ;;  %v906_v49 = vadd.f32 %v905_v37, %v904_v27  ;;  %v909_v50 = vrot.slane %v863_v43, 4  ;;  %1739 = vmatpush.bf16.msrb.mxu1 %v3978_v39 }
  0xe0   : > { %v4969_v54 = vadd.f32 %v749_v53, %v4907_v35  ;;  %4358 = vrsqrt.f32 %v4956_v34  ;;  %v890_v57 = vadd.f32 %v889_v21, %v888_v58  ;;  %v781_v60 = vrot.slane %v4951_v32, 4 }
  0xe1   : > { %v788_v61 = vadd.f32 %v787_v45, %v4954_v33  ;;  %v4974_v63 = vmul.f32 0.125, %v878_v19  ;;  %v1020_v22 = vmax.f32 %v1004_v40, 0.0  ;;  %v4976_v52 = vadd.f32 %v771_v41, %v770_v5 }
  0xe2   : > { %v626_v51 = vpop.f32.mrf.mxu0  ;;  %v655_v62 = vpop.f32.mrf.mxu1  ;;  %v900_v56 = vadd.f32 %v899_v36, %v898_v14  ;;  %v780_v0 = vadd.f32 %v779_v44, %v778_v31  ;;  %v915_v6 = vrot.slane %v864_v3, 4  ;;  %v907_v58 = vrot.slane %v906_v49, 1 }
  0xe3   : > { %v789_v1 = vrot.slane %v788_v61, 2  ;;  %v4979_v35 = vadd.f32 %v4897_v26, %v626_v51  ;;  %v910_v7 = vadd.f32 %v909_v50, %v863_v43  ;;  %v4983_v8 = vadd.f32 %v4916_v46, %v655_v62 }
  0xe4   : > { %v4985_v9 = vmul.f32 0.125, %v890_v57  ;;  %v782_v11 = vadd.f32 %v781_v60, %v4951_v32  ;;  %v916_v12 = vadd.f32 %v915_v6, %v864_v3  ;;  %v901_v16 = vrot.slane %v900_v56, 1  ;;  %v4207_v3 = vld [vmem:[%s6981_s6 + $0x44] sm:$0xf]  ;;  %v3903_v57 = vld [vmem:[%s6981_s6 + $0x48] sm:$0xf0] }
  0xe5   : > { %7065 = vst [vmem:[#allocation22_spill] sm:$0xff] %v4979_v35  ;;  %v790_v5 = vadd.f32 %v789_v1, %v788_v61  ;;  %v865_v26 = vmul.f32 %v4979_v35, %v4979_v35  ;;  %v799_v17 = vrot.slane %v4983_v8, 4  ;;  %v4994_v19 = vadd.f32 1e-05, %v1020_v22 }
  0xe6   : > { %7066 = vst [vmem:[#allocation23_spill] sm:$0xff] %v4983_v8  ;;  %v4992_v18 = vpop.eup %4358  ;;  %v4996_v46 = vmul.f32 0.125, %v780_v0  ;;  %v917_v27 = vrot.slane %v916_v12, 2  ;;  %v908_v29 = vadd.f32 %v907_v58, %v906_v49  ;;  %v911_v21 = vrot.slane %v910_v7, 2  ;;  %v3967_v0 = vld [vmem:[%s6981_s6 + $0xc8] sm:$0xf0] }
  0xe7   : > { %v791_v25 = vrot.slane %v790_v5, 1  ;;  %v800_v31 = vadd.f32 %v799_v17, %v4983_v8  ;;  %v866_v37 = vmul.f32 %v4983_v8, %v4983_v8  ;;  %v783_v38 = vrot.slane %v782_v11, 2  ;;  %v4214_v17 = vld [vmem:[%s6981_s6 + $0x74] sm:$0xf0] }
  0xe8   : > { %7067 = vst [vmem:[#allocation24_spill] sm:$0xff] %v4996_v46  ;;  %v918_v40 = vadd.f32 %v917_v27, %v916_v12  ;;  %v921_v41 = vrot.slane %v865_v26, 4  ;;  %v5003_v36 = vmul.f32 %v4992_v18, %v4956_v34  ;;  %v902_v43 = vadd.f32 %v901_v16, %v900_v56  ;;  %v4223_v56 = vld [vmem:[%s6981_s6 + $0xc4] sm:$0xf] }
  0xe9   : > { %v792_v39 = vadd.f32 %v791_v25, %v790_v5  ;;  %v793_v44 = vrot.slane %v4979_v35, 4  ;;  %v801_v45 = vrot.slane %v800_v31, 2  ;;  %4360 = vrsqrt.f32 %v4994_v19 }
  0xea   : > { %v919_v50 = vrot.slane %v918_v40, 1  ;;  %v927_v51 = vrot.slane %v866_v37, 4  ;;  %v974_v60 = vmul.f32 0.125, %v908_v29  ;;  %v990_v61 = vmul.f32 %v4996_v46, %v4996_v46  ;;  %v628_v1 = vpop.f32.mrf.mxu0  ;;  %v657_v16 = vpop.f32.mrf.mxu1 }
  0xeb   : > { %v5010_v49 = vmul.f32 0.125, %v792_v39  ;;  %v912_v62 = vadd.f32 %v911_v21, %v910_v7  ;;  %v802_v22 = vadd.f32 %v801_v45, %v800_v31  ;;  %v5023_v6 = vadd.f32 %v783_v38, %v782_v11  ;;  %v3925_v7 = vld [vmem:[%s6981_s6 + $0x70] sm:$0xf] }
  0xec   : > { %v920_v58 = vadd.f32 %v919_v50, %v918_v40  ;;  %v922_v5 = vadd.f32 %v921_v41, %v865_v26  ;;  %v928_v12 = vadd.f32 %v927_v51, %v866_v37  ;;  %v794_v27 = vadd.f32 %v793_v44, %v4979_v35 }
  0xed   : > { %7068 = vst [vmem:[#allocation25_spill] sm:$0xff] %v5010_v49  ;;  %v992_v25 = vmul.f32 %v5010_v49, %v5010_v49  ;;  %v803_v29 = vrot.slane %v802_v22, 1  ;;  %v3906_v11 = vor.u32 %v4207_v3, %v3903_v57  ;;  %v3970_v26 = vor.u32 %v4223_v56, %v3967_v0  ;;  %v4230_v57 = vld [vmem:[%s6981_s6 + $0xf4] sm:$0xf0]  ;;  %v4205_v56 = vld [vmem:[%s6981_s6 + $0x34] sm:$0xf] }
  0xee   : > { %v976_v21 = vmul.f32 0.125, %v920_v58  ;;  %v929_v31 = vrot.slane %v928_v12, 2  ;;  %v5035_v37 = vadd.f32 %v4940_v10, %v628_v1  ;;  %v1006_v38 = vsub.f32 %v974_v60, %v990_v61  ;;  %v3989_v10 = vld [vmem:[%s6981_s6 + $0xf0] sm:$0xf] }
  0xef   : > { %v913_v39 = vrot.slane %v912_v62, 1  ;;  %1711 = vmatpush.bf16.msrb.mxu0 %v3906_v11  ;;  %v5038_v40 = vadd.f32 %v4964_v4, %v657_v16  ;;  %v3926_v41 = vor.u32 %v4214_v17, %v3925_v7  ;;  %v5040_v45 = vpop.eup %4360  ;;  %v923_v50 = vrot.slane %v922_v5, 2  ;;  %1740 = vmatpush.bf16.msrb.mxu1 %v3970_v26  ;;  %v4221_v26 = vld [vmem:[%s6981_s6 + $0xb4] sm:$0xf] }
  0xf0   : > { %7069 = vst [vmem:[#allocation26_spill] sm:$0xff] %v5035_v37  ;;  %v804_v51 = vadd.f32 %v803_v29, %v802_v22  ;;  %v930_v44 = vadd.f32 %v929_v31, %v928_v12  ;;  %v867_v3 = vmul.f32 %v5035_v37, %v5035_v37  ;;  %v5050_v4 = vmul.f32 0.125, %v902_v43  ;;  %v3895_v43 = vld [vmem:[%s6981_s6 + $0x38] sm:$0xf0] }
  0xf1   : > { %7070 = vst [vmem:[#allocation27_spill] sm:$0xff] %v5038_v40  ;;  %v795_v60 = vrot.slane %v794_v27, 2  ;;  %v811_v61 = vrot.slane %v5038_v40, 4  ;;  %v868_v22 = vmul.f32 %v5038_v40, %v5038_v40  ;;  %1650 = vmatpush.bf16.msra.mxu2 %v3926_v41  ;;  %v1008_v0 = vsub.f32 %v976_v21, %v992_v25  ;;  %v3959_v41 = vld [vmem:[%s6981_s6 + $0xb8] sm:$0xf0] }
  0xf2   : > { %v931_v1 = vrot.slane %v930_v44, 1  ;;  %v805_v58 = vrot.slane %v5035_v37, 4  ;;  %v933_v12 = vrot.slane %v867_v3, 4  ;;  %v5064_v16 = vmul.f32 %v5040_v45, %v4994_v19 }
  0xf3   : > { %v1022_v7 = vmax.f32 %v1006_v38, 0.0  ;;  %v812_v29 = vadd.f32 %v811_v61, %v5038_v40  ;;  %v914_v11 = vadd.f32 %v913_v39, %v912_v62  ;;  %v924_v31 = vadd.f32 %v923_v50, %v922_v5  ;;  %v3917_v62 = vld [vmem:[%s6981_s6 + $0x60] sm:$0xf]  ;;  %v4212_v5 = vld [vmem:[%s6981_s6 + $0x64] sm:$0xf0] }
  0xf4   : > { %v5068_v25 = vmul.f32 0.125, %v804_v51  ;;  %v932_v21 = vadd.f32 %v931_v1, %v930_v44  ;;  %v939_v53 = vrot.slane %v868_v22, 4  ;;  %v3990_v38 = vor.u32 %v4230_v57, %v3989_v10  ;;  %v3981_v61 = vld [vmem:[%s6981_s6 + $0xe0] sm:$0xf]  ;;  %v4228_v10 = vld [vmem:[%s6981_s6 + $0xe4] sm:$0xf0]  ;;  %v631_v57 = vpop.f32.mrf.mxu0 }
  0xf5   : > { %v813_v14 = vrot.slane %v812_v29, 2  ;;  %v3898_v8 = vor.u32 %v4205_v56, %v3895_v43  ;;  %v1024_v39 = vmax.f32 %v1008_v0, 0.0  ;;  %v5082_v50 = vadd.f32 %v795_v60, %v794_v27  ;;  %v660_v60 = vpop.f32.mrf.mxu1  ;;  %v4210_v0 = vld [vmem:[%s6981_s6 + $0x54] sm:$0xf0] }
  0xf6   : > { %7071 = vst [vmem:[#allocation28_spill] sm:$0xff] %v5068_v25  ;;  %v806_v51 = vadd.f32 %v805_v58, %v5035_v37  ;;  %v934_v44 = vadd.f32 %v933_v12, %v867_v3  ;;  %v5091_v56 = vadd.f32 1e-05, %v1022_v7  ;;  %v940_v43 = vadd.f32 %v939_v53, %v868_v22  ;;  %1679 = vmatpush.bf16.msra.mxu3 %v3990_v38  ;;  %v3909_v3 = vld [vmem:[%s6981_s6 + $0x50] sm:$0xf] }
  0xf7   : > { %v814_v1 = vadd.f32 %v813_v14, %v812_v29  ;;  %1712 = vmatpush.bf16.msrb.mxu0 %v3898_v8  ;;  %v3962_v27 = vor.u32 %v4221_v26, %v3959_v41  ;;  %v925_v58 = vrot.slane %v924_v31, 1  ;;  %v978_v12 = vmul.f32 0.125, %v932_v21 }
  0xf8   : > { %v994_v7 = vmul.f32 %v5068_v25, %v5068_v25  ;;  %v3918_v17 = vor.u32 %v4212_v5, %v3917_v62  ;;  %v941_v53 = vrot.slane %v940_v43, 2  ;;  %v3982_v8 = vor.u32 %v4228_v10, %v3981_v61 }
  0xf9   : > { %v815_v14 = vrot.slane %v814_v1, 1  ;;  %1741 = vmatpush.bf16.msrb.mxu1 %v3962_v27  ;;  %v5102_v22 = vadd.f32 %v4874_v2, %v631_v57  ;;  %v5104_v29 = vadd.f32 1e-05, %v1024_v39  ;;  %v935_v26 = vrot.slane %v934_v44, 2  ;;  %v4226_v39 = vld [vmem:[%s6981_s6 + $0xd4] sm:$0xf0] }
  0xfa   : > { %1651 = vmatpush.bf16.msra.mxu2 %v3918_v17  ;;  %v5107_v41 = vadd.f32 %v4884_v13, %v660_v60  ;;  %v3910_v38 = vor.u32 %v4210_v0, %v3909_v3  ;;  %v807_v21 = vrot.slane %v806_v51, 2  ;;  %v942_v37 = vadd.f32 %v941_v53, %v940_v43  ;;  %1680 = vmatpush.bf16.msra.mxu3 %v3982_v8  ;;  %v3973_v13 = vld [vmem:[%s6981_s6 + $0xd0] sm:$0xf]  ;;  %v3887_v43 = vld [vmem:[%s6981_s6 + $0x28] sm:$0xf0] }
  0xfb   : > { %7072 = vst [vmem:[#allocation29_spill] sm:$0xff] %v5102_v22  ;;  %v816_v40 = vadd.f32 %v815_v14, %v814_v1  ;;  %v869_v62 = vmul.f32 %v5102_v22, %v5102_v22  ;;  %4362 = vrsqrt.f32 %v5091_v56  ;;  %v5112_v5 = vmul.f32 0.125, %v914_v11  ;;  %v4203_v11 = vld [vmem:[%s6981_s6 + $0x24] sm:$0xf]  ;;  %v3901_v27 = vld [vmem:[%s6981_s6 + $0x40] sm:$0xf] }
  0xfc   : > { %7073 = vst [vmem:[#allocation30_spill] sm:$0xff] %v5107_v41  ;;  %v823_v2 = vrot.slane %v5107_v41, 4  ;;  %v870_v17 = vmul.f32 %v5107_v41, %v5107_v41  ;;  %v926_v10 = vadd.f32 %v925_v58, %v924_v31  ;;  %v1010_v57 = vsub.f32 %v978_v12, %v994_v7  ;;  %v4208_v60 = vld [vmem:[%s6981_s6 + $0x44] sm:$0xf0]  ;;  %v3965_v31 = vld [vmem:[%s6981_s6 + $0xc0] sm:$0xf]  ;;  %v633_v35 = vpop.f32.mrf.mxu0 }
  0xfd   : > { %v943_v1 = vrot.slane %v942_v37, 1  ;;  %4364 = vrsqrt.f32 %v5104_v29  ;;  %v936_v3 = vadd.f32 %v935_v26, %v934_v44  ;;  %v945_v0 = vrot.slane %v869_v62, 4  ;;  %v4219_v12 = vld [vmem:[%s6981_s6 + $0xa4] sm:$0xf]  ;;  %v3951_v7 = vld [vmem:[%s6981_s6 + $0xa8] sm:$0xf0] }
  0xfe   : > { %v824_v58 = vadd.f32 %v823_v2, %v5107_v41  ;;  %1652 = vmatpush.bf16.msra.mxu2 %v3910_v38  ;;  %v5147_v14 = vadd.f32 %v807_v21, %v806_v51  ;;  %v5149_v53 = vmul.f32 0.125, %v816_v40  ;;  %v817_v8 = vrot.slane %v5102_v22, 4  ;;  %v4224_v44 = vld [vmem:[%s6981_s6 + $0xc4] sm:$0xf0]  ;;  %v662_v51 = vpop.f32.mrf.mxu1  ;;  %v3893_v40 = vld [vmem:[%s6981_s6 + $0x30] sm:$0xf] }
  0xff   : > { %v951_v61 = vrot.slane %v870_v17, 4  ;;  %v944_v26 = vadd.f32 %v943_v1, %v942_v37  ;;  %v3974_v2 = vor.u32 %v4226_v39, %v3973_v13  ;;  %v3890_v41 = vor.u32 %v4203_v11, %v3887_v43  ;;  %v4206_v21 = vld [vmem:[%s6981_s6 + $0x34] sm:$0xf0] }
 0x100   : > { %7074 = vst [vmem:[#allocation31_spill] sm:$0xff] %v5149_v53  ;;  %v825_v38 = vrot.slane %v824_v58, 2  ;;  %v1026_v25 = vmax.f32 %v1010_v57, 0.0  ;;  %v946_v33 = vadd.f32 %v945_v0, %v869_v62  ;;  %v3954_v49 = vor.u32 %v4219_v12, %v3951_v7 }
 0x101   : > { %v952_v42 = vadd.f32 %v951_v61, %v870_v17  ;;  %v5161_v32 = vpop.eup %4362  ;;  %v937_v37 = vrot.slane %v936_v3, 1  ;;  %1681 = vmatpush.bf16.msra.mxu3 %v3974_v2  ;;  %1713 = vmatpush.bf16.msrb.mxu0 %v3890_v41  ;;  %v3902_v13 = vor.u32 %v4208_v60, %v3901_v27  ;;  %v3966_v39 = vor.u32 %v4224_v44, %v3965_v31 }
 0x102   : > { %v826_v1 = vadd.f32 %v825_v38, %v824_v58  ;;  %v996_v62 = vmul.f32 %v5149_v53, %v5149_v53  ;;  %v818_v17 = vadd.f32 %v817_v8, %v5102_v22  ;;  %1742 = vmatpush.bf16.msrb.mxu1 %v3954_v49  ;;  %v5167_v57 = vadd.f32 %v4889_v20, %v633_v35  ;;  %v4220_v53 = vld [vmem:[%s6981_s6 + $0xa4] sm:$0xf0] }
 0x103   : > { %v953_v61 = vrot.slane %v952_v42, 2  ;;  %v5169_v11 = vpop.eup %4364  ;;  %v980_v43 = vmul.f32 0.125, %v944_v26  ;;  %1653 = vmatpush.bf16.msra.mxu2 %v3902_v13  ;;  %v5172_v58 = vadd.f32 %v4892_v23, %v662_v51  ;;  %v3894_v41 = vor.u32 %v4206_v21, %v3893_v40  ;;  %v3957_v23 = vld [vmem:[%s6981_s6 + $0xb0] sm:$0xf]  ;;  %v3879_v40 = vld [vmem:[%s6981_s6 + $0x18] sm:$0xf0] }
 0x104   : > { %7075 = vst [vmem:[#allocation32_spill] sm:$0xff] %v5167_v57  ;;  %v827_v0 = vrot.slane %v826_v1, 1  ;;  %v5176_v27 = vmul.f32 %v5161_v32, %v5091_v56  ;;  %v5178_v60 = vadd.f32 1e-05, %v1026_v25  ;;  %v947_v31 = vrot.slane %v946_v33, 2 }
 0x105   : > { %7076 = vst [vmem:[#allocation33_spill] sm:$0xff] %v5172_v58  ;;  %v954_v49 = vadd.f32 %v953_v61, %v952_v42  ;;  %v938_v12 = vadd.f32 %v937_v37, %v936_v3  ;;  %1682 = vmatpush.bf16.msra.mxu3 %v3966_v39  ;;  %v871_v35 = vmul.f32 %v5167_v57, %v5167_v57  ;;  %v835_v7 = vrot.slane %v5172_v58, 4  ;;  %v4222_v42 = vld [vmem:[%s6981_s6 + $0xb4] sm:$0xf0]  ;;  %v3885_v21 = vld [vmem:[%s6981_s6 + $0x20] sm:$0xf] }
 0x106   : > { %v828_v20 = vadd.f32 %v827_v0, %v826_v1  ;;  %v5186_v8 = vmul.f32 0.125, %v926_v10  ;;  %v819_v44 = vrot.slane %v818_v17, 2  ;;  %v872_v25 = vmul.f32 %v5172_v58, %v5172_v58  ;;  %v4201_v10 = vld [vmem:[%s6981_s6 + $0x14] sm:$0xf]  ;;  %v4204_v37 = vld [vmem:[%s6981_s6 + $0x24] sm:$0xf0] }
 0x107   : > { %v955_v26 = vrot.slane %v954_v49, 1  ;;  %v5195_v3 = vmul.f32 %v5169_v11, %v5104_v29  ;;  %v1012_v2 = vsub.f32 %v980_v43, %v996_v62  ;;  %v836_v51 = vadd.f32 %v835_v7, %v5172_v58  ;;  %1654 = vmatpush.bf16.msra.mxu2 %v3894_v41  ;;  %v4217_v62 = vld [vmem:[%s6981_s6 + $0x94] sm:$0xf]  ;;  %v3943_v61 = vld [vmem:[%s6981_s6 + $0x98] sm:$0xf0] }
 0x108   : > { %4366 = vrsqrt.f32 %v5178_v60  ;;  %v948_v1 = vadd.f32 %v947_v31, %v946_v33  ;;  %v829_v13 = vrot.slane %v5167_v57, 4  ;;  %v963_v39 = vrot.slane %v872_v25, 4  ;;  %v3949_v33 = vld [vmem:[%s6981_s6 + $0xa0] sm:$0xf] }
 0x109   : > { %v5219_v43 = vmul.f32 0.125, %v938_v12  ;;  %v5221_v0 = vmul.f32 0.125, %v828_v20  ;;  %v957_v41 = vrot.slane %v871_v35, 4  ;;  %v837_v7 = vrot.slane %v836_v51, 2  ;;  %v3877_v12 = vld [vmem:[%s6981_s6 + $0x10] sm:$0xf] }
 0x10a   : > { %v5226_v31 = vadd.f32 %v819_v44, %v818_v17  ;;  %v956_v38 = vadd.f32 %v955_v26, %v954_v49  ;;  %v964_v58 = vadd.f32 %v963_v39, %v872_v25  ;;  %v3958_v22 = vor.u32 %v4222_v42, %v3957_v23  ;;  %v4202_v20 = vld [vmem:[%s6981_s6 + $0x14] sm:$0xf0]  ;;  %v4199_v49 = vld [vmem:[%s6981_s6 + $0x4] sm:$0xf]  ;;  %v3871_v23 = vld [vmem:[%s6981_s6 + $0x8] sm:$0xf0] }
 0x10b   : > { %7077 = vst [vmem:[#allocation34_spill] sm:$0xff] %v5221_v0  ;;  %v1028_v46 = vmax.f32 %v1012_v2, 0.0  ;;  %v838_v24 = vadd.f32 %v837_v7, %v836_v51  ;;  %v3882_v55 = vor.u32 %v4201_v10, %v3879_v40  ;;  %v3946_v17 = vor.u32 %v4217_v62, %v3943_v61  ;;  %v4215_v2 = vld [vmem:[%s6981_s6 + $0x84] sm:$0xf]  ;;  %v3935_v51 = vld [vmem:[%s6981_s6 + $0x88] sm:$0xf0] }
 0x10c   : > { %v949_v44 = vrot.slane %v948_v1, 1  ;;  %v830_v26 = vadd.f32 %v829_v13, %v5167_v57  ;;  %v965_v25 = vrot.slane %v964_v58, 2  ;;  %1683 = vmatpush.bf16.msra.mxu3 %v3958_v22  ;;  %v3886_v42 = vor.u32 %v4204_v37, %v3885_v21  ;;  %v3941_v22 = vld [vmem:[%s6981_s6 + $0x90] sm:$0xf]  ;;  %v4218_v21 = vld [vmem:[%s6981_s6 + $0x94] sm:$0xf0] }
 0x10d   : > { %v998_v10 = vmul.f32 %v5221_v0, %v5221_v0  ;;  %v958_v40 = vadd.f32 %v957_v41, %v871_v35  ;;  %v839_v39 = vrot.slane %v838_v24, 1  ;;  %1714 = vmatpush.bf16.msrb.mxu0 %v3882_v55  ;;  %1743 = vmatpush.bf16.msrb.mxu1 %v3946_v17  ;;  %v3950_v62 = vor.u32 %v4220_v53, %v3949_v33  ;;  %v3869_v55 = vld [vmem:[%s6981_s6] sm:$0xf]  ;;  %v4200_v17 = vld [vmem:[%s6981_s6 + $0x4] sm:$0xf0] }
 0x10e   : > { %v5258_v37 = vpop.eup %4366  ;;  %v982_v13 = vmul.f32 0.125, %v956_v38  ;;  %v966_v61 = vadd.f32 %v965_v25, %v964_v58  ;;  %1655 = vmatpush.bf16.msra.mxu2 %v3886_v42  ;;  %v3878_v7 = vor.u32 %v4202_v20, %v3877_v12  ;;  %v3874_v57 = vor.u32 %v4199_v49, %v3871_v23  ;;  %v3933_v20 = vld [vmem:[%s6981_s6 + $0x80] sm:$0xf] }
 0x10f   : > { %v5263_v53 = vadd.f32 1e-05, %v1028_v46  ;;  %v821_v35 = vrot.slane %v5226_v31, 1  ;;  %v840_v41 = vadd.f32 %v839_v39, %v838_v24  ;;  %v3938_v33 = vor.u32 %v4215_v2, %v3935_v51  ;;  %v4216_v24 = vld [vmem:[%s6981_s6 + $0x84] sm:$0xf0] }
 0x110   : > { %v950_v0 = vadd.f32 %v949_v44, %v948_v1  ;;  %v831_v38 = vrot.slane %v830_v26, 2  ;;  %v967_v58 = vrot.slane %v966_v61, 1  ;;  %1684 = vmatpush.bf16.msra.mxu3 %v3950_v62  ;;  %v3942_v12 = vor.u32 %v4218_v21, %v3941_v22 }
 0x111   : > { %v959_v49 = vrot.slane %v958_v40, 2  ;;  %v5272_v46 = vmul.f32 0.125, %v840_v41  ;;  %1715 = vmatpush.bf16.msrb.mxu0 %v3874_v57  ;;  %1744 = vmatpush.bf16.msrb.mxu1 %v3938_v33  ;;  %v7078_v1 = vrot.slane %v4966_v48, 1  ;;  %v5281_v44 = vmul.f32 0.125, %v4969_v54 }
 0x112   : > { %v1014_v25 = vsub.f32 %v982_v13, %v998_v10  ;;  %v968_v42 = vadd.f32 %v967_v58, %v966_v61  ;;  %1656 = vmatpush.bf16.msra.mxu2 %v3878_v7  ;;  %v3870_v2 = vor.u32 %v4200_v17, %v3869_v55  ;;  %v1061_v51 = vmul.f32 %v4992_v18, %v5003_v36 }
 0x113   : > { %v762_v23 = vadd.f32 %v7078_v1, %v4966_v48  ;;  %4368 = vrsqrt.f32 %v5263_v53  ;;  %v1000_v57 = vmul.f32 %v5272_v46, %v5272_v46  ;;  %v985_v48 = vmul.f32 %v5281_v44, %v5281_v44 }
 0x114   : > { %v984_v62 = vmul.f32 0.125, %v968_v42  ;;  %1685 = vmatpush.bf16.msra.mxu3 %v3942_v12  ;;  %v3934_v54 = vor.u32 %v4216_v24, %v3933_v20  ;;  %v1062_v10 = vmul.f32 0.5, %v1061_v51  ;;  %v1081_v22 = vmul.f32 %v5040_v45, %v5064_v16 }
 0x115   : > { %v5288_v39 = vmul.f32 0.125, %v762_v23  ;;  %v5294_v21 = vadd.f32 %v831_v38, %v830_v26  ;;  %v960_v36 = vadd.f32 %v959_v49, %v958_v40  ;;  %v1001_v61 = vsub.f32 %v4974_v63, %v985_v48 }
 0x116   : > { %v1030_v7 = vmax.f32 %v1014_v25, 0.0  ;;  %v1016_v55 = vsub.f32 %v984_v62, %v1000_v57  ;;  %1657 = vmatpush.bf16.msra.mxu2 %v3870_v2  ;;  %v1063_v41 = vsub.f32 1.5, %v1062_v10  ;;  %v1082_v33 = vmul.f32 0.5, %v1081_v22 }
 0x117   : > { %v987_v13 = vmul.f32 %v5288_v39, %v5288_v39  ;;  %v1017_v58 = vmax.f32 %v1001_v61, 0.0  ;;  %v7079_v12 = vrot.slane %v4976_v52, 1  ;;  %v7080_v26 = vrot.slane %v5023_v6, 1 }
 0x118   : > { %v5308_v38 = vmul.f32 %v5258_v37, %v5178_v60  ;;  %v5310_v63 = vmul.f32 0.125, %v950_v0  ;;  %v1032_v20 = vmax.f32 %v1016_v55, 0.0  ;;  %1686 = vmatpush.bf16.msra.mxu3 %v3934_v54  ;;  %v1083_v49 = vsub.f32 1.5, %v1082_v33 }
 0x119   : > { %v1003_v17 = vsub.f32 %v4985_v9, %v987_v13  ;;  %v774_v16 = vadd.f32 %v7079_v12, %v4976_v52  ;;  %v786_v40 = vadd.f32 %v7080_v26, %v5023_v6  ;;  %v5312_v24 = vpop.eup %4368  ;;  %v5314_v1 = vadd.f32 1e-05, %v1017_v58 }
 0x11a   : > { %v1101_v52 = vmul.f32 %v5161_v32, %v5176_v27  ;;  %v833_v6 = vrot.slane %v5294_v21, 1  ;;  %v1064_v25 = vmul.f32 %v4992_v18, %v1063_v41  ;;  %vm1066_vm1 = vweird.f32 %v4992_v18 }
 0x11b   : > { %v1019_v9 = vmax.f32 %v1003_v17, 0.0  ;;  %v5316_v23 = vmul.f32 0.125, %v774_v16  ;;  %v5323_v0 = vmul.f32 0.125, %v786_v40  ;;  %v5325_v42 = vadd.f32 1e-05, %v1030_v7 }
 0x11c   : > { %v961_v2 = vrot.slane %v960_v36, 1  ;;  %4370 = vrsqrt.f32 %v5314_v1  ;;  %vm1065_vm2 = vweird.f32 %v4956_v34  ;;  %vm1086_vm3 = vweird.f32 %v5040_v45 }
 0x11d   : > { %v5327_v51 = vadd.f32 1e-05, %v1019_v9  ;;  %v989_v27 = vmul.f32 %v5316_v23, %v5316_v23  ;;  %v991_v57 = vmul.f32 %v5323_v0, %v5323_v0  ;;  %v5336_v48 = vadd.f32 1e-05, %v1032_v20  ;;  %vm5338_vm4 = vmor %vm1065_vm2, %vm1066_vm1 }
 0x11e   : > { %v1084_v54 = vmul.f32 %v5040_v45, %v1083_v49  ;;  %v1102_v10 = vmul.f32 0.5, %v1101_v52  ;;  %v5346_v34 = vmul.f32 %v5312_v24, %v5263_v53  ;;  %v1068_v22 = vsel %vm5338_vm4, %v4992_v18, %v1064_v25 }
 0x11f   : > { %4372 = vrsqrt.f32 %v5327_v51  ;;  %v1005_v13 = vsub.f32 %v5050_v4, %v989_v27  ;;  %v1007_v61 = vsub.f32 %v5112_v5, %v991_v57  ;;  %v5353_v7 = vadd.f32 %v961_v2, %v960_v36 }
 0x120   : > { %vm1085_vm5 = vweird.f32 %v4994_v19  ;;  %v1103_v55 = vsub.f32 1.5, %v1102_v10  ;;  %v1121_v41 = vmul.f32 %v5169_v11, %v5195_v3  ;;  %4374 = vrsqrt.f32 %v5325_v42 }
 0x121   : > { %vm5361_vm6 = vmor %vm1085_vm5, %vm1086_vm3  ;;  %v1021_v18 = vmax.f32 %v1005_v13, 0.0  ;;  %v1023_v4 = vmax.f32 %v1007_v61, 0.0  ;;  %v7085_v5 = vrot.slane %v5082_v50, 1  ;;  %4376 = vrsqrt.f32 %v5336_v48 }
 0x122   : > { %v5368_v17 = vpop.eup %4370  ;;  %v1088_v19 = vsel %vm5361_vm6, %v5040_v45, %v1084_v54  ;;  %v1225_v3 = vrot.slane %v1068_v22, 7  ;;  %v1122_v58 = vmul.f32 0.5, %v1121_v41  ;;  %vm1055_vm7 = vweird.f32 %v5314_v1 }
 0x123   : > { %v798_v36 = vadd.f32 %v7085_v5, %v5082_v50  ;;  %v1050_v12 = vmul.f32 %v5368_v17, %v5314_v1  ;;  %v5377_v16 = vadd.f32 1e-05, %v1021_v18  ;;  %v5379_v26 = vadd.f32 1e-05, %v1023_v4 }
 0x124   : > { %v7086_v50 = vrot.slane %v5147_v14, 1  ;;  %v1104_v45 = vmul.f32 %v5161_v32, %v1103_v55  ;;  %vm1106_vm9 = vweird.f32 %v5161_v32  ;;  %v1123_v49 = vsub.f32 1.5, %v1122_v58 }
 0x125   : > { %v5384_v20 = vpop.eup %4372  ;;  %v5388_v9 = vmul.f32 0.125, %v798_v36  ;;  %v1051_v52 = vmul.f32 %v5368_v17, %v1050_v12  ;;  %vm1075_vm10 = vweird.f32 %v5327_v51  ;;  %4378 = vrsqrt.f32 %v5377_v16 }
 0x126   : > { %v810_v40 = vadd.f32 %v7086_v50, %v5147_v14  ;;  %v1070_v25 = vmul.f32 %v5384_v20, %v5327_v51  ;;  %v1226_v2 = vrot.slane %v1088_v19, 7  ;;  %vm1105_vm11 = vweird.f32 %v5091_v56  ;;  %v5398_v14 = vpop.eup %4374 }
 0x127   : > { %4380 = vrsqrt.f32 %v5379_v26  ;;  %vm1125_vm12 = vweird.f32 %v5104_v29  ;;  %v1052_v27 = vmul.f32 0.5, %v1051_v52  ;;  %vm5401_vm13 = vmor %vm1105_vm11, %vm1106_vm9  ;;  %vm1126_vm14 = vweird.f32 %v5169_v11  ;;  %v5408_v10 = vpop.eup %4376 }
 0x128   : > { %v1071_v57 = vmul.f32 %v5384_v20, %v1070_v25  ;;  %v5406_v54 = vmul.f32 0.125, %v810_v40  ;;  %v1108_v56 = vsel %vm5401_vm13, %v5161_v32, %v1104_v45  ;;  %v1124_v22 = vmul.f32 %v5169_v11, %v1123_v49  ;;  %vm5436_vm3 = vmor %vm1125_vm12, %vm1126_vm14 }
 0x129   : > { %v993_v13 = vmul.f32 %v5388_v9, %v5388_v9  ;;  %v1141_v61 = vmul.f32 %v5258_v37, %v5308_v38  ;;  %v1053_v55 = vsub.f32 1.5, %v1052_v27  ;;  %vm1056_vm15 = vweird.f32 %v5368_v17 }
 0x12a   : > { %v1072_v41 = vmul.f32 0.5, %v1071_v57  ;;  %v995_v33 = vmul.f32 %v5406_v54, %v5406_v54  ;;  %vm1145_vm1 = vweird.f32 %v5178_v60  ;;  %vm1076_vm2 = vweird.f32 %v5384_v20  ;;  %vm1057_vm4 = vmor %vm1055_vm7, %vm1056_vm15 }
 0x12b   : > { %v1009_v32 = vsub.f32 %v5186_v8, %v993_v13  ;;  %v1142_v18 = vmul.f32 0.5, %v1141_v61  ;;  %v5427_v4 = vadd.f32 %v821_v35, %v5226_v31  ;;  %v5429_v38 = vpop.eup %4378  ;;  %v1054_v5 = vmul.f32 %v5368_v17, %v1053_v55  ;;  %v5446_v31 = vld [vmem:[%s6979_s4] sm:$0x3]  ;;  %vm1077_vm7 = vmor %vm1075_vm10, %vm1076_vm2 }
 0x12c   : > { %v1073_v36 = vsub.f32 1.5, %v1072_v41  ;;  %v1227_v8 = vrot.slane %v1108_v56, 7  ;;  %v1011_v58 = vsub.f32 %v5219_v43, %v995_v33  ;;  %v1090_v29 = vmul.f32 %v5429_v38, %v5377_v16 }
 0x12d   : > { %v5441_v12 = vpop.eup %4380  ;;  %vm1095_vm5 = vweird.f32 %v5377_v16  ;;  %v1128_v43 = vsel %vm5436_vm3, %v5169_v11, %v1124_v22  ;;  %v1025_v35 = vmax.f32 %v1009_v32, 0.0  ;;  %v1143_v50 = vsub.f32 1.5, %v1142_v18 }
 0x12e   : > { %v1058_v40 = vsel %vm1057_vm4, %v5368_v17, %v1054_v5  ;;  %v1074_v45 = vmul.f32 %v5384_v20, %v1073_v36  ;;  %v1110_v49 = vmul.f32 %v5441_v12, %v5379_v26  ;;  %vm1146_vm6 = vweird.f32 %v5258_v37 }
 0x12f   : > { %v1234_v1 = vsel %vm1233_vm8, %v1058_v40, %v1225_v3  ;;  %v1091_v11 = vmul.f32 %v5429_v38, %v1090_v29  ;;  %vm1115_vm9 = vweird.f32 %v5379_v26  ;;  %v1027_v52 = vmax.f32 %v1011_v58, 0.0  ;;  %vm5488_vm11 = vmor %vm1145_vm1, %vm1146_vm6 }
 0x130   : > { %v5470_v17 = vadd.f32 1e-05, %v1025_v35  ;;  %v1078_v25 = vsel %vm1077_vm7, %v5384_v20, %v1074_v45  ;;  %v1250_v27 = vmul.f32 %v1234_v1, %v5446_v31  ;;  %v1111_v57 = vmul.f32 %v5441_v12, %v1110_v49  ;;  %v7093_v45 = vld [vmem:[#allocation17_spill] sm:$0xff] }
 0x131   : > { %v5476_v62 = vmul.f32 %v5258_v37, %v1143_v50  ;;  %v1235_v51 = vsel %vm1233_vm8, %v1078_v25, %v1226_v2  ;;  %v1092_v56 = vmul.f32 0.5, %v1091_v11  ;;  %v5479_v3 = vadd.f32 1e-05, %v1027_v52 }
 0x132   : > { %4382 = vrsqrt.f32 %v5470_v17  ;;  %v1251_v22 = vmul.f32 %v1235_v51, %v5446_v31  ;;  %v1266_v13 = vperm.slane %v1250_v27, 0  ;;  %v1267_v61 = vperm.slane %v1250_v27, 1 }
 0x133   : > { %v1112_v55 = vmul.f32 0.5, %v1111_v57  ;;  %v1093_v20 = vsub.f32 1.5, %v1092_v56  ;;  %vm1096_vm10 = vweird.f32 %v5429_v38  ;;  %v1228_v41 = vrot.slane %v1128_v43, 7 }
 0x134   : > { %v5495_v33 = vadd.f32 %v833_v6, %v5294_v21  ;;  %v1268_v32 = vperm.slane %v1251_v22, 0  ;;  %v1269_v18 = vperm.slane %v1251_v22, 1  ;;  %vm1116_vm12 = vweird.f32 %v5441_v12  ;;  %vm1097_vm13 = vmor %vm1095_vm5, %vm1096_vm10 }
 0x135   : > { %v1148_v5 = vsel %vm5488_vm11, %v5258_v37, %v5476_v62  ;;  %v1315_v60 = vmul.f32 %v1267_v61, %v4886_v15  ;;  %v1094_v36 = vmul.f32 %v5429_v38, %v1093_v20  ;;  %v1113_v19 = vsub.f32 1.5, %v1112_v55  ;;  %v5518_v15 = vld [vmem:[%s6980_s5] sm:$0x3]  ;;  %vm1117_vm14 = vmor %vm1115_vm9, %vm1116_vm12 }
 0x136   : > { %4384 = vrsqrt.f32 %v5479_v3  ;;  %v1298_v58 = vmul.f32 %v1266_v13, %v4836_v28  ;;  %v1314_v21 = vmul.f32 %v1266_v13, %v5281_v44  ;;  %v1317_v6 = vmul.f32 %v1269_v18, %v4923_v59 }
 0x137   : > { %v1299_v29 = vmul.f32 %v1267_v61, %v4838_v30  ;;  %v1300_v28 = vmul.f32 %v1268_v32, %v4856_v47  ;;  %v1346_v35 = vrot.slane %v1315_v60, 7  ;;  %v1098_v44 = vsel %vm1097_vm13, %v5429_v38, %v1094_v36  ;;  %v7094_v60 = vld [vmem:[#allocation18_spill] sm:$0xff] }
 0x138   : > { %v5513_v43 = vpop.eup %4382  ;;  %v1114_v59 = vmul.f32 %v5441_v12, %v1113_v19  ;;  %v1316_v30 = vmul.f32 %v1268_v32, %v5288_v39  ;;  %v1347_v50 = vrot.slane %v1317_v6, 7  ;;  %v1236_v16 = vsel %vm1233_vm8, %v1098_v44, %v1227_v8  ;;  %v7095_v44 = vld [vmem:[#allocation24_spill] sm:$0xff] }
 0x139   : > { %v1130_v40 = vmul.f32 %v5513_v43, %v5470_v17  ;;  %v1354_v47 = vsel %vm1233_vm8, %v1314_v21, %v1346_v35  ;;  %v1301_v49 = vmul.f32 %v1269_v18, %v7093_v45  ;;  %v1252_v1 = vmul.f32 %v1236_v16, %v5446_v31 }
 0x13a   : > { %v1118_v38 = vsel %vm1117_vm14, %v5441_v12, %v1114_v59  ;;  %v1355_v39 = vsel %vm1233_vm8, %v1316_v30, %v1347_v50  ;;  %v1370_v11 = vsub.f32 %v5518_v15, %v1354_v47  ;;  %vm1136_vm15 = vweird.f32 %v5513_v43  ;;  %v7096_v50 = vld [vmem:[#allocation20_spill] sm:$0xff] }
 0x13b   : > { %v1237_v26 = vsel %vm1233_vm8, %v1118_v38, %v1228_v41  ;;  %v1131_v52 = vmul.f32 %v5513_v43, %v1130_v40  ;;  %v1371_v25 = vsub.f32 %v5518_v15, %v1355_v39  ;;  %v1270_v57 = vperm.slane %v1252_v1, 0  ;;  %v7097_v40 = vld [vmem:[#allocation25_spill] sm:$0xff] }
 0x13c   : > { %v5540_v8 = vpop.eup %4384  ;;  %v1253_v27 = vmul.f32 %v1237_v26, %v5446_v31  ;;  %v1271_v12 = vperm.slane %v1252_v1, 1  ;;  %v1386_v51 = vperm.slane %v1370_v11, 0  ;;  %v1387_v56 = vperm.slane %v1370_v11, 1 }
 0x13d   : > { %v1132_v22 = vmul.f32 0.5, %v1131_v52  ;;  %vm1135_vm1 = vweird.f32 %v5470_v17  ;;  %v1161_v13 = vmul.f32 %v5312_v24, %v5346_v34  ;;  %v1388_v61 = vperm.slane %v1371_v25, 0 }
 0x13e   : > { %v1389_v55 = vperm.slane %v1371_v25, 1  ;;  %v1272_v20 = vperm.slane %v1253_v27, 0  ;;  %v1273_v41 = vperm.slane %v1253_v27, 1  ;;  %v1418_v32 = vadd.f32 %v1386_v51, %v1298_v58  ;;  %v7099_v25 = vld [vmem:[#allocation21_spill] sm:$0xff]  ;;  %vm1137_vm4 = vmor %vm1135_vm1, %vm1136_vm15 }
 0x13f   : > { %v1419_v18 = vadd.f32 %v1387_v56, %v1299_v29  ;;  %v1302_v36 = vmul.f32 %v1270_v57, %v7094_v60  ;;  %v1150_v19 = vmul.f32 %v5540_v8, %v5479_v3  ;;  %v1420_v21 = vadd.f32 %v1388_v61, %v1300_v28 }
 0x140   : > { %v1421_v6 = vadd.f32 %v1389_v55, %v1301_v49  ;;  %v1318_v35 = vmul.f32 %v1270_v57, %v5316_v23  ;;  %v1319_v59 = vmul.f32 %v1271_v12, %v7095_v44  ;;  %vm1166_vm2 = vweird.f32 %v5312_v24  ;;  %v7098_v49 = vld [vmem:[#allocation19_spill] sm:$0xff] }
 0x141   : > { %v1434_v34 = vmax.f32 %v1418_v32, 0.0  ;;  %v1435_v30 = vmax.f32 %v1419_v18, 0.0  ;;  %v1304_v16 = vmul.f32 %v1272_v20, %v7096_v50  ;;  %v1321_v58 = vmul.f32 %v1273_v41, %v7097_v40 }
 0x142   : > { %v1436_v29 = vmax.f32 %v1420_v21, 0.0  ;;  %v1437_v47 = vmax.f32 %v1421_v6, 0.0  ;;  %v1320_v45 = vmul.f32 %v1272_v20, %v5323_v0  ;;  %v1348_v38 = vrot.slane %v1319_v59, 7 }
 0x143   : > { %vm1165_vm3 = vweird.f32 %v5263_v53  ;;  %v1349_v28 = vrot.slane %v1321_v58, 7  ;;  %v1303_v23 = vmul.f32 %v1271_v12, %v7098_v49  ;;  %v1133_v1 = vsub.f32 1.5, %v1132_v22 }
 0x144   : > { %v1151_v39 = vmul.f32 %v5540_v8, %v1150_v19  ;;  %v1450_v11 = vpack.c.bf16 %v1436_v29, %v1434_v34  ;;  %v1451_v26 = vpack.c.bf16 %v1437_v47, %v1435_v30  ;;  %v1356_v52 = vsel %vm1233_vm8, %v1318_v35, %v1348_v38  ;;  %vm1167_vm6 = vmor %vm1165_vm3, %vm1166_vm2 }
 0x145   : > { %v1305_v27 = vmul.f32 %v1273_v41, %v7099_v25  ;;  %v1357_v57 = vsel %vm1233_vm8, %v1320_v45, %v1349_v28  ;;  %v1372_v51 = vsub.f32 %v5518_v15, %v1356_v52  ;;  %v1134_v0 = vmul.f32 %v5513_v43, %v1133_v1 }
 0x146   : > { %v1152_v56 = vmul.f32 0.5, %v1151_v39  ;;  %1658 = vmatmul.bf16.vlgmr.msra.gmra.mxu2 %v1450_v11  ;;  %1687 = vmatmul.bf16.vlgmr.msra.gmra.mxu3 %v1451_v26  ;;  %v1373_v12 = vsub.f32 %v5518_v15, %v1357_v57  ;;  %vm1156_vm5 = vweird.f32 %v5540_v8  ;;  %v1162_v22 = vmul.f32 0.5, %v1161_v13 }
 0x147   : > { %v1229_v61 = vrot.slane %v1148_v5, 7  ;;  %1716 = vmatmul.bf16.vlgmr.msrb.gmra.mxu0 %v1450_v11  ;;  %1745 = vmatmul.bf16.vlgmr.msrb.gmra.mxu1 %v1451_v26  ;;  %v1390_v55 = vperm.slane %v1372_v51, 0  ;;  %v1391_v20 = vperm.slane %v1372_v51, 1  ;;  %v1138_v41 = vsel %vm1137_vm4, %v5513_v43, %v1134_v0  ;;  %v7101_v0 = vld [vmem:[#allocation31_spill] sm:$0xff] }
 0x148   : > { %v1153_v32 = vsub.f32 1.5, %v1152_v56  ;;  %v1392_v18 = vperm.slane %v1373_v12, 0  ;;  %v1393_v60 = vperm.slane %v1373_v12, 1  ;;  %v1163_v17 = vsub.f32 1.5, %v1162_v22 }
 0x149   : > { %v1238_v19 = vsel %vm1233_vm8, %v1138_v41, %v1229_v61  ;;  %v1422_v21 = vadd.f32 %v1390_v55, %v1302_v36  ;;  %v1423_v13 = vadd.f32 %v1391_v20, %v1303_v23  ;;  %v5581_v37 = vmul.f32 0.125, %v5427_v4 }
 0x14a   : > { %v5578_v2 = vmul.f32 %v1238_v19, %v5446_v31  ;;  %v1424_v62 = vadd.f32 %v1392_v18, %v1304_v16  ;;  %v1425_v5 = vadd.f32 %v1393_v60, %v1305_v27  ;;  %v1154_v6 = vmul.f32 %v5540_v8, %v1153_v32  ;;  %v7102_v19 = vld [vmem:[#allocation22_spill] sm:$0xff] }
 0x14b   : > { %v1164_v43 = vmul.f32 %v5312_v24, %v1163_v17  ;;  %v1180_v35 = vmul.f32 %v5398_v14, %v5325_v42  ;;  %v983_v44 = vmul.f32 0.125, %v5353_v7  ;;  %v1200_v36 = vmul.f32 %v5408_v10, %v5336_v48 }
 0x14c   : > { %v5595_v4 = vmul.f32 0.125, %v5495_v33  ;;  %vm1155_vm7 = vweird.f32 %v5479_v3  ;;  %v1274_v34 = vperm.slane %v5578_v2, 0  ;;  %v1275_v30 = vperm.slane %v5578_v2, 1  ;;  %v7100_v3 = vld [vmem:[#allocation28_spill] sm:$0xff] }
 0x14d   : > { %v1168_v59 = vsel %vm1167_vm6, %v5312_v24, %v1164_v43  ;;  %v1440_v7 = vmax.f32 %v1424_v62, 0.0  ;;  %v1441_v50 = vmax.f32 %v1425_v5, 0.0  ;;  %vm1157_vm9 = vmor %vm1155_vm7, %vm1156_vm5  ;;  %v997_v53 = vmul.f32 %v5581_v37, %v5581_v37  ;;  %v7104_v62 = vld [vmem:[#allocation23_spill] sm:$0xff] }
 0x14e   : > { %v1230_v16 = vrot.slane %v1168_v59, 7  ;;  %v1438_v40 = vmax.f32 %v1422_v21, 0.0  ;;  %v1439_v33 = vmax.f32 %v1423_v13, 0.0  ;;  %v1158_v58 = vsel %vm1157_vm9, %v5540_v8, %v1154_v6  ;;  %v7103_v13 = vld [vmem:[#allocation26_spill] sm:$0xff]  ;;  %v7105_v43 = vld [vmem:[#allocation27_spill] sm:$0xff] }
 0x14f   : > { %v1323_v29 = vmul.f32 %v1275_v30, %v7100_v3  ;;  %v999_v47 = vmul.f32 %v5595_v4, %v5595_v4  ;;  %v1013_v45 = vsub.f32 %v5310_v63, %v997_v53  ;;  %v1181_v38 = vmul.f32 %v5398_v14, %v1180_v35 }
 0x150   : > { %v1239_v24 = vsel %vm1233_vm8, %v1158_v58, %v1230_v16  ;;  %v1322_v49 = vmul.f32 %v1274_v34, %v5388_v9  ;;  %v1452_v1 = vpack.c.bf16 %v1440_v7, %v1438_v40  ;;  %v1453_v39 = vpack.c.bf16 %v1441_v50, %v1439_v33 }
 0x151   : > { %v1255_v28 = vmul.f32 %v1239_v24, %v5446_v31  ;;  %v1350_v23 = vrot.slane %v1323_v29, 7  ;;  %v1015_v11 = vsub.f32 %v983_v44, %v999_v47  ;;  %v1029_v8 = vmax.f32 %v1013_v45, 0.0 }
 0x152   : > { %v1201_v27 = vmul.f32 %v5408_v10, %v1200_v36  ;;  %v1182_v63 = vmul.f32 0.5, %v1181_v38  ;;  %v1306_v21 = vmul.f32 %v1274_v34, %v7102_v19  ;;  %vm1186_vm10 = vweird.f32 %v5398_v14  ;;  %v7109_v19 = vld [vmem:[#allocation29_spill] sm:$0xff] }
 0x153   : > { %v1276_v26 = vperm.slane %v1255_v28, 0  ;;  %v1277_v52 = vperm.slane %v1255_v28, 1  ;;  %v1358_v25 = vsel %vm1233_vm8, %v1322_v49, %v1350_v23  ;;  %v1031_v57 = vmax.f32 %v1015_v11, 0.0 }
 0x154   : > { %v1045_v51 = vadd.f32 1e-05, %v1029_v8  ;;  %v1374_v12 = vsub.f32 %v5518_v15, %v1358_v25  ;;  %v1202_v55 = vmul.f32 0.5, %v1201_v27  ;;  %v1183_v20 = vsub.f32 1.5, %v1182_v63 }
 0x155   : > { %v1325_v56 = vmul.f32 %v1277_v52, %v7101_v0  ;;  %v5618_v22 = vadd.f32 1e-05, %v1031_v57  ;;  %v1324_v9 = vmul.f32 %v1276_v26, %v5406_v54  ;;  %v1308_v2 = vmul.f32 %v1276_v26, %v7103_v13 }
 0x156   : > { %4386 = vrsqrt.f32 %v1045_v51  ;;  %1663 = vmatmul.bf16.gmra.mxu2 %v1452_v1  ;;  %1692 = vmatmul.bf16.gmra.mxu3 %v1453_v39  ;;  %v1394_v32 = vperm.slane %v1374_v12, 0  ;;  %v1395_v18 = vperm.slane %v1374_v12, 1  ;;  %v1203_v17 = vsub.f32 1.5, %v1202_v55 }
 0x157   : > { %v1351_v61 = vrot.slane %v1325_v56, 7  ;;  %1721 = vmatmul.bf16.gmra.mxu0 %v1452_v1  ;;  %1750 = vmatmul.bf16.gmra.mxu1 %v1453_v39  ;;  %4388 = vrsqrt.f32 %v5618_v22  ;;  %v1307_v54 = vmul.f32 %v1275_v30, %v7104_v62  ;;  %v1309_v35 = vmul.f32 %v1277_v52, %v7105_v43 }
 0x158   : > { %v1184_v36 = vmul.f32 %v5398_v14, %v1183_v20  ;;  %v1426_v59 = vadd.f32 %v1394_v32, %v1306_v21  ;;  %vm1185_vm11 = vweird.f32 %v5325_v42  ;;  %v1204_v40 = vmul.f32 %v5408_v10, %v1203_v17 }
 0x159   : > { %v1359_v41 = vsel %vm1233_vm8, %v1324_v9, %v1351_v61  ;;  %v1427_v7 = vadd.f32 %v1395_v18, %v1307_v54  ;;  %vm1206_vm12 = vweird.f32 %v5408_v10  ;;  %vm5635_vm13 = vmor %vm1185_vm11, %vm1186_vm10  ;;  %vm1205_vm14 = vweird.f32 %v5336_v48  ;;  %v7108_v9 = vld [vmem:[#allocation34_spill] sm:$0xff]  ;;  %v7111_v54 = vld [vmem:[#allocation32_spill] sm:$0xff] }
 0x15a   : > { %v1375_v60 = vsub.f32 %v5518_v15, %v1359_v41  ;;  %v1188_v42 = vsel %vm5635_vm13, %v5398_v14, %v1184_v36  ;;  %v1442_v24 = vmax.f32 %v1426_v59, 0.0  ;;  %vm1207_vm15 = vmor %vm1205_vm14, %vm1206_vm12  ;;  %vm1175_vm2 = vweird.f32 %v1045_v51 }
 0x15b   : > { %v1443_v47 = vmax.f32 %v1427_v7, 0.0  ;;  %v1208_v28 = vsel %vm1207_vm15, %v5408_v10, %v1204_v40  ;;  %v1231_v11 = vrot.slane %v1188_v42, 7  ;;  %vm1195_vm5 = vweird.f32 %v5618_v22 }
 0x15c   : > { %v4387_v5 = vpop.eup %4386  ;;  %v1396_v6 = vperm.slane %v1375_v60, 0  ;;  %v1397_v44 = vperm.slane %v1375_v60, 1  ;;  %v1232_v14 = vrot.slane %v1208_v28, 7 }
 0x15d   : > { %v1170_v50 = vmul.f32 %v4387_v5, %v1045_v51  ;;  %v4389_v16 = vpop.eup %4388  ;;  %vm1176_vm1 = vweird.f32 %v4387_v5 }
 0x15e   : > { %v1428_v34 = vadd.f32 %v1396_v6, %v1308_v2  ;;  %v1429_v53 = vadd.f32 %v1397_v44, %v1309_v35  ;;  %v1190_v58 = vmul.f32 %v4389_v16, %v5618_v22  ;;  %vm1196_vm3 = vweird.f32 %v4389_v16  ;;  %vm1177_vm4 = vmor %vm1175_vm2, %vm1176_vm1  ;;  %v7110_v2 = vld [vmem:[#allocation30_spill] sm:$0xff]  ;;  %v7112_v6 = vld [vmem:[#allocation33_spill] sm:$0xff] }
 0x15f   : > { %v1171_v30 = vmul.f32 %v4387_v5, %v1170_v50  ;;  %vm1197_vm6 = vmor %vm1195_vm5, %vm1196_vm3 }
 0x160   : > { %v1444_v3 = vmax.f32 %v1428_v34, 0.0  ;;  %v1445_v29 = vmax.f32 %v1429_v53, 0.0  ;;  %v1191_v38 = vmul.f32 %v4389_v16, %v1190_v58 }
 0x161   : > { %v1172_v45 = vmul.f32 0.5, %v1171_v30 }
 0x162   : > { %v1454_v49 = vpack.c.bf16 %v1444_v3, %v1442_v24  ;;  %v1455_v23 = vpack.c.bf16 %v1445_v29, %v1443_v47  ;;  %v1192_v39 = vmul.f32 0.5, %v1191_v38 }
 0x163   : > { %v1173_v1 = vsub.f32 1.5, %v1172_v45 }
 0x164   : > { %v1193_v26 = vsub.f32 1.5, %v1192_v39 }
 0x165   : > { %v1174_v8 = vmul.f32 %v4387_v5, %v1173_v1 }
 0x166   : > { %1668 = vmatmul.bf16.gmra.mxu2 %v1454_v49  ;;  %1697 = vmatmul.bf16.gmra.mxu3 %v1455_v23  ;;  %v1194_v52 = vmul.f32 %v4389_v16, %v1193_v26 }
 0x167   : > { %v1178_v48 = vsel %vm1177_vm4, %v4387_v5, %v1174_v8  ;;  %1726 = vmatmul.bf16.gmra.mxu0 %v1454_v49  ;;  %1755 = vmatmul.bf16.gmra.mxu1 %v1455_v23 }
 0x168   : > { %v1240_v10 = vsel %vm1233_vm8, %v1178_v48, %v1231_v11  ;;  %v1198_v25 = vsel %vm1197_vm6, %v4389_v16, %v1194_v52 }
 0x169   : > { %v1256_v27 = vmul.f32 %v1240_v10, %v5446_v31  ;;  %v1241_v57 = vsel %vm1233_vm8, %v1198_v25, %v1232_v14 }
 0x16a   : > { %v1257_v51 = vmul.f32 %v1241_v57, %v5446_v31 }
 0x16b   : > { %v1279_v63 = vperm.slane %v1256_v27, 1  ;;  %v1278_v0 = vperm.slane %v1256_v27, 0 }
 0x16c   : > { %v1280_v56 = vperm.slane %v1257_v51, 0  ;;  %v1281_v12 = vperm.slane %v1257_v51, 1 }
 0x16d   : > { %v1327_v61 = vmul.f32 %v1279_v63, %v7108_v9  ;;  %v1326_v55 = vmul.f32 %v1278_v0, %v5581_v37  ;;  %v1310_v21 = vmul.f32 %v1278_v0, %v7109_v19  ;;  %v1311_v62 = vmul.f32 %v1279_v63, %v7110_v2  ;;  %v4053_v63 = vld [vmem:[#allocation7 + $0x70] sm:$0xf]  ;;  %v4246_v0 = vld [vmem:[#allocation7 + $0x74] sm:$0xf0] }
 0x16e   : > { %v1329_v22 = vmul.f32 %v1281_v12, %v5272_v46  ;;  %v1328_v41 = vmul.f32 %v1280_v56, %v5595_v4  ;;  %v1312_v37 = vmul.f32 %v1280_v56, %v7111_v54  ;;  %v1313_v4 = vmul.f32 %v1281_v12, %v7112_v6 }
 0x16f   : > { %v1352_v20 = vrot.slane %v1327_v61, 7 }
 0x170   : > { %v1353_v32 = vrot.slane %v1329_v22, 7  ;;  %v4117_v22 = vld [vmem:[#allocation7 + $0xf0] sm:$0xf] }
 0x171   : > { %v1360_v18 = vsel %vm1233_vm8, %v1326_v55, %v1352_v20  ;;  %v4262_v55 = vld [vmem:[#allocation7 + $0xf4] sm:$0xf0] }
 0x172   : > { %v1361_v60 = vsel %vm1233_vm8, %v1328_v41, %v1353_v32  ;;  %v1376_v31 = vsub.f32 %v5518_v15, %v1360_v18 }
 0x173   : > { %v1377_v17 = vsub.f32 %v5518_v15, %v1361_v60  ;;  %v4054_v60 = vor.u32 %v4246_v0, %v4053_v63  ;;  %v4045_v63 = vld [vmem:[#allocation7 + $0x60] sm:$0xf]  ;;  %v4244_v0 = vld [vmem:[#allocation7 + $0x64] sm:$0xf0] }
 0x174   : > { %v1398_v13 = vperm.slane %v1376_v31, 0  ;;  %v1399_v46 = vperm.slane %v1376_v31, 1  ;;  %v4118_v31 = vor.u32 %v4262_v55, %v4117_v22  ;;  %v4260_v22 = vld [vmem:[#allocation7 + $0xe4] sm:$0xf0] }
 0x175   : > { %v1400_v5 = vperm.slane %v1377_v17, 0  ;;  %v1401_v43 = vperm.slane %v1377_v17, 1  ;;  %2672 = vmatpush.bf16.msrb.mxu2 %v4054_v60 }
 0x176   : > { %v1430_v35 = vadd.f32 %v1398_v13, %v1310_v21  ;;  %v1431_v44 = vadd.f32 %v1399_v46, %v1311_v62  ;;  %2701 = vmatpush.bf16.msrb.mxu3 %v4118_v31 }
 0x177   : > { %v1432_v36 = vadd.f32 %v1400_v5, %v1312_v37  ;;  %v1433_v59 = vadd.f32 %v1401_v43, %v1313_v4 }
 0x178   : > { %v1446_v7 = vmax.f32 %v1430_v35, 0.0  ;;  %v1447_v16 = vmax.f32 %v1431_v44, 0.0 }
 0x179   : > { %v1448_v50 = vmax.f32 %v1432_v36, 0.0  ;;  %v1449_v15 = vmax.f32 %v1433_v59, 0.0 }
 0x17b   : > { %v1456_v34 = vpack.c.bf16 %v1448_v50, %v1446_v7  ;;  %v1457_v53 = vpack.c.bf16 %v1449_v15, %v1447_v16 }
 0x17d   : > { %1673 = vmatmul.bf16.gmra.mxu2 %v1456_v34  ;;  %1702 = vmatmul.bf16.gmra.mxu3 %v1457_v53 }
 0x17e   : > { %1731 = vmatmul.bf16.gmra.mxu0 %v1456_v34  ;;  %1760 = vmatmul.bf16.gmra.mxu1 %v1457_v53 }
 0x1c4   : > { %v1717_v40 = vpop.f32.mrf.mxu0  ;;  %v1746_v30 = vpop.f32.mrf.mxu1 }
 0x1c5   : > { %v5662_v33 = vadd.f32 %v1746_v30, %v1717_v40 }
 0x1c7   : > { %7113 = vst [vmem:[#allocation17_spill] sm:$0xff] %v5662_v33  ;;  %v1774_v58 = vrot.slane %v5662_v33, 4  ;;  %v1881_v3 = vmul.f32 %v5662_v33, %v5662_v33 }
 0x1c9   : > { %v1775_v29 = vadd.f32 %v1774_v58, %v5662_v33  ;;  %v1902_v42 = vrot.slane %v1881_v3, 4  ;;  %v1659_v24 = vpop.f32.mrf.mxu2  ;;  %v1688_v47 = vpop.f32.mrf.mxu3 }
 0x1ca   : > { %v5668_v45 = vadd.f32 %v1688_v47, %v1659_v24 }
 0x1cb   : > { %v1776_v38 = vrot.slane %v1775_v29, 2  ;;  %v1903_v28 = vadd.f32 %v1902_v42, %v1881_v3 }
 0x1cc   : > { %7114 = vst [vmem:[#allocation18_spill] sm:$0xff] %v5668_v45  ;;  %v1768_v49 = vrot.slane %v5668_v45, 4  ;;  %v1880_v23 = vmul.f32 %v5668_v45, %v5668_v45  ;;  %v1719_v1 = vpop.f32.mrf.mxu0  ;;  %v1748_v39 = vpop.f32.mrf.mxu1 }
 0x1cd   : > { %v1777_v11 = vadd.f32 %v1776_v38, %v1775_v29  ;;  %v1904_v8 = vrot.slane %v1903_v28, 2  ;;  %v5673_v26 = vadd.f32 %v1748_v39, %v1719_v1 }
 0x1ce   : > { %v1769_v14 = vadd.f32 %v1768_v49, %v5668_v45  ;;  %v1896_v48 = vrot.slane %v1880_v23, 4  ;;  %v3997_v45 = vld [vmem:[#allocation7] sm:$0xf] }
 0x1cf   : > { %7115 = vst [vmem:[#allocation24_spill] sm:$0xff] %v5673_v26  ;;  %v1778_v52 = vrot.slane %v1777_v11, 1  ;;  %v1905_v10 = vadd.f32 %v1904_v8, %v1903_v28  ;;  %v1786_v25 = vrot.slane %v5673_v26, 4  ;;  %v1883_v27 = vmul.f32 %v5673_v26, %v5673_v26  ;;  %v4245_v28 = vld [vmem:[#allocation7 + $0x74] sm:$0xf] }
 0x1d0   : > { %v1770_v57 = vrot.slane %v1769_v14, 2  ;;  %v1897_v51 = vadd.f32 %v1896_v48, %v1880_v23  ;;  %v4261_v8 = vld [vmem:[#allocation7 + $0xf4] sm:$0xf] }
 0x1d1   : > { %v1779_v56 = vadd.f32 %v1778_v52, %v1777_v11  ;;  %v1906_v12 = vrot.slane %v1905_v10, 1  ;;  %v1787_v9 = vadd.f32 %v1786_v25, %v5673_v26  ;;  %v1914_v61 = vrot.slane %v1883_v27, 4  ;;  %v1661_v20 = vpop.f32.mrf.mxu2  ;;  %v1690_v41 = vpop.f32.mrf.mxu3  ;;  %v4055_v11 = vld [vmem:[#allocation7 + $0x78] sm:$0xf0] }
 0x1d2   : > { %v1771_v32 = vadd.f32 %v1770_v57, %v1769_v14  ;;  %v1898_v18 = vrot.slane %v1897_v51, 2  ;;  %v5682_v46 = vadd.f32 %v1690_v41, %v1661_v20  ;;  %v4119_v25 = vld [vmem:[#allocation7 + $0xf8] sm:$0xf0]  ;;  %v4058_v41 = vor.u32 %v4245_v28, %v4055_v11  ;;  %v4243_v28 = vld [vmem:[#allocation7 + $0x64] sm:$0xf] }
 0x1d3   : > { %v5680_v17 = vmul.f32 0.125, %v1779_v56  ;;  %v1907_v19 = vadd.f32 %v1906_v12, %v1905_v10  ;;  %v1788_v21 = vrot.slane %v1787_v9, 2  ;;  %v1915_v13 = vadd.f32 %v1914_v61, %v1883_v27  ;;  %v4109_v61 = vld [vmem:[#allocation7 + $0xe0] sm:$0xf] }
 0x1d4   : > { %v1772_v2 = vrot.slane %v1771_v32, 1  ;;  %v1899_v62 = vadd.f32 %v1898_v18, %v1897_v51  ;;  %7116 = vst [vmem:[#allocation20_spill] sm:$0xff] %v5682_v46  ;;  %v1722_v54 = vpop.f32.mrf.mxu0  ;;  %v1751_v37 = vpop.f32.mrf.mxu1  ;;  %v1780_v36 = vrot.slane %v5682_v46, 4  ;;  %v1882_v59 = vmul.f32 %v5682_v46, %v5682_v46  ;;  %2730 = vmatpush.bf16.msra.mxu0 %v4058_v41 }
 0x1d5   : > { %v1993_v5 = vmul.f32 0.125, %v1907_v19  ;;  %v2009_v6 = vmul.f32 %v5680_v17, %v5680_v17  ;;  %v1789_v4 = vadd.f32 %v1788_v21, %v1787_v9  ;;  %v1916_v43 = vrot.slane %v1915_v13, 2 }
 0x1d6   : > { %v1773_v35 = vadd.f32 %v1772_v2, %v1771_v32  ;;  %v1900_v44 = vrot.slane %v1899_v62, 1  ;;  %v5689_v15 = vadd.f32 %v1751_v37, %v1722_v54  ;;  %v1781_v40 = vadd.f32 %v1780_v36, %v5682_v46 }
 0x1d7   : > { %v2025_v7 = vsub.f32 %v1993_v5, %v2009_v6  ;;  %v1790_v50 = vrot.slane %v1789_v4, 1  ;;  %v1917_v16 = vadd.f32 %v1916_v43, %v1915_v13  ;;  %v1908_v30 = vrot.slane %v1882_v59, 4 }
 0x1d8   : > { %7117 = vst [vmem:[#allocation25_spill] sm:$0xff] %v5689_v15  ;;  %v5691_v34 = vmul.f32 0.125, %v1773_v35  ;;  %v1901_v53 = vadd.f32 %v1900_v44, %v1899_v62  ;;  %v1798_v42 = vrot.slane %v5689_v15, 4  ;;  %v1782_v47 = vrot.slane %v1781_v40, 2 }
 0x1d9   : > { %v2041_v58 = vmax.f32 %v2025_v7, 0.0  ;;  %v1791_v3 = vadd.f32 %v1790_v50, %v1789_v4  ;;  %v1918_v29 = vrot.slane %v1917_v16, 1  ;;  %v1909_v38 = vadd.f32 %v1908_v30, %v1882_v59  ;;  %v1664_v18 = vpop.f32.mrf.mxu2  ;;  %v1693_v60 = vpop.f32.mrf.mxu3 }
 0x1da   : > { %v1992_v24 = vmul.f32 0.125, %v1901_v53  ;;  %v2008_v49 = vmul.f32 %v5691_v34, %v5691_v34  ;;  %v1799_v39 = vadd.f32 %v1798_v42, %v5689_v15  ;;  %v1783_v48 = vadd.f32 %v1782_v47, %v1781_v40 }
 0x1db   : > { %v5697_v23 = vmul.f32 0.125, %v1791_v3  ;;  %v1919_v1 = vadd.f32 %v1918_v29, %v1917_v16  ;;  %v5700_v14 = vadd.f32 1e-05, %v2041_v58  ;;  %v1910_v52 = vrot.slane %v1909_v38, 2 }
 0x1dc   : > { %v1885_v10 = vmul.f32 %v5689_v15, %v5689_v15  ;;  %v1800_v51 = vrot.slane %v1799_v39, 2  ;;  %v1784_v56 = vrot.slane %v1783_v48, 1  ;;  %v4122_v32 = vor.u32 %v4261_v8, %v4119_v25  ;;  %v1724_v2 = vpop.f32.mrf.mxu0  ;;  %v1753_v62 = vpop.f32.mrf.mxu1  ;;  %v4023_v15 = vld [vmem:[#allocation7 + $0x38] sm:$0xf0] }
 0x1dd   : > { %v1995_v27 = vmul.f32 0.125, %v1919_v1  ;;  %v2011_v57 = vmul.f32 %v5697_v23, %v5697_v23  ;;  %v1911_v12 = vadd.f32 %v1910_v52, %v1909_v38  ;;  %v2024_v31 = vsub.f32 %v1992_v24, %v2008_v49  ;;  %v4047_v49 = vld [vmem:[#allocation7 + $0x68] sm:$0xf0]  ;;  %v4259_v52 = vld [vmem:[#allocation7 + $0xe4] sm:$0xf] }
 0x1de   : > { %v1926_v9 = vrot.slane %v1885_v10, 4  ;;  %v1801_v20 = vadd.f32 %v1800_v51, %v1799_v39  ;;  %v1785_v19 = vadd.f32 %v1784_v56, %v1783_v48  ;;  %2759 = vmatpush.bf16.msra.mxu1 %v4122_v32  ;;  %v4046_v5 = vor.u32 %v4244_v0, %v4045_v63 }
 0x1df   : > { %v2027_v55 = vsub.f32 %v1995_v27, %v2011_v57  ;;  %v1912_v21 = vrot.slane %v1911_v12, 1  ;;  %v4110_v6 = vor.u32 %v4260_v22, %v4109_v61  ;;  %4390 = vrsqrt.f32 %v5700_v14 }
 0x1e0   : > { %v1927_v13 = vadd.f32 %v1926_v9, %v1885_v10  ;;  %v1802_v37 = vrot.slane %v1801_v20, 1  ;;  %v5707_v4 = vmul.f32 0.125, %v1785_v19  ;;  %2673 = vmatpush.bf16.msrb.mxu2 %v4046_v5  ;;  %v5711_v59 = vadd.f32 %v1693_v60, %v1664_v18  ;;  %v4111_v10 = vld [vmem:[#allocation7 + $0xe8] sm:$0xf0]  ;;  %v4242_v9 = vld [vmem:[#allocation7 + $0x54] sm:$0xf0] }
 0x1e1   : > { %v2043_v54 = vmax.f32 %v2027_v55, 0.0  ;;  %v1913_v43 = vadd.f32 %v1912_v21, %v1911_v12  ;;  %2702 = vmatpush.bf16.msrb.mxu3 %v4110_v6  ;;  %v5713_v7 = vadd.f32 %v1753_v62, %v1724_v2  ;;  %v2040_v50 = vmax.f32 %v2024_v31, 0.0  ;;  %v4037_v12 = vld [vmem:[#allocation7 + $0x50] sm:$0xf]  ;;  %v1666_v61 = vpop.f32.mrf.mxu2  ;;  %v1695_v22 = vpop.f32.mrf.mxu3  ;;  %v4258_v60 = vld [vmem:[#allocation7 + $0xd4] sm:$0xf0] }
 0x1e2   : > { %7118 = vst [vmem:[#allocation19_spill] sm:$0xff] %v5707_v4  ;;  %v1928_v35 = vrot.slane %v1927_v13, 2  ;;  %v1803_v36 = vadd.f32 %v1802_v37, %v1801_v20  ;;  %v2010_v53 = vmul.f32 %v5707_v4, %v5707_v4  ;;  %v1792_v58 = vrot.slane %v5711_v59, 4  ;;  %v4101_v18 = vld [vmem:[#allocation7 + $0xd0] sm:$0xf] }
 0x1e3   : > { %v5709_v44 = vadd.f32 1e-05, %v2043_v54  ;;  %7119 = vst [vmem:[#allocation21_spill] sm:$0xff] %v5711_v59  ;;  %v1994_v16 = vmul.f32 0.125, %v1913_v43  ;;  %v1884_v3 = vmul.f32 %v5711_v59, %v5711_v59  ;;  %v1810_v24 = vrot.slane %v5713_v7, 4 }
 0x1e4   : > { %7120 = vst [vmem:[#allocation28_spill] sm:$0xff] %v5713_v7  ;;  %v1929_v40 = vadd.f32 %v1928_v35, %v1927_v13  ;;  %v5718_v30 = vmul.f32 0.125, %v1803_v36  ;;  %v1887_v38 = vmul.f32 %v5713_v7, %v5713_v7  ;;  %v5728_v39 = vadd.f32 1e-05, %v2040_v50  ;;  %v1727_v31 = vpop.f32.mrf.mxu0  ;;  %v1756_v19 = vpop.f32.mrf.mxu1  ;;  %v4241_v62 = vld [vmem:[#allocation7 + $0x54] sm:$0xf] }
 0x1e5   : > { %4392 = vrsqrt.f32 %v5709_v44  ;;  %v2026_v29 = vsub.f32 %v1994_v16, %v2010_v53  ;;  %v1920_v47 = vrot.slane %v1884_v3, 4  ;;  %v5726_v1 = vpop.eup %4390  ;;  %v1811_v48 = vadd.f32 %v1810_v24, %v5713_v7  ;;  %v4039_v43 = vld [vmem:[#allocation7 + $0x58] sm:$0xf0]  ;;  %v4232_v4 = vld [vmem:[#allocation7 + $0x4] sm:$0xf0] }
 0x1e6   : > { %7121 = vst [vmem:[#allocation31_spill] sm:$0xff] %v5718_v30  ;;  %v1930_v42 = vrot.slane %v1929_v40, 1  ;;  %v2013_v8 = vmul.f32 %v5718_v30, %v5718_v30  ;;  %v1793_v27 = vadd.f32 %v1792_v58, %v5711_v59  ;;  %v1938_v51 = vrot.slane %v1887_v38, 4 }
 0x1e7   : > { %v2042_v25 = vmax.f32 %v2026_v29, 0.0  ;;  %v1921_v57 = vadd.f32 %v1920_v47, %v1884_v3  ;;  %v1812_v0 = vrot.slane %v1811_v48, 2  ;;  %v4050_v56 = vor.u32 %v4243_v28, %v4047_v49 }
 0x1e8   : > { %v1931_v11 = vadd.f32 %v1930_v42, %v1929_v40  ;;  %v1939_v41 = vadd.f32 %v1938_v51, %v1887_v38  ;;  %v4114_v32 = vor.u32 %v4259_v52, %v4111_v10  ;;  %v2083_v21 = vmul.f32 %v5726_v1, %v5700_v14  ;;  %v4240_v51 = vld [vmem:[#allocation7 + $0x44] sm:$0xf0] }
 0x1e9   : > { %v1922_v20 = vrot.slane %v1921_v57, 2  ;;  %4394 = vrsqrt.f32 %v5728_v39  ;;  %v1813_v2 = vadd.f32 %v1812_v0, %v1811_v48  ;;  %2731 = vmatpush.bf16.msra.mxu0 %v4050_v56  ;;  %v5739_v54 = vadd.f32 1e-05, %v2042_v25  ;;  %v4103_v48 = vld [vmem:[#allocation7 + $0xd8] sm:$0xf0] }
 0x1ea   : > { %v1997_v63 = vmul.f32 0.125, %v1931_v11  ;;  %v1794_v37 = vrot.slane %v1793_v27, 2  ;;  %v1940_v5 = vrot.slane %v1939_v41, 2  ;;  %2760 = vmatpush.bf16.msra.mxu1 %v4114_v32  ;;  %v4038_v6 = vor.u32 %v4242_v9, %v4037_v12  ;;  %v4093_v12 = vld [vmem:[#allocation7 + $0xc0] sm:$0xf]  ;;  %v1669_v32 = vpop.f32.mrf.mxu2 }
 0x1eb   : > { %v5734_v55 = vpop.eup %4392  ;;  %v1814_v50 = vrot.slane %v1813_v2, 1  ;;  %v4102_v16 = vor.u32 %v4258_v60, %v4101_v18  ;;  %v1923_v53 = vadd.f32 %v1922_v20, %v1921_v57  ;;  %v5743_v58 = vadd.f32 %v1695_v22, %v1666_v61  ;;  %v4029_v57 = vld [vmem:[#allocation7 + $0x40] sm:$0xf]  ;;  %v4256_v9 = vld [vmem:[#allocation7 + $0xc4] sm:$0xf0]  ;;  %v1698_v18 = vpop.f32.mrf.mxu3 }
 0x1ec   : > { %v2029_v13 = vsub.f32 %v1997_v63, %v2013_v8  ;;  %v2103_v35 = vmul.f32 %v5734_v55, %v5709_v44  ;;  %v1941_v40 = vadd.f32 %v1940_v5, %v1939_v41  ;;  %2674 = vmatpush.bf16.msrb.mxu2 %v4038_v6  ;;  %v5745_v3 = vadd.f32 %v1756_v19, %v1727_v31  ;;  %v4257_v8 = vld [vmem:[#allocation7 + $0xd4] sm:$0xf] }
 0x1ed   : > { %7122 = vst [vmem:[#allocation22_spill] sm:$0xff] %v5743_v58  ;;  %v2084_v29 = vmul.f32 %v5726_v1, %v2083_v21  ;;  %v1815_v24 = vadd.f32 %v1814_v50, %v1813_v2  ;;  %2703 = vmatpush.bf16.msrb.mxu3 %v4102_v16  ;;  %v4042_v47 = vor.u32 %v4241_v62, %v4039_v43  ;;  %v1804_v49 = vrot.slane %v5743_v58, 4  ;;  %v1758_v2 = vpop.f32.mrf.mxu1 }
 0x1ee   : > { %v2045_v36 = vmax.f32 %v2029_v13, 0.0  ;;  %7123 = vst [vmem:[#allocation26_spill] sm:$0xff] %v5745_v3  ;;  %v5750_v38 = vadd.f32 %v1794_v37, %v1793_v27  ;;  %v1942_v28 = vrot.slane %v1941_v40, 1  ;;  %v1886_v11 = vmul.f32 %v5743_v58, %v5743_v58  ;;  %v1729_v13 = vpop.f32.mrf.mxu0 }
 0x1ef   : > { %v5755_v52 = vpop.eup %4394  ;;  %4396 = vrsqrt.f32 %v5739_v54  ;;  %v5758_v10 = vmul.f32 0.125, %v1815_v24  ;;  %v1822_v25 = vrot.slane %v5745_v3, 4  ;;  %v1889_v27 = vmul.f32 %v5745_v3, %v5745_v3  ;;  %2732 = vmatpush.bf16.msra.mxu0 %v4042_v47 }
 0x1f0   : > { %v5748_v42 = vadd.f32 1e-05, %v2045_v36  ;;  %v2104_v63 = vmul.f32 %v5734_v55, %v2103_v35  ;;  %v1924_v0 = vrot.slane %v1923_v53, 1  ;;  %v1943_v56 = vadd.f32 %v1942_v28, %v1941_v40 }
 0x1f1   : > { %7124 = vst [vmem:[#allocation23_spill] sm:$0xff] %v5758_v10  ;;  %v1805_v61 = vadd.f32 %v1804_v49, %v5743_v58  ;;  %v1932_v22 = vrot.slane %v1886_v11, 4  ;;  %v1823_v20 = vadd.f32 %v1822_v25, %v5745_v3  ;;  %v1950_v41 = vrot.slane %v1889_v27, 4  ;;  %v4237_v58 = vld [vmem:[#allocation7 + $0x34] sm:$0xf] }
 0x1f2   : > { %4398 = vrsqrt.f32 %v5748_v42  ;;  %v1999_v60 = vmul.f32 0.125, %v1943_v56  ;;  %v2015_v31 = vmul.f32 %v5758_v10, %v5758_v10  ;;  %v4106_v19 = vor.u32 %v4257_v8, %v4103_v48 }
 0x1f3   : > { %v4030_v21 = vor.u32 %v4240_v51, %v4029_v57  ;;  %v1933_v62 = vadd.f32 %v1932_v22, %v1886_v11  ;;  %v1824_v37 = vrot.slane %v1823_v20, 2  ;;  %v1951_v5 = vadd.f32 %v1950_v41, %v1889_v27  ;;  %v4031_v41 = vld [vmem:[#allocation7 + $0x48] sm:$0xf0] }
 0x1f4   : > { %v4094_v6 = vor.u32 %v4256_v9, %v4093_v12  ;;  %v5769_v43 = vmul.f32 0.5, %v2084_v29  ;;  %v5773_v35 = vmul.f32 %v5755_v52, %v5728_v39  ;;  %2761 = vmatpush.bf16.msra.mxu1 %v4106_v19  ;;  %v5775_v36 = vadd.f32 %v1698_v18, %v1669_v32  ;;  %v4255_v19 = vld [vmem:[#allocation7 + $0xc4] sm:$0xf] }
 0x1f5   : > { %2675 = vmatpush.bf16.msrb.mxu2 %v4030_v21  ;;  %v5777_v50 = vpop.eup %4396  ;;  %v1934_v16 = vrot.slane %v1933_v62, 2  ;;  %v1825_v40 = vadd.f32 %v1824_v37, %v1823_v20  ;;  %v1952_v24 = vrot.slane %v1951_v5, 2  ;;  %v5779_v47 = vadd.f32 %v1758_v2, %v1729_v13  ;;  %v4239_v20 = vld [vmem:[#allocation7 + $0x44] sm:$0xf]  ;;  %v4095_v21 = vld [vmem:[#allocation7 + $0xc8] sm:$0xf0] }
 0x1f6   : > { %7125 = vst [vmem:[#allocation27_spill] sm:$0xff] %v5775_v36  ;;  %2704 = vmatpush.bf16.msrb.mxu3 %v4094_v6  ;;  %v5783_v29 = vmul.f32 0.5, %v2104_v63  ;;  %v1925_v11 = vadd.f32 %v1924_v0, %v1923_v53  ;;  %v1806_v8 = vrot.slane %v1805_v61, 2  ;;  %v2031_v48 = vsub.f32 %v1999_v60, %v2015_v31  ;;  %v4238_v6 = vld [vmem:[#allocation7 + $0x34] sm:$0xf0] }
 0x1f7   : > { %7126 = vst [vmem:[#allocation34_spill] sm:$0xff] %v5779_v47  ;;  %v1826_v25 = vrot.slane %v1825_v40, 1  ;;  %v1953_v27 = vadd.f32 %v1952_v24, %v1951_v5  ;;  %v1888_v57 = vmul.f32 %v5775_v36, %v5775_v36  ;;  %v5790_v51 = vmul.f32 %v5777_v50, %v5739_v54 }
 0x1f8   : > { %v5781_v28 = vpop.eup %4398  ;;  %v1816_v56 = vrot.slane %v5775_v36, 4  ;;  %v1834_v12 = vrot.slane %v5779_v47, 4  ;;  %v1891_v63 = vmul.f32 %v5779_v47, %v5779_v47  ;;  %v1935_v9 = vadd.f32 %v1934_v16, %v1933_v62  ;;  %v4021_v62 = vld [vmem:[#allocation7 + $0x30] sm:$0xf]  ;;  %v1671_v16 = vpop.f32.mrf.mxu2 }
 0x1f9   : > { %v1827_v53 = vadd.f32 %v1826_v25, %v1825_v40  ;;  %v1954_v0 = vrot.slane %v1953_v27, 1  ;;  %v1944_v22 = vrot.slane %v1888_v57, 4  ;;  %v5796_v32 = vmul.f32 0.125, %v1925_v11  ;;  %v1700_v40 = vpop.f32.mrf.mxu3  ;;  %v4085_v25 = vld [vmem:[#allocation7 + $0xb0] sm:$0xf] }
 0x1fa   : > { %v5798_v18 = vadd.f32 %v1806_v8, %v1805_v61  ;;  %v1835_v60 = vadd.f32 %v1834_v12, %v5779_v47  ;;  %v1962_v31 = vrot.slane %v1891_v63, 4  ;;  %v2047_v13 = vmax.f32 %v2031_v48, 0.0  ;;  %v4254_v12 = vld [vmem:[#allocation7 + $0xb4] sm:$0xf0] }
 0x1fb   : > { %v5801_v2 = vmul.f32 0.125, %v1827_v53  ;;  %v1955_v37 = vadd.f32 %v1954_v0, %v1953_v27  ;;  %v1945_v5 = vadd.f32 %v1944_v22, %v1888_v57  ;;  %v5805_v24 = vmul.f32 %v5781_v28, %v5748_v42  ;;  %v1732_v49 = vpop.f32.mrf.mxu0  ;;  %v1761_v47 = vpop.f32.mrf.mxu1 }
 0x1fc   : > { %v1836_v61 = vrot.slane %v1835_v60, 2  ;;  %v1963_v11 = vadd.f32 %v1962_v31, %v1891_v63  ;;  %v4034_v8 = vor.u32 %v4239_v20, %v4031_v41  ;;  %v1936_v48 = vrot.slane %v1935_v9, 1 }
 0x1fd   : > { %7127 = vst [vmem:[#allocation29_spill] sm:$0xff] %v5801_v2  ;;  %v2001_v53 = vmul.f32 0.125, %v1955_v37  ;;  %v2017_v27 = vmul.f32 %v5801_v2, %v5801_v2  ;;  %v1817_v57 = vadd.f32 %v1816_v56, %v5775_v36  ;;  %v1946_v0 = vrot.slane %v1945_v5, 2  ;;  %v4015_v56 = vld [vmem:[#allocation7 + $0x28] sm:$0xf0] }
 0x1fe   : > { %v1837_v22 = vadd.f32 %v1836_v61, %v1835_v60  ;;  %v1964_v3 = vrot.slane %v1963_v11, 2  ;;  %2733 = vmatpush.bf16.msra.mxu0 %v4034_v8  ;;  %v4098_v7 = vor.u32 %v4255_v19, %v4095_v21  ;;  %v5810_v63 = vadd.f32 1e-05, %v2047_v13 }
 0x1ff   : > { %v2033_v20 = vsub.f32 %v2001_v53, %v2017_v27  ;;  %v4022_v41 = vor.u32 %v4238_v6, %v4021_v62  ;;  %v4086_v31 = vor.u32 %v4254_v12, %v4085_v25  ;;  %v5812_v37 = vadd.f32 %v1700_v40, %v1671_v16  ;;  %v4253_v6 = vld [vmem:[#allocation7 + $0xb4] sm:$0xf]  ;;  %v4252_v53 = vld [vmem:[#allocation7 + $0xa4] sm:$0xf0] }
 0x200   : > { %7128 = vst [vmem:[#allocation30_spill] sm:$0xff] %v5810_v63  ;;  %v1838_v10 = vrot.slane %v1837_v22, 1  ;;  %v1965_v59 = vadd.f32 %v1964_v3, %v1963_v11  ;;  %2762 = vmatpush.bf16.msra.mxu1 %v4098_v7  ;;  %v5814_v2 = vadd.f32 %v1761_v47, %v1732_v49  ;;  %v1937_v60 = vadd.f32 %v1936_v48, %v1935_v9  ;;  %v4087_v49 = vld [vmem:[#allocation7 + $0xb8] sm:$0xf0]  ;;  %v4013_v9 = vld [vmem:[#allocation7 + $0x20] sm:$0xf]  ;;  %v1674_v27 = vpop.f32.mrf.mxu2 }
 0x201   : > { %7129 = vst [vmem:[#allocation32_spill] sm:$0xff] %v5812_v37  ;;  %v1818_v61 = vrot.slane %v1817_v57, 2  ;;  %2676 = vmatpush.bf16.msrb.mxu2 %v4022_v41  ;;  %2705 = vmatpush.bf16.msrb.mxu3 %v4086_v31  ;;  %v4026_v19 = vor.u32 %v4237_v58, %v4023_v15  ;;  %v1947_v21 = vadd.f32 %v1946_v0, %v1945_v5  ;;  %4400 = vrsqrt.f32 %v5810_v63  ;;  %v4236_v5 = vld [vmem:[#allocation7 + $0x24] sm:$0xf0]  ;;  %v4077_v48 = vld [vmem:[#allocation7 + $0xa0] sm:$0xf]  ;;  %v1703_v0 = vpop.f32.mrf.mxu3 }
 0x202   : > { %7130 = vst [vmem:[#allocation33_spill] sm:$0xff] %v5814_v2  ;;  %v1839_v13 = vadd.f32 %v1838_v10, %v1837_v22  ;;  %v1966_v8 = vrot.slane %v1965_v59, 1  ;;  %v1890_v62 = vmul.f32 %v5812_v37, %v5812_v37  ;;  %v2049_v7 = vmax.f32 %v2033_v20, 0.0 }
 0x203   : > { %v1846_v3 = vrot.slane %v5814_v2, 4  ;;  %v1893_v47 = vmul.f32 %v5814_v2, %v5814_v2  ;;  %2734 = vmatpush.bf16.msra.mxu0 %v4026_v19  ;;  %v1828_v58 = vrot.slane %v5812_v37, 4  ;;  %v5826_v40 = vmul.f32 0.125, %v1937_v60  ;;  %v1734_v31 = vpop.f32.mrf.mxu0  ;;  %v1763_v19 = vpop.f32.mrf.mxu1 }
 0x204   : > { %v5823_v16 = vmul.f32 0.125, %v1839_v13  ;;  %v1967_v15 = vadd.f32 %v1966_v8, %v1965_v59  ;;  %v1956_v10 = vrot.slane %v1890_v62, 4  ;;  %v5828_v11 = vadd.f32 %v1818_v61, %v1817_v57  ;;  %v4235_v61 = vld [vmem:[#allocation7 + $0x24] sm:$0xf] }
 0x205   : > { %v1847_v25 = vadd.f32 %v1846_v3, %v5814_v2  ;;  %v1974_v12 = vrot.slane %v1893_v47, 4  ;;  %v1948_v22 = vrot.slane %v1947_v21, 1  ;;  %v4090_v8 = vor.u32 %v4253_v6, %v4087_v49 }
 0x206   : > { %7131 = vst [vmem:[#allocation35_spill] sm:$0xff] %v5823_v16  ;;  %v2003_v20 = vmul.f32 0.125, %v1967_v15  ;;  %v2019_v59 = vmul.f32 %v5823_v16, %v5823_v16  ;;  %v1957_v41 = vadd.f32 %v1956_v10, %v1890_v62  ;;  %v4014_v57 = vor.u32 %v4236_v5, %v4013_v9 }
 0x207   : > { %7132 = vst [vmem:[#allocation36_spill] sm:$0xff] %v5828_v11  ;;  %v1848_v13 = vrot.slane %v1847_v25, 2  ;;  %v1975_v60 = vadd.f32 %v1974_v12, %v1893_v47  ;;  %v5833_v3 = vadd.f32 1e-05, %v2049_v7  ;;  %v1829_v2 = vadd.f32 %v1828_v58, %v5812_v37  ;;  %v5836_v26 = vpop.eup %4400  ;;  %2763 = vmatpush.bf16.msra.mxu1 %v4090_v8  ;;  %v4249_v37 = vld [vmem:[#allocation7 + $0x94] sm:$0xf] }
 0x208   : > { %v1958_v36 = vrot.slane %v1957_v41, 2  ;;  %v4078_v30 = vor.u32 %v4252_v53, %v4077_v48  ;;  %2677 = vmatpush.bf16.msrb.mxu2 %v4014_v57  ;;  %v5838_v62 = vadd.f32 %v1703_v0, %v1674_v27  ;;  %v5840_v10 = vadd.f32 %v1763_v19, %v1734_v31  ;;  %v4251_v27 = vld [vmem:[#allocation7 + $0xa4] sm:$0xf]  ;;  %v4069_v19 = vld [vmem:[#allocation7 + $0x90] sm:$0xf]  ;;  %v1676_v6 = vpop.f32.mrf.mxu2 }
 0x209   : > { %v1849_v15 = vadd.f32 %v1848_v13, %v1847_v25  ;;  %v1976_v46 = vrot.slane %v1975_v60, 2  ;;  %v1949_v47 = vadd.f32 %v1948_v22, %v1947_v21  ;;  %v2035_v49 = vsub.f32 %v2003_v20, %v2019_v59  ;;  %v4079_v22 = vld [vmem:[#allocation7 + $0xa8] sm:$0xf0] }
 0x20a   : > { %7133 = vst [vmem:[#allocation37_spill] sm:$0xff] %v5838_v62  ;;  %2706 = vmatpush.bf16.msrb.mxu3 %v4078_v30  ;;  %v4018_v7 = vor.u32 %v4235_v61, %v4015_v56  ;;  %v1840_v5 = vrot.slane %v5838_v62, 4  ;;  %v1892_v25 = vmul.f32 %v5838_v62, %v5838_v62  ;;  %4402 = vrsqrt.f32 %v5833_v3  ;;  %v4250_v61 = vld [vmem:[#allocation7 + $0x94] sm:$0xf0] }
 0x20b   : > { %7134 = vst [vmem:[#allocation38_spill] sm:$0xff] %v5840_v10  ;;  %v1850_v9 = vrot.slane %v1849_v15, 1  ;;  %v1977_v58 = vadd.f32 %v1976_v46, %v1975_v60  ;;  %v1830_v12 = vrot.slane %v1829_v2, 2  ;;  %v1959_v48 = vadd.f32 %v1958_v36, %v1957_v41  ;;  %v4005_v46 = vld [vmem:[#allocation7 + $0x10] sm:$0xf] }
 0x20c   : > { %v1858_v53 = vrot.slane %v5840_v10, 4  ;;  %2735 = vmatpush.bf16.msra.mxu0 %v4018_v7  ;;  %v1841_v30 = vadd.f32 %v1840_v5, %v5838_v62  ;;  %v1968_v56 = vrot.slane %v1892_v25, 4  ;;  %v5851_v20 = vmul.f32 %v5836_v26, %v5810_v63  ;;  %v4234_v41 = vld [vmem:[#allocation7 + $0x14] sm:$0xf0]  ;;  %v1705_v62 = vpop.f32.mrf.mxu3 }
 0x20d   : > { %v1851_v0 = vadd.f32 %v1850_v9, %v1849_v15  ;;  %v1978_v21 = vrot.slane %v1977_v58, 1  ;;  %v5853_v59 = vmul.f32 0.125, %v1949_v47  ;;  %v1895_v36 = vmul.f32 %v5840_v10, %v5840_v10  ;;  %v4233_v15 = vld [vmem:[#allocation7 + $0x14] sm:$0xf] }
 0x20e   : > { %v1859_v31 = vadd.f32 %v1858_v53, %v5840_v10  ;;  %v2051_v13 = vmax.f32 %v2035_v49, 0.0  ;;  %v1969_v57 = vadd.f32 %v1968_v56, %v1892_v25  ;;  %v5860_v7 = vadd.f32 %v1830_v12, %v1829_v2  ;;  %v4007_v53 = vld [vmem:[#allocation7 + $0x18] sm:$0xf0] }
 0x20f   : > { %7135 = vst [vmem:[#allocation39_spill] sm:$0xff] %v5853_v59  ;;  %v5858_v60 = vmul.f32 0.125, %v1851_v0  ;;  %v1979_v8 = vadd.f32 %v1978_v21, %v1977_v58  ;;  %v1986_v5 = vrot.slane %v1895_v36, 4  ;;  %v4082_v47 = vor.u32 %v4251_v27, %v4079_v22  ;;  %v4071_v59 = vld [vmem:[#allocation7 + $0x98] sm:$0xf0] }
 0x210   : > { %v1860_v9 = vrot.slane %v1859_v31, 2  ;;  %v1960_v16 = vrot.slane %v1959_v48, 1  ;;  %v1842_v0 = vrot.slane %v1841_v30, 2  ;;  %v5864_v58 = vpop.eup %4402  ;;  %v4006_v2 = vor.u32 %v4234_v41, %v4005_v46 }
 0x211   : > { %7136 = vst [vmem:[#allocation40_spill] sm:$0xff] %v5858_v60  ;;  %v2005_v10 = vmul.f32 0.125, %v1979_v8  ;;  %v2021_v49 = vmul.f32 %v5858_v60, %v5858_v60  ;;  %v1987_v21 = vadd.f32 %v1986_v5, %v1895_v36  ;;  %2764 = vmatpush.bf16.msra.mxu1 %v4082_v47  ;;  %v4070_v12 = vor.u32 %v4250_v61, %v4069_v19  ;;  %v4248_v19 = vld [vmem:[#allocation7 + $0x84] sm:$0xf0] }
 0x212   : > { %v1861_v25 = vadd.f32 %v1860_v9, %v1859_v31  ;;  %v5866_v56 = vadd.f32 1e-05, %v2051_v13  ;;  %v1970_v22 = vrot.slane %v1969_v57, 2  ;;  %v5868_v63 = vadd.f32 %v1705_v62, %v1676_v6  ;;  %2678 = vmatpush.bf16.msrb.mxu2 %v4006_v2  ;;  %v4063_v9 = vld [vmem:[#allocation7 + $0x88] sm:$0xf0] }
 0x213   : > { %v2037_v27 = vsub.f32 %v2005_v10, %v2021_v49  ;;  %v1988_v8 = vrot.slane %v1987_v21, 2  ;;  %2707 = vmatpush.bf16.msrb.mxu3 %v4070_v12  ;;  %v4010_v60 = vor.u32 %v4233_v15, %v4007_v53  ;;  %v4074_v33 = vor.u32 %v4249_v37, %v4071_v59  ;;  %v4061_v10 = vld [vmem:[#allocation7 + $0x80] sm:$0xf]  ;;  %v4231_v37 = vld [vmem:[#allocation7 + $0x4] sm:$0xf] }
 0x214   : > { %v1862_v11 = vrot.slane %v1861_v25, 1  ;;  %v5872_v31 = vmul.f32 %v5864_v58, %v5833_v3  ;;  %v1961_v46 = vadd.f32 %v1960_v16, %v1959_v48  ;;  %v5874_v41 = vadd.f32 %v1842_v0, %v1841_v30  ;;  %v3999_v59 = vld [vmem:[#allocation7 + $0x8] sm:$0xf0]  ;;  %v4247_v30 = vld [vmem:[#allocation7 + $0x84] sm:$0xf] }
 0x215   : > { %v2053_v36 = vmax.f32 %v2037_v27, 0.0  ;;  %v1832_v62 = vrot.slane %v5860_v7, 1  ;;  %v1989_v13 = vadd.f32 %v1988_v8, %v1987_v21  ;;  %v1894_v61 = vmul.f32 %v5868_v63, %v5868_v63  ;;  %2736 = vmatpush.bf16.msra.mxu0 %v4010_v60  ;;  %2765 = vmatpush.bf16.msra.mxu1 %v4074_v33 }
 0x216   : > { %v1863_v6 = vadd.f32 %v1862_v11, %v1861_v25  ;;  %4404 = vrsqrt.f32 %v5866_v56  ;;  %v5880_v15 = vadd.f32 %v1970_v22, %v1969_v57  ;;  %v1852_v16 = vrot.slane %v5868_v63, 4 }
 0x217   : > { %v3998_v48 = vor.u32 %v4232_v4, %v3997_v45  ;;  %v1990_v11 = vrot.slane %v1989_v13, 1  ;;  %v1980_v47 = vrot.slane %v1894_v61, 4  ;;  %v4062_v53 = vor.u32 %v4248_v19, %v4061_v10 }
 0x218   : > { %v5883_v5 = vmul.f32 0.125, %v1863_v6  ;;  %vm2078_vm7 = vweird.f32 %v5728_v39  ;;  %v5886_v60 = vmul.f32 0.125, %v1961_v46  ;;  %v5888_v33 = vadd.f32 1e-05, %v2053_v36  ;;  %v5936_v39 = vld [vmem:[%s6982_s7] sm:$0x3] }
 0x219   : > { %v1844_v49 = vrot.slane %v5874_v41, 1  ;;  %2679 = vmatpush.bf16.msrb.mxu2 %v3998_v48  ;;  %v4002_v57 = vor.u32 %v4231_v37, %v3999_v59  ;;  %v1991_v0 = vadd.f32 %v1990_v11, %v1989_v13  ;;  %v1981_v4 = vadd.f32 %v1980_v47, %v1894_v61  ;;  %2708 = vmatpush.bf16.msrb.mxu3 %v4062_v53 }
 0x21a   : > { %v2023_v45 = vmul.f32 %v5883_v5, %v5883_v5  ;;  %v4066_v25 = vor.u32 %v4247_v30, %v4063_v9  ;;  %v1972_v21 = vrot.slane %v5880_v15, 1  ;;  %v1853_v2 = vadd.f32 %v1852_v16, %v5868_v63 }
 0x21b   : > { %2737 = vmatpush.bf16.msra.mxu0 %v4002_v57  ;;  %v2074_v12 = vmul.f32 %v5755_v52, %v5773_v35  ;;  %v2086_v27 = vsub.f32 1.5, %v5769_v43  ;;  %v2007_v22 = vmul.f32 0.125, %v1991_v0  ;;  %v1982_v8 = vrot.slane %v1981_v4, 2 }
 0x21c   : > { %2766 = vmatpush.bf16.msra.mxu1 %v4066_v25  ;;  %vm2089_vm9 = vweird.f32 %v5726_v1  ;;  %v2094_v46 = vmul.f32 %v5777_v50, %v5790_v51  ;;  %v5901_v36 = vpop.eup %4404  ;;  %vm2079_vm10 = vweird.f32 %v5755_v52  ;;  %vm2088_vm11 = vweird.f32 %v5700_v14 }
 0x21d   : > { %v2075_v10 = vmul.f32 0.5, %v2074_v12  ;;  %v2087_v19 = vmul.f32 %v5726_v1, %v2086_v27  ;;  %4406 = vrsqrt.f32 %v5888_v33  ;;  %v2039_v43 = vsub.f32 %v2007_v22, %v2023_v45  ;;  %vm5907_vm12 = vmor %vm2088_vm11, %vm2089_vm9 }
 0x21e   : > { %v1983_v35 = vadd.f32 %v1982_v8, %v1981_v4  ;;  %v2095_v13 = vmul.f32 0.5, %v2094_v46  ;;  %v1854_v61 = vrot.slane %v1853_v2, 2  ;;  %v2106_v59 = vsub.f32 1.5, %v5783_v29  ;;  %vm5923_vm1 = vmor %vm2078_vm7, %vm2079_vm10 }
 0x21f   : > { %v2076_v51 = vsub.f32 1.5, %v2075_v10  ;;  %v2091_v37 = vsel %vm5907_vm12, %v5726_v1, %v2087_v19  ;;  %vm2098_vm13 = vweird.f32 %v5739_v54  ;;  %vm2099_vm14 = vweird.f32 %v5777_v50 }
 0x220   : > { %v2096_v16 = vsub.f32 1.5, %v2095_v13  ;;  %vm2108_vm15 = vweird.f32 %v5709_v44  ;;  %v2055_v14 = vmax.f32 %v2039_v43, 0.0  ;;  %v2107_v1 = vmul.f32 %v5734_v55, %v2106_v59  ;;  %vm5943_vm4 = vmor %vm2098_vm13, %vm2099_vm14 }
 0x221   : > { %v2077_v48 = vmul.f32 %v5755_v52, %v2076_v51  ;;  %vm2109_vm2 = vweird.f32 %v5734_v55  ;;  %v1984_v29 = vrot.slane %v1983_v35, 1  ;;  %v2248_v44 = vrot.slane %v2091_v37, 7 }
 0x222   : > { %v2097_v9 = vmul.f32 %v5777_v50, %v2096_v16  ;;  %vm2110_vm3 = vmor %vm2108_vm15, %vm2109_vm2  ;;  %v7141_v11 = vrot.slane %v5750_v38, 1  ;;  %v2124_v4 = vmul.f32 %v5781_v28, %v5805_v24  ;;  %v1973_v54 = vadd.f32 %v1972_v21, %v5880_v15 }
 0x223   : > { %v2081_v53 = vsel %vm5923_vm1, %v5755_v52, %v2077_v48  ;;  %v2111_v0 = vsel %vm2110_vm3, %v5734_v55, %v2107_v1  ;;  %v5953_v25 = vpop.eup %4406  ;;  %v5957_v52 = vmul.f32 %v5901_v36, %v5866_v56  ;;  %v5963_v27 = vadd.f32 %v1854_v61, %v1853_v2 }
 0x224   : > { %v1797_v47 = vadd.f32 %v7141_v11, %v5750_v38  ;;  %v7144_v38 = vrot.slane %v5798_v18, 1  ;;  %v2101_v12 = vsel %vm5943_vm4, %v5777_v50, %v2097_v9  ;;  %v2249_v55 = vrot.slane %v2111_v0, 7  ;;  %v7145_v11 = vld [vmem:[#allocation19_spill] sm:$0xff] }
 0x225   : > { %v5970_v8 = vadd.f32 1e-05, %v2055_v14  ;;  %v1985_v46 = vadd.f32 %v1984_v29, %v1983_v35  ;;  %v2125_v19 = vmul.f32 0.5, %v2124_v4  ;;  %v5979_v43 = vmul.f32 0.125, %v1973_v54  ;;  %v7147_v54 = vld [vmem:[#allocation17_spill] sm:$0xff] }
 0x226   : > { %v1809_v45 = vadd.f32 %v7144_v38, %v5798_v18  ;;  %v2256_v18 = vsel %vm1233_vm8, %v2081_v53, %v2248_v44  ;;  %v5966_v22 = vmul.f32 0.125, %v1797_v47  ;;  %v2257_v10 = vsel %vm1233_vm8, %v2101_v12, %v2249_v55  ;;  %v7148_v55 = vld [vmem:[#allocation36_spill] sm:$0xff] }
 0x227   : > { %v2272_v15 = vmul.f32 %v2256_v18, %v5936_v39  ;;  %v2273_v21 = vmul.f32 %v2257_v10, %v5936_v39  ;;  %v2144_v35 = vmul.f32 %v5836_v26, %v5851_v20  ;;  %v5987_v16 = vmul.f32 %v5953_v25, %v5888_v33 }
 0x228   : > { %v5968_v24 = vmul.f32 0.125, %v1809_v45  ;;  %v2012_v50 = vmul.f32 %v5966_v22, %v5966_v22  ;;  %4408 = vrsqrt.f32 %v5970_v8  ;;  %v1856_v14 = vrot.slane %v5963_v27, 1 }
 0x229   : > { %v2288_v6 = vperm.slane %v2272_v15, 0  ;;  %v2289_v13 = vperm.slane %v2272_v15, 1  ;;  %v2290_v61 = vperm.slane %v2273_v21, 0  ;;  %v2291_v51 = vperm.slane %v2273_v21, 1  ;;  %v7150_v15 = vld [vmem:[#allocation20_spill] sm:$0xff] }
 0x22a   : > { %v2014_v2 = vmul.f32 %v5968_v24, %v5968_v24  ;;  %v2028_v37 = vsub.f32 %v5796_v32, %v2012_v50  ;;  %v5992_v30 = vmul.f32 0.125, %v1985_v46  ;;  %v2126_v1 = vsub.f32 1.5, %v2125_v19  ;;  %v5999_v32 = vld [vmem:[%s6983_s8] sm:$0x3]  ;;  %v7151_v19 = vld [vmem:[#allocation30_spill] sm:$0xff] }
 0x22b   : > { %v2337_v48 = vmul.f32 %v2289_v13, %v5680_v17  ;;  %v2339_v20 = vmul.f32 %v2291_v51, %v5697_v23  ;;  %vm2128_vm5 = vweird.f32 %v5748_v42  ;;  %v2338_v47 = vmul.f32 %v2290_v61, %v7145_v11  ;;  %v7146_v23 = vld [vmem:[#allocation18_spill] sm:$0xff] }
 0x22c   : > { %v2030_v59 = vsub.f32 %v5826_v40, %v2014_v2  ;;  %v2336_v40 = vmul.f32 %v2288_v6, %v5691_v34  ;;  %v2044_v9 = vmax.f32 %v2028_v37, 0.0  ;;  %vm2129_vm6 = vweird.f32 %v5781_v28 }
 0x22d   : > { %v2368_v29 = vrot.slane %v2337_v48, 7  ;;  %v2369_v17 = vrot.slane %v2339_v20, 7  ;;  %v2145_v53 = vmul.f32 0.5, %v2144_v35  ;;  %v2320_v57 = vmul.f32 %v2288_v6, %v7146_v23  ;;  %vm6032_vm9 = vmor %vm2128_vm5, %vm2129_vm6 }
 0x22e   : > { %v2046_v44 = vmax.f32 %v2030_v59, 0.0  ;;  %v6006_v38 = vadd.f32 1e-05, %v2044_v9  ;;  %v2321_v12 = vmul.f32 %v2289_v13, %v7147_v54  ;;  %v7149_v18 = vrot.slane %v7148_v55, 1  ;;  %v6016_v10 = vpop.eup %4408  ;;  %v7152_v59 = vld [vmem:[#allocation24_spill] sm:$0xff]  ;;  %v7155_v54 = vld [vmem:[#allocation39_spill] sm:$0xff] }
 0x22f   : > { %v2376_v0 = vsel %vm1233_vm8, %v2336_v40, %v2368_v29  ;;  %v2377_v4 = vsel %vm1233_vm8, %v2338_v47, %v2369_v17  ;;  %v2322_v21 = vmul.f32 %v2290_v61, %v7150_v15  ;;  %v2127_v2 = vmul.f32 %v5781_v28, %v2126_v1 }
 0x230   : > { %v6008_v45 = vadd.f32 1e-05, %v2046_v44  ;;  %v2392_v34 = vsub.f32 %v5999_v32, %v2376_v0  ;;  %v1821_v46 = vadd.f32 %v7149_v18, %v7148_v55  ;;  %v2393_v50 = vsub.f32 %v5999_v32, %v2377_v4 }
 0x231   : > { %4410 = vrsqrt.f32 %v6006_v38  ;;  %vm2148_vm7 = vweird.f32 %v7151_v19  ;;  %v2146_v13 = vsub.f32 1.5, %v2145_v53  ;;  %v2323_v48 = vmul.f32 %v2291_v51, %v7152_v59 }
 0x232   : > { %v2408_v6 = vperm.slane %v2392_v34, 0  ;;  %v2409_v35 = vperm.slane %v2392_v34, 1  ;;  %4412 = vrsqrt.f32 %v6008_v45  ;;  %v2410_v37 = vperm.slane %v2393_v50, 0 }
 0x233   : > { %v2411_v20 = vperm.slane %v2393_v50, 1  ;;  %v1833_v61 = vadd.f32 %v1832_v62, %v5860_v7  ;;  %vm2149_vm10 = vweird.f32 %v5836_v26  ;;  %v6037_v9 = vmul.f32 0.125, %v1821_v46 }
 0x234   : > { %v2440_v40 = vadd.f32 %v2408_v6, %v2320_v57  ;;  %v2441_v29 = vadd.f32 %v2409_v35, %v2321_v12  ;;  %v2442_v51 = vadd.f32 %v2410_v37, %v2322_v21  ;;  %v2131_v7 = vsel %vm6032_vm9, %v5781_v28, %v2127_v2  ;;  %vm6060_vm13 = vmor %vm2148_vm7, %vm2149_vm10 }
 0x235   : > { %v2443_v44 = vadd.f32 %v2411_v20, %v2323_v48  ;;  %v6042_v62 = vmul.f32 0.125, %v1833_v61  ;;  %v2147_v47 = vmul.f32 %v5836_v26, %v2146_v13  ;;  %v2016_v42 = vmul.f32 %v6037_v9, %v6037_v9 }
 0x236   : > { %v2456_v11 = vmax.f32 %v2440_v40, 0.0  ;;  %v2164_v17 = vmul.f32 %v5864_v58, %v5872_v31  ;;  %v2458_v23 = vmax.f32 %v2442_v51, 0.0  ;;  %v2457_v57 = vmax.f32 %v2441_v29, 0.0 }
 0x237   : > { %v4411_v53 = vpop.eup %4410  ;;  %v2459_v0 = vmax.f32 %v2443_v44, 0.0  ;;  %v2018_v4 = vmul.f32 %v6042_v62, %v6042_v62  ;;  %vm2118_vm11 = vweird.f32 %v6006_v38  ;;  %v2032_v12 = vsub.f32 %v7155_v54, %v2016_v42 }
 0x238   : > { %v4413_v34 = vpop.eup %4412  ;;  %v2113_v28 = vmul.f32 %v4411_v53, %v6006_v38  ;;  %v2165_v55 = vmul.f32 0.5, %v2164_v17  ;;  %v2472_v18 = vpack.c.bf16 %v2458_v23, %v2456_v11  ;;  %vm2138_vm12 = vweird.f32 %v6008_v45 }
 0x239   : > { %v2473_v46 = vpack.c.bf16 %v2459_v0, %v2457_v57  ;;  %v2133_v15 = vmul.f32 %v4413_v34, %v6008_v45  ;;  %v2034_v50 = vsub.f32 %v5886_v60, %v2018_v4  ;;  %v2048_v2 = vmax.f32 %v2032_v12, 0.0 }
 0x23a   : > { %v2114_v31 = vmul.f32 %v4411_v53, %v2113_v28  ;;  %v2166_v6 = vsub.f32 1.5, %v2165_v55  ;;  %2680 = vmatmul.bf16.vlgmr.msrb.gmra.mxu2 %v2472_v18  ;;  %v2151_v13 = vsel %vm6060_vm13, %v5836_v26, %v2147_v47  ;;  %v2250_v37 = vrot.slane %v2131_v7, 7  ;;  %2738 = vmatmul.bf16.vlgmr.msra.gmra.mxu0 %v2472_v18 }
 0x23b   : > { %2709 = vmatmul.bf16.vlgmr.msrb.gmra.mxu3 %v2473_v46  ;;  %v2134_v35 = vmul.f32 %v4413_v34, %v2133_v15  ;;  %v2184_v59 = vmul.f32 %v5901_v36, %v5957_v52  ;;  %2767 = vmatmul.bf16.vlgmr.msra.gmra.mxu1 %v2473_v46  ;;  %vm2119_vm14 = vweird.f32 %v4411_v53  ;;  %v2050_v48 = vmax.f32 %v2034_v50, 0.0 }
 0x23c   : > { %v2115_v19 = vmul.f32 0.5, %v2114_v31  ;;  %v6070_v20 = vadd.f32 1e-05, %v2048_v2  ;;  %vm2169_vm15 = vweird.f32 %v5864_v58  ;;  %v1845_v40 = vadd.f32 %v1844_v49, %v5874_v41  ;;  %vm6086_vm2 = vmor %vm2118_vm11, %vm2119_vm14 }
 0x23d   : > { %v2135_v60 = vmul.f32 0.5, %v2134_v35  ;;  %v2185_v61 = vmul.f32 0.5, %v2184_v59  ;;  %v6076_v29 = vadd.f32 1e-05, %v2050_v48  ;;  %v2167_v52 = vmul.f32 %v5864_v58, %v2166_v6  ;;  %v7164_v35 = vld [vmem:[#allocation31_spill] sm:$0xff]  ;;  %v7165_v59 = vld [vmem:[#allocation21_spill] sm:$0xff] }
 0x23e   : > { %v2116_v26 = vsub.f32 1.5, %v2115_v19  ;;  %4414 = vrsqrt.f32 %v6070_v20  ;;  %vm2139_vm1 = vweird.f32 %v4413_v34  ;;  %v1857_v44 = vadd.f32 %v1856_v14, %v5963_v27  ;;  %v7166_v48 = vld [vmem:[#allocation23_spill] sm:$0xff] }
 0x23f   : > { %v2136_v1 = vsub.f32 1.5, %v2135_v60  ;;  %v2186_v51 = vsub.f32 1.5, %v2185_v61  ;;  %vm2168_vm3 = vweird.f32 %v5833_v3  ;;  %4416 = vrsqrt.f32 %v6076_v29  ;;  %vm2140_vm6 = vmor %vm2138_vm12, %vm2139_vm1  ;;  %v7167_v60 = vld [vmem:[#allocation25_spill] sm:$0xff] }
 0x240   : > { %v2117_v7 = vmul.f32 %v4411_v53, %v2116_v26  ;;  %vm2189_vm4 = vweird.f32 %v5901_v36  ;;  %vm6095_vm5 = vmor %vm2168_vm3, %vm2169_vm15  ;;  %v6100_v14 = vmul.f32 0.125, %v1845_v40  ;;  %v6102_v38 = vmul.f32 0.125, %v1857_v44  ;;  %v7168_v40 = vld [vmem:[#allocation22_spill] sm:$0xff] }
 0x241   : > { %v2137_v49 = vmul.f32 %v4413_v34, %v2136_v1  ;;  %v2187_v27 = vmul.f32 %v5901_v36, %v2186_v51  ;;  %v6106_v3 = vmul.f32 %v6016_v10, %v5970_v8  ;;  %v2251_v42 = vrot.slane %v2151_v13, 7 }
 0x242   : > { %v2121_v47 = vsel %vm6086_vm2, %v4411_v53, %v2117_v7  ;;  %v2171_v17 = vsel %vm6095_vm5, %v5864_v58, %v2167_v52  ;;  %vm2188_vm7 = vweird.f32 %v5866_v56  ;;  %v2020_v0 = vmul.f32 %v6100_v14, %v6100_v14 }
 0x243   : > { %v2141_v23 = vsel %vm2140_vm6, %v4413_v34, %v2137_v49  ;;  %v2258_v57 = vsel %vm1233_vm8, %v2121_v47, %v2250_v37  ;;  %vm6126_vm9 = vmor %vm2188_vm7, %vm2189_vm4  ;;  %v2022_v58 = vmul.f32 %v6102_v38, %v6102_v38  ;;  %v2204_v56 = vmul.f32 %v5953_v25, %v5987_v16 }
 0x244   : > { %v6120_v4 = vpop.eup %4414  ;;  %v2259_v53 = vsel %vm1233_vm8, %v2141_v23, %v2251_v42  ;;  %v2274_v45 = vmul.f32 %v2258_v57, %v5936_v39  ;;  %v2191_v12 = vsel %vm6126_vm9, %v5901_v36, %v2187_v27  ;;  %v2252_v55 = vrot.slane %v2171_v17, 7  ;;  %v7169_v27 = vld [vmem:[#allocation28_spill] sm:$0xff] }
 0x245   : > { %v2275_v34 = vmul.f32 %v2259_v53, %v5936_v39  ;;  %v2153_v54 = vmul.f32 %v6120_v4, %v6070_v20  ;;  %v4417_v18 = vpop.eup %4416  ;;  %vm2158_vm10 = vweird.f32 %v6070_v20  ;;  %v2036_v31 = vsub.f32 %v5979_v43, %v2020_v0 }
 0x246   : > { %v2292_v46 = vperm.slane %v2274_v45, 0  ;;  %v2293_v15 = vperm.slane %v2274_v45, 1  ;;  %v2038_v21 = vsub.f32 %v5992_v30, %v2022_v58  ;;  %v2173_v6 = vmul.f32 %v4417_v18, %v6076_v29 }
 0x247   : > { %v2294_v16 = vperm.slane %v2275_v34, 0  ;;  %v2295_v50 = vperm.slane %v2275_v34, 1  ;;  %v2154_v2 = vmul.f32 %v6120_v4, %v2153_v54  ;;  %vm2159_vm11 = vweird.f32 %v6120_v4 }
 0x248   : > { %v2341_v13 = vmul.f32 %v2293_v15, %v7164_v35  ;;  %vm2178_vm12 = vweird.f32 %v6076_v29  ;;  %v2253_v36 = vrot.slane %v2191_v12, 7  ;;  %v2205_v37 = vmul.f32 0.5, %v2204_v56  ;;  %vm2160_vm15 = vmor %vm2158_vm10, %vm2159_vm11 }
 0x249   : > { %v2324_v19 = vmul.f32 %v2292_v46, %v7165_v59  ;;  %v2340_v43 = vmul.f32 %v2292_v46, %v5966_v22  ;;  %v2343_v30 = vmul.f32 %v2295_v50, %v7166_v48  ;;  %v2325_v61 = vmul.f32 %v2293_v15, %v7167_v60 }
 0x24a   : > { %v2326_v26 = vmul.f32 %v2294_v16, %v7168_v40  ;;  %v2370_v52 = vrot.slane %v2341_v13, 7  ;;  %v2155_v1 = vmul.f32 0.5, %v2154_v2  ;;  %v2174_v51 = vmul.f32 %v4417_v18, %v2173_v6 }
 0x24b   : > { %v2342_v44 = vmul.f32 %v2294_v16, %v5968_v24  ;;  %v2371_v7 = vrot.slane %v2343_v30, 7  ;;  %v2052_v41 = vmax.f32 %v2036_v31, 0.0  ;;  %v2054_v49 = vmax.f32 %v2038_v21, 0.0 }
 0x24c   : > { %v2378_v11 = vsel %vm1233_vm8, %v2340_v43, %v2370_v52  ;;  %v2327_v47 = vmul.f32 %v2295_v50, %v7169_v27  ;;  %v2156_v42 = vsub.f32 1.5, %v2155_v1  ;;  %v2175_v22 = vmul.f32 0.5, %v2174_v51  ;;  %v7173_v52 = vld [vmem:[#allocation35_spill] sm:$0xff] }
 0x24d   : > { %vm2209_vm13 = vweird.f32 %v5953_v25  ;;  %v2379_v17 = vsel %vm1233_vm8, %v2342_v44, %v2371_v7  ;;  %v2394_v23 = vsub.f32 %v5999_v32, %v2378_v11  ;;  %vm2179_vm14 = vweird.f32 %v4417_v18  ;;  %v7174_v11 = vld [vmem:[#allocation27_spill] sm:$0xff] }
 0x24e   : > { %v6159_v57 = vadd.f32 1e-05, %v2052_v41  ;;  %v2395_v24 = vsub.f32 %v5999_v32, %v2379_v17  ;;  %v2157_v0 = vmul.f32 %v6120_v4, %v2156_v42  ;;  %v2176_v53 = vsub.f32 1.5, %v2175_v22  ;;  %vm2180_vm1 = vmor %vm2178_vm12, %vm2179_vm14 }
 0x24f   : > { %v2206_v45 = vsub.f32 1.5, %v2205_v37  ;;  %v2412_v28 = vperm.slane %v2394_v23, 0  ;;  %v2413_v58 = vperm.slane %v2394_v23, 1  ;;  %v6167_v56 = vadd.f32 1e-05, %v2054_v49 }
 0x250   : > { %4418 = vrsqrt.f32 %v6159_v57  ;;  %v2414_v34 = vperm.slane %v2395_v24, 0  ;;  %v2415_v54 = vperm.slane %v2395_v24, 1  ;;  %v2161_v12 = vsel %vm2160_vm15, %v6120_v4, %v2157_v0  ;;  %v7175_v0 = vld [vmem:[#allocation26_spill] sm:$0xff] }
 0x251   : > { %v2177_v46 = vmul.f32 %v4417_v18, %v2176_v53  ;;  %v2444_v15 = vadd.f32 %v2412_v28, %v2324_v19  ;;  %v2445_v31 = vadd.f32 %v2413_v58, %v2325_v61  ;;  %v2260_v21 = vsel %vm1233_vm8, %v2161_v12, %v2252_v55  ;;  %v7170_v61 = vld [vmem:[#allocation29_spill] sm:$0xff]  ;;  %v7176_v28 = vld [vmem:[#allocation32_spill] sm:$0xff]  ;;  %v7177_v12 = vld [vmem:[#allocation34_spill] sm:$0xff] }
 0x252   : > { %v2224_v20 = vmul.f32 %v6016_v10, %v6106_v3  ;;  %v2446_v16 = vadd.f32 %v2414_v34, %v2326_v26  ;;  %v2447_v50 = vadd.f32 %v2415_v54, %v2327_v47  ;;  %v2276_v6 = vmul.f32 %v2260_v21, %v5936_v39 }
 0x253   : > { %v2181_v2 = vsel %vm2180_vm1, %v4417_v18, %v2177_v46  ;;  %v2460_v35 = vmax.f32 %v2444_v15, 0.0  ;;  %v6180_v13 = vmul.f32 %v5953_v25, %v2206_v45  ;;  %4420 = vrsqrt.f32 %v6167_v56 }
 0x254   : > { %v2261_v4 = vsel %vm1233_vm8, %v2181_v2, %v2253_v36  ;;  %v2462_v29 = vmax.f32 %v2446_v16, 0.0  ;;  %v2461_v37 = vmax.f32 %v2445_v31, 0.0  ;;  %v2463_v59 = vmax.f32 %v2447_v50, 0.0 }
 0x255   : > { %v2277_v55 = vmul.f32 %v2261_v4, %v5936_v39  ;;  %v2296_v3 = vperm.slane %v2276_v6, 0  ;;  %v2297_v43 = vperm.slane %v2276_v6, 1  ;;  %vm2208_vm2 = vweird.f32 %v5888_v33 }
 0x256   : > { %v6184_v19 = vpop.eup %4418  ;;  %v2225_v18 = vmul.f32 0.5, %v2224_v20  ;;  %v2474_v48 = vpack.c.bf16 %v2462_v29, %v2460_v35  ;;  %v2475_v30 = vpack.c.bf16 %v2463_v59, %v2461_v37  ;;  %vm6190_vm3 = vmor %vm2208_vm2, %vm2209_vm13  ;;  %vm2228_vm4 = vweird.f32 %v5970_v8 }
 0x257   : > { %v2298_v36 = vperm.slane %v2277_v55, 0  ;;  %v2299_v60 = vperm.slane %v2277_v55, 1  ;;  %v2345_v40 = vmul.f32 %v2297_v43, %v7170_v61  ;;  %v2211_v33 = vsel %vm6190_vm3, %v5953_v25, %v6180_v13 }
 0x258   : > { %2685 = vmatmul.bf16.gmra.mxu2 %v2474_v48  ;;  %2714 = vmatmul.bf16.gmra.mxu3 %v2475_v30  ;;  %v2344_v44 = vmul.f32 %v2296_v3, %v6037_v9  ;;  %v2193_v41 = vmul.f32 %v6184_v19, %v6159_v57  ;;  %vm2198_vm5 = vweird.f32 %v6159_v57  ;;  %v2226_v49 = vsub.f32 1.5, %v2225_v18 }
 0x259   : > { %v2347_v1 = vmul.f32 %v2299_v60, %v7173_v52  ;;  %v4421_v51 = vpop.eup %4420  ;;  %2743 = vmatmul.bf16.gmra.mxu0 %v2474_v48  ;;  %2772 = vmatmul.bf16.gmra.mxu1 %v2475_v30  ;;  %v2372_v7 = vrot.slane %v2345_v40, 7  ;;  %v2328_v27 = vmul.f32 %v2296_v3, %v7174_v11  ;;  %v2346_v47 = vmul.f32 %v2298_v36, %v6042_v62 }
 0x25a   : > { %v2213_v25 = vmul.f32 %v4421_v51, %v6167_v56  ;;  %v2194_v17 = vmul.f32 %v6184_v19, %v2193_v41  ;;  %v2227_v9 = vmul.f32 %v6016_v10, %v2226_v49  ;;  %vm2229_vm6 = vweird.f32 %v6016_v10 }
 0x25b   : > { %v2373_v42 = vrot.slane %v2347_v1, 7  ;;  %v2380_v22 = vsel %vm1233_vm8, %v2344_v44, %v2372_v7  ;;  %v2329_v53 = vmul.f32 %v2297_v43, %v7175_v0  ;;  %v2330_v62 = vmul.f32 %v2298_v36, %v7176_v28  ;;  %vm6220_vm9 = vmor %vm2228_vm4, %vm2229_vm6  ;;  %v7183_v0 = vld [vmem:[#allocation38_spill] sm:$0xff] }
 0x25c   : > { %v2396_v24 = vsub.f32 %v5999_v32, %v2380_v22  ;;  %v2214_v45 = vmul.f32 %v4421_v51, %v2213_v25  ;;  %v2195_v34 = vmul.f32 0.5, %v2194_v17  ;;  %vm2199_vm7 = vweird.f32 %v6184_v19  ;;  %v7181_v25 = vld [vmem:[#allocation37_spill] sm:$0xff] }
 0x25d   : > { %v2381_v23 = vsel %vm1233_vm8, %v2346_v47, %v2373_v42  ;;  %v2331_v46 = vmul.f32 %v2299_v60, %v7177_v12  ;;  %v2231_v2 = vsel %vm6220_vm9, %v6016_v10, %v2227_v9  ;;  %vm2219_vm10 = vweird.f32 %v4421_v51  ;;  %vm2200_vm12 = vmor %vm2198_vm5, %vm2199_vm7  ;;  %v7182_v9 = vld [vmem:[#allocation33_spill] sm:$0xff] }
 0x25e   : > { %v2397_v58 = vsub.f32 %v5999_v32, %v2381_v23  ;;  %v2416_v54 = vperm.slane %v2396_v24, 0  ;;  %v2417_v15 = vperm.slane %v2396_v24, 1  ;;  %v2215_v31 = vmul.f32 0.5, %v2214_v45 }
 0x25f   : > { %v2196_v50 = vsub.f32 1.5, %v2195_v34  ;;  %vm2218_vm11 = vweird.f32 %v6167_v56  ;;  %v2254_v55 = vrot.slane %v2211_v33, 7  ;;  %v2255_v3 = vrot.slane %v2231_v2, 7 }
 0x260   : > { %v2418_v20 = vperm.slane %v2397_v58, 0  ;;  %v2419_v16 = vperm.slane %v2397_v58, 1  ;;  %v2448_v6 = vadd.f32 %v2416_v54, %v2328_v27  ;;  %v2449_v35 = vadd.f32 %v2417_v15, %v2329_v53  ;;  %vm2220_vm13 = vmor %vm2218_vm11, %vm2219_vm10 }
 0x261   : > { %v2216_v4 = vsub.f32 1.5, %v2215_v31  ;;  %v2197_v37 = vmul.f32 %v6184_v19, %v2196_v50 }
 0x262   : > { %v2450_v13 = vadd.f32 %v2418_v20, %v2330_v62  ;;  %v2451_v29 = vadd.f32 %v2419_v16, %v2331_v46  ;;  %v2464_v8 = vmax.f32 %v2448_v6, 0.0  ;;  %v2465_v43 = vmax.f32 %v2449_v35, 0.0 }
 0x263   : > { %v2217_v59 = vmul.f32 %v4421_v51, %v2216_v4  ;;  %v2201_v48 = vsel %vm2200_vm12, %v6184_v19, %v2197_v37  ;;  %v7180_v19 = vld [vmem:[#allocation40_spill] sm:$0xff] }
 0x264   : > { %v2466_v10 = vmax.f32 %v2450_v13, 0.0  ;;  %v2467_v18 = vmax.f32 %v2451_v29, 0.0  ;;  %v2262_v36 = vsel %vm1233_vm8, %v2201_v48, %v2254_v55 }
 0x265   : > { %v2221_v30 = vsel %vm2220_vm13, %v4421_v51, %v2217_v59  ;;  %v2278_v40 = vmul.f32 %v2262_v36, %v5936_v39 }
 0x266   : > { %v2476_v60 = vpack.c.bf16 %v2466_v10, %v2464_v8  ;;  %v2477_v56 = vpack.c.bf16 %v2467_v18, %v2465_v43  ;;  %v2263_v61 = vsel %vm1233_vm8, %v2221_v30, %v2255_v3 }
 0x267   : > { %v2279_v57 = vmul.f32 %v2263_v61, %v5936_v39  ;;  %v2300_v26 = vperm.slane %v2278_v40, 0  ;;  %v2301_v52 = vperm.slane %v2278_v40, 1 }
 0x268   : > { %2690 = vmatmul.bf16.gmra.mxu2 %v2476_v60  ;;  %2719 = vmatmul.bf16.gmra.mxu3 %v2477_v56 }
 0x269   : > { %v2302_v1 = vperm.slane %v2279_v57, 0  ;;  %v2303_v33 = vperm.slane %v2279_v57, 1  ;;  %2748 = vmatmul.bf16.gmra.mxu0 %v2476_v60  ;;  %2777 = vmatmul.bf16.gmra.mxu1 %v2477_v56  ;;  %v2349_v51 = vmul.f32 %v2301_v52, %v7180_v19  ;;  %v2348_v7 = vmul.f32 %v2300_v26, %v6100_v14 }
 0x26a   : > { %v2332_v22 = vmul.f32 %v2300_v26, %v7181_v25  ;;  %v2333_v23 = vmul.f32 %v2301_v52, %v7182_v9 }
 0x26b   : > { %v2351_v44 = vmul.f32 %v2303_v33, %v5883_v5  ;;  %v2374_v41 = vrot.slane %v2349_v51, 7  ;;  %v2350_v49 = vmul.f32 %v2302_v1, %v6102_v38  ;;  %v2334_v14 = vmul.f32 %v2302_v1, %v5868_v63 }
 0x26c   : > { %v2335_v38 = vmul.f32 %v2303_v33, %v7183_v0 }
 0x26d   : > { %v2375_v11 = vrot.slane %v2351_v44, 7  ;;  %v2382_v39 = vsel %vm1233_vm8, %v2348_v7, %v2374_v41 }
 0x26e   : > { %v2398_v47 = vsub.f32 %v5999_v32, %v2382_v39 }
 0x26f   : > { %v2383_v27 = vsel %vm1233_vm8, %v2350_v49, %v2375_v11 }
 0x270   : > { %v2399_v42 = vsub.f32 %v5999_v32, %v2383_v27  ;;  %v2420_v17 = vperm.slane %v2398_v47, 0  ;;  %v2421_v5 = vperm.slane %v2398_v47, 1 }
 0x272   : > { %v2422_v24 = vperm.slane %v2399_v42, 0  ;;  %v2423_v53 = vperm.slane %v2399_v42, 1  ;;  %v2452_v45 = vadd.f32 %v2420_v17, %v2332_v22  ;;  %v2453_v28 = vadd.f32 %v2421_v5, %v2333_v23 }
 0x274   : > { %v2454_v62 = vadd.f32 %v2422_v24, %v2334_v14  ;;  %v2455_v58 = vadd.f32 %v2423_v53, %v2335_v38  ;;  %v2468_v34 = vmax.f32 %v2452_v45, 0.0  ;;  %v2469_v12 = vmax.f32 %v2453_v28, 0.0 }
 0x276   : > { %v2470_v54 = vmax.f32 %v2454_v62, 0.0  ;;  %v2471_v32 = vmax.f32 %v2455_v58, 0.0 }
 0x278   : > { %v2478_v46 = vpack.c.bf16 %v2470_v54, %v2468_v34  ;;  %v2479_v15 = vpack.c.bf16 %v2471_v32, %v2469_v12 }
 0x27a   : > { %2695 = vmatmul.bf16.gmra.mxu2 %v2478_v46  ;;  %2724 = vmatmul.bf16.gmra.mxu3 %v2479_v15 }
 0x27b   : > { %2753 = vmatmul.bf16.gmra.mxu0 %v2478_v46  ;;  %2782 = vmatmul.bf16.gmra.mxu1 %v2479_v15 }
 0x2b7   : > { %v2739_v31 = vpop.f32.mrf.mxu0 }
 0x2b8   : > { %v2768_v63 = vpop.f32.mrf.mxu1 }
 0x2b9   : > { %v6250_v21 = vadd.f32 %v2768_v63, %v2739_v31 }
 0x2bb   : > { %v2796_v20 = vrot.slane %v6250_v21, 4  ;;  %v2903_v16 = vmul.f32 %v6250_v21, %v6250_v21 }
 0x2bd   : > { %v2797_v50 = vadd.f32 %v2796_v20, %v6250_v21  ;;  %v2924_v2 = vrot.slane %v2903_v16, 4  ;;  %v2681_v6 = vpop.f32.mrf.mxu2 }
 0x2be   : > { %v2710_v35 = vpop.f32.mrf.mxu3 }
 0x2bf   : > { %v6256_v4 = vadd.f32 %v2710_v35, %v2681_v6  ;;  %v2798_v13 = vrot.slane %v2797_v50, 2  ;;  %v2925_v29 = vadd.f32 %v2924_v2, %v2903_v16  ;;  %v2741_v59 = vpop.f32.mrf.mxu0  ;;  %v4270_v2 = vld [vmem:[%s6987_s12 + $0x38] sm:$0xff] }
 0x2c0   : > { %v2770_v55 = vpop.f32.mrf.mxu1  ;;  %3634 = vmatpush.bf16.msra.mxu2 %v4270_v2 }
 0x2c1   : > { %v2790_v37 = vrot.slane %v6256_v4, 4  ;;  %v2902_v8 = vmul.f32 %v6256_v4, %v6256_v4  ;;  %v2799_v3 = vadd.f32 %v2798_v13, %v2797_v50  ;;  %v2926_v10 = vrot.slane %v2925_v29, 2 }
 0x2c2   : > { %v6261_v43 = vadd.f32 %v2770_v55, %v2741_v59 }
 0x2c3   : > { %v2791_v18 = vadd.f32 %v2790_v37, %v6256_v4  ;;  %v2918_v48 = vrot.slane %v2902_v8, 4  ;;  %v2800_v30 = vrot.slane %v2799_v3, 1  ;;  %v2927_v36 = vadd.f32 %v2926_v10, %v2925_v29 }
 0x2c4   : > { %v2808_v60 = vrot.slane %v6261_v43, 4  ;;  %v2905_v56 = vmul.f32 %v6261_v43, %v6261_v43 }
 0x2c5   : > { %v2792_v61 = vrot.slane %v2791_v18, 2  ;;  %v2919_v40 = vadd.f32 %v2918_v48, %v2902_v8  ;;  %v2801_v57 = vadd.f32 %v2800_v30, %v2799_v3  ;;  %v2928_v26 = vrot.slane %v2927_v36, 1  ;;  %v2683_v33 = vpop.f32.mrf.mxu2 }
 0x2c6   : > { %v2809_v52 = vadd.f32 %v2808_v60, %v6261_v43  ;;  %v2936_v1 = vrot.slane %v2905_v56, 4  ;;  %v2712_v19 = vpop.f32.mrf.mxu3 }
 0x2c7   : > { %v2793_v51 = vadd.f32 %v2792_v61, %v2791_v18  ;;  %v2920_v44 = vrot.slane %v2919_v40, 2  ;;  %v6268_v7 = vadd.f32 %v2712_v19, %v2683_v33  ;;  %v6270_v41 = vmul.f32 0.125, %v2801_v57 }
 0x2c8   : > { %v2929_v49 = vadd.f32 %v2928_v26, %v2927_v36  ;;  %v2810_v11 = vrot.slane %v2809_v52, 2  ;;  %v2937_v39 = vadd.f32 %v2936_v1, %v2905_v56  ;;  %v4278_v26 = vld [vmem:[%s6987_s12 + $0x78] sm:$0xff]  ;;  %v4269_v1 = vld [vmem:[%s6987_s12 + $0x30] sm:$0xff] }
 0x2c9   : > { %v2794_v27 = vrot.slane %v2793_v51, 1  ;;  %v2921_v47 = vadd.f32 %v2920_v44, %v2919_v40  ;;  %v2802_v42 = vrot.slane %v6268_v7, 4  ;;  %v2904_v25 = vmul.f32 %v6268_v7, %v6268_v7  ;;  %3663 = vmatpush.bf16.msra.mxu3 %v4278_v26  ;;  %3635 = vmatpush.bf16.msra.mxu2 %v4269_v1 }
 0x2ca   : > { %v3015_v22 = vmul.f32 0.125, %v2929_v49  ;;  %v3031_v17 = vmul.f32 %v6270_v41, %v6270_v41  ;;  %v2811_v9 = vadd.f32 %v2810_v11, %v2809_v52  ;;  %v2938_v23 = vrot.slane %v2937_v39, 2  ;;  %v4277_v49 = vld [vmem:[%s6987_s12 + $0x70] sm:$0xff] }
 0x2cb   : > { %v2795_v5 = vadd.f32 %v2794_v27, %v2793_v51  ;;  %v2922_v14 = vrot.slane %v2921_v47, 1  ;;  %v2803_v24 = vadd.f32 %v2802_v42, %v6268_v7  ;;  %v2930_v0 = vrot.slane %v2904_v25, 4 }
 0x2cc   : > { %v3047_v38 = vsub.f32 %v3015_v22, %v3031_v17  ;;  %v2812_v53 = vrot.slane %v2811_v9, 1  ;;  %v2939_v45 = vadd.f32 %v2938_v23, %v2937_v39 }
 0x2cd   : > { %v6278_v28 = vmul.f32 0.125, %v2795_v5  ;;  %v2923_v62 = vadd.f32 %v2922_v14, %v2921_v47  ;;  %v2804_v58 = vrot.slane %v2803_v24, 2  ;;  %v2931_v34 = vadd.f32 %v2930_v0, %v2904_v25  ;;  %3664 = vmatpush.bf16.msra.mxu3 %v4277_v49 }
 0x2ce   : > { %v3063_v54 = vmax.f32 %v3047_v38, 0.0  ;;  %v2813_v12 = vadd.f32 %v2812_v53, %v2811_v9  ;;  %v2940_v32 = vrot.slane %v2939_v45, 1 }
 0x2cf   : > { %v3014_v46 = vmul.f32 0.125, %v2923_v62  ;;  %v3030_v15 = vmul.f32 %v6278_v28, %v6278_v28  ;;  %v2805_v31 = vadd.f32 %v2804_v58, %v2803_v24  ;;  %v2932_v63 = vrot.slane %v2931_v34, 2 }
 0x2d0   : > { %v6282_v20 = vadd.f32 1e-05, %v3063_v54  ;;  %v6284_v16 = vmul.f32 0.125, %v2813_v12  ;;  %v2941_v50 = vadd.f32 %v2940_v32, %v2939_v45 }
 0x2d1   : > { %v3046_v6 = vsub.f32 %v3014_v46, %v3030_v15  ;;  %v2806_v35 = vrot.slane %v2805_v31, 1  ;;  %v2933_v13 = vadd.f32 %v2932_v63, %v2931_v34 }
 0x2d2   : > { %4422 = vrsqrt.f32 %v6282_v20  ;;  %v3017_v29 = vmul.f32 0.125, %v2941_v50  ;;  %v3033_v37 = vmul.f32 %v6284_v16, %v6284_v16  ;;  %vm3110_vm14 = vweird.f32 %v6282_v20 }
 0x2d3   : > { %v3062_v8 = vmax.f32 %v3046_v6, 0.0  ;;  %v2807_v59 = vadd.f32 %v2806_v35, %v2805_v31  ;;  %v2934_v55 = vrot.slane %v2933_v13, 1 }
 0x2d4   : > { %v3049_v3 = vsub.f32 %v3017_v29, %v3033_v37 }
 0x2d5   : > { %v6292_v10 = vadd.f32 1e-05, %v3062_v8  ;;  %v6294_v18 = vmul.f32 0.125, %v2807_v59  ;;  %v2935_v48 = vadd.f32 %v2934_v55, %v2933_v13  ;;  %v4276_v59 = vld [vmem:[%s6987_s12 + $0x68] sm:$0xff] }
 0x2d6   : > { %v3065_v30 = vmax.f32 %v3049_v3, 0.0  ;;  %v2744_v36 = vpop.f32.mrf.mxu0  ;;  %v2773_v60 = vpop.f32.mrf.mxu1  ;;  %3665 = vmatpush.bf16.msra.mxu3 %v4276_v59 }
 0x2d7   : > { %4424 = vrsqrt.f32 %v6292_v10  ;;  %v3016_v56 = vmul.f32 0.125, %v2935_v48  ;;  %v3032_v61 = vmul.f32 %v6294_v18, %v6294_v18  ;;  %v6306_v52 = vadd.f32 %v2773_v60, %v2744_v36 }
 0x2d8   : > { %v6299_v40 = vpop.eup %4422  ;;  %v6301_v57 = vadd.f32 1e-05, %v3065_v30  ;;  %vm3100_vm1 = vweird.f32 %v6292_v10 }
 0x2d9   : > { %v3105_v33 = vmul.f32 %v6299_v40, %v6282_v20  ;;  %v3048_v19 = vsub.f32 %v3016_v56, %v3032_v61  ;;  %v2820_v51 = vrot.slane %v6306_v52, 4  ;;  %v2907_v44 = vmul.f32 %v6306_v52, %v6306_v52  ;;  %v4268_v20 = vld [vmem:[%s6987_s12 + $0x28] sm:$0xff] }
 0x2da   : > { %4426 = vrsqrt.f32 %v6301_v57  ;;  %vm3111_vm15 = vweird.f32 %v6299_v40  ;;  %vm3130_vm4 = vweird.f32 %v6301_v57  ;;  %3636 = vmatpush.bf16.msra.mxu2 %v4268_v20 }
 0x2db   : > { %v3106_v11 = vmul.f32 %v6299_v40, %v3105_v33  ;;  %v3064_v39 = vmax.f32 %v3048_v19, 0.0  ;;  %v2686_v27 = vpop.f32.mrf.mxu2  ;;  %v2715_v47 = vpop.f32.mrf.mxu3  ;;  %v2821_v42 = vadd.f32 %v2820_v51, %v6306_v52  ;;  %v2948_v25 = vrot.slane %v2907_v44, 4  ;;  %vm6343_vm3 = vmor %vm3110_vm14, %vm3111_vm15  ;;  %v6375_v19 = vld [vmem:[%s6985_s10] sm:$0x3] }
 0x2dc   : > { %v6322_v22 = vadd.f32 %v2715_v47, %v2686_v27 }
 0x2dd   : > { %v4425_v17 = vpop.eup %4424  ;;  %v3107_v9 = vmul.f32 0.5, %v3106_v11  ;;  %v6324_v23 = vadd.f32 1e-05, %v3064_v39  ;;  %v2822_v14 = vrot.slane %v2821_v42, 2  ;;  %v2949_v24 = vadd.f32 %v2948_v25, %v2907_v44 }
 0x2de   : > { %v3095_v5 = vmul.f32 %v4425_v17, %v6292_v10  ;;  %v2746_v38 = vpop.f32.mrf.mxu0  ;;  %v2775_v53 = vpop.f32.mrf.mxu1  ;;  %v2906_v54 = vmul.f32 %v6322_v22, %v6322_v22  ;;  %v2814_v46 = vrot.slane %v6322_v22, 4  ;;  %vm3101_vm2 = vweird.f32 %v4425_v17 }
 0x2df   : > { %v3108_v0 = vsub.f32 1.5, %v3107_v9  ;;  %4428 = vrsqrt.f32 %v6324_v23  ;;  %v2823_v58 = vadd.f32 %v2822_v14, %v2821_v42  ;;  %v2950_v34 = vrot.slane %v2949_v24, 2  ;;  %vm3102_vm6 = vmor %vm3100_vm1, %vm3101_vm2 }
 0x2e0   : > { %v6330_v45 = vpop.eup %4426  ;;  %v3096_v62 = vmul.f32 %v4425_v17, %v3095_v5  ;;  %v2942_v50 = vrot.slane %v2906_v54, 4  ;;  %v6349_v35 = vadd.f32 %v2775_v53, %v2746_v38  ;;  %v2815_v48 = vadd.f32 %v2814_v46, %v6322_v22  ;;  %v4267_v38 = vld [vmem:[%s6987_s12 + $0x20] sm:$0xff] }
 0x2e1   : > { %v3109_v12 = vmul.f32 %v6299_v40, %v3108_v0  ;;  %v3125_v32 = vmul.f32 %v6330_v45, %v6301_v57  ;;  %v2824_v31 = vrot.slane %v2823_v58, 1  ;;  %v2951_v63 = vadd.f32 %v2950_v34, %v2949_v24  ;;  %v4275_v53 = vld [vmem:[%s6987_s12 + $0x60] sm:$0xff]  ;;  %3637 = vmatpush.bf16.msra.mxu2 %v4267_v38 }
 0x2e2   : > { %v3097_v15 = vmul.f32 0.5, %v3096_v62  ;;  %v2943_v30 = vadd.f32 %v2942_v50, %v2906_v54  ;;  %v2832_v36 = vrot.slane %v6349_v35, 4  ;;  %vm3131_vm5 = vweird.f32 %v6330_v45  ;;  %3666 = vmatpush.bf16.msra.mxu3 %v4275_v53  ;;  %v4266_v50 = vld [vmem:[%s6987_s12 + $0x18] sm:$0xff] }
 0x2e3   : > { %v3126_v6 = vmul.f32 %v6330_v45, %v3125_v32  ;;  %v3113_v29 = vsel %vm6343_vm3, %v6299_v40, %v3109_v12  ;;  %v2825_v37 = vadd.f32 %v2824_v31, %v2823_v58  ;;  %v2952_v8 = vrot.slane %v2951_v63, 1  ;;  %v2688_v39 = vpop.f32.mrf.mxu2  ;;  %v2717_v10 = vpop.f32.mrf.mxu3  ;;  %vm6399_vm9 = vmor %vm3130_vm4, %vm3131_vm5 }
 0x2e4   : > { %v3098_v13 = vsub.f32 1.5, %v3097_v15  ;;  %v3270_v40 = vrot.slane %v3113_v29, 7  ;;  %v2944_v33 = vrot.slane %v2943_v30, 2  ;;  %v2833_v11 = vadd.f32 %v2832_v36, %v6349_v35 }
 0x2e5   : > { %v6360_v55 = vpop.eup %4428  ;;  %v3127_v3 = vmul.f32 0.5, %v3126_v6  ;;  %v6367_v61 = vmul.f32 0.125, %v2825_v37  ;;  %v2953_v1 = vadd.f32 %v2952_v8, %v2951_v63  ;;  %v2816_v25 = vrot.slane %v2815_v48, 2  ;;  %3638 = vmatpush.bf16.msra.mxu2 %v4266_v50  ;;  %v4272_v50 = vld [vmem:[%s6987_s12 + $0x48] sm:$0xff] }
 0x2e6   : > { %v3099_v60 = vmul.f32 %v4425_v17, %v3098_v13  ;;  %v3115_v56 = vmul.f32 %v6360_v55, %v6324_v23  ;;  %v2749_v9 = vpop.f32.mrf.mxu0  ;;  %v2778_v5 = vpop.f32.mrf.mxu1  ;;  %v2945_v24 = vadd.f32 %v2944_v33, %v2943_v30  ;;  %v2909_v0 = vmul.f32 %v6349_v35, %v6349_v35 }
 0x2e7   : > { %v3128_v26 = vsub.f32 1.5, %v3127_v3  ;;  %v3035_v49 = vmul.f32 %v6367_v61, %v6367_v61  ;;  %v3019_v42 = vmul.f32 0.125, %v2953_v1  ;;  %vm3121_vm7 = vweird.f32 %v6360_v55 }
 0x2e8   : > { %v3103_v51 = vsel %vm3102_vm6, %v4425_v17, %v3099_v60  ;;  %v3116_v44 = vmul.f32 %v6360_v55, %v3115_v56  ;;  %v2834_v17 = vrot.slane %v2833_v11, 2  ;;  %v6406_v32 = vadd.f32 %v2717_v10, %v2688_v39  ;;  %v4273_v39 = vld [vmem:[%s6987_s12 + $0x50] sm:$0xff] }
 0x2e9   : > { %v3278_v27 = vsel %vm1233_vm8, %v3103_v51, %v3270_v40  ;;  %v3129_v47 = vmul.f32 %v6330_v45, %v3128_v26  ;;  %v3051_v12 = vsub.f32 %v3019_v42, %v3035_v49  ;;  %v2960_v15 = vrot.slane %v2909_v0, 4 }
 0x2ea   : > { %v3117_v14 = vmul.f32 0.5, %v3116_v44  ;;  %v6392_v62 = vmul.f32 %v3278_v27, %v6375_v19  ;;  %v2835_v46 = vadd.f32 %v2834_v17, %v2833_v11  ;;  %vm3120_vm10 = vweird.f32 %v6324_v23  ;;  %v4265_v11 = vld [vmem:[%s6987_s12 + $0x10] sm:$0xff] }
 0x2eb   : > { %v3133_v54 = vsel %vm6399_vm9, %v6330_v45, %v3129_v47  ;;  %v6410_v57 = vadd.f32 %v2816_v25, %v2815_v48  ;;  %v2946_v63 = vrot.slane %v2945_v24, 1  ;;  %v4274_v45 = vld [vmem:[%s6987_s12 + $0x58] sm:$0xff]  ;;  %vm3122_vm11 = vmor %vm3120_vm10, %vm3121_vm7  ;;  %v2961_v29 = vadd.f32 %v2960_v15, %v2909_v0  ;;  %v2691_v40 = vpop.f32.mrf.mxu2  ;;  %v2720_v26 = vpop.f32.mrf.mxu3  ;;  %3639 = vmatpush.bf16.msra.mxu2 %v4265_v11 }
 0x2ec   : > { %v3118_v34 = vsub.f32 1.5, %v3117_v14  ;;  %v3310_v2 = vperm.slane %v6392_v62, 0  ;;  %v3271_v6 = vrot.slane %v3133_v54, 7  ;;  %v2836_v13 = vrot.slane %v2835_v46, 1  ;;  %3667 = vmatpush.bf16.msra.mxu3 %v4274_v45 }
 0x2ed   : > { %v7040_v23 = vperm.slane %v6392_v62, 1  ;;  %v3067_v8 = vmax.f32 %v3051_v12, 0.0  ;;  %v2908_v20 = vmul.f32 %v6406_v32, %v6406_v32  ;;  %v2962_v48 = vrot.slane %v2961_v29, 2 }
 0x2ee   : > { %v3119_v31 = vmul.f32 %v6360_v55, %v3118_v34  ;;  %v2837_v3 = vadd.f32 %v2836_v13, %v2835_v46  ;;  %v2947_v30 = vadd.f32 %v2946_v63, %v2945_v24  ;;  %v2826_v36 = vrot.slane %v6406_v32, 4  ;;  %v2751_v44 = vpop.f32.mrf.mxu0  ;;  %v2780_v49 = vpop.f32.mrf.mxu1  ;;  %v4264_v34 = vld [vmem:[%s6987_s12 + $0x8] sm:$0xff] }
 0x2ef   : > { %v2954_v60 = vrot.slane %v2908_v20, 4  ;;  %v6427_v56 = vadd.f32 %v2778_v5, %v2749_v9  ;;  %v2963_v51 = vadd.f32 %v2962_v48, %v2961_v29  ;;  %v6449_v27 = vadd.f32 1e-05, %v3067_v8  ;;  %3640 = vmatpush.bf16.msra.mxu2 %v4264_v34 }
 0x2f0   : > { %v3123_v37 = vsel %vm3122_vm11, %v6360_v55, %v3119_v31  ;;  %v6430_v55 = vmul.f32 %v3310_v2, %v6256_v4  ;;  %v6433_v33 = vmul.f32 0.125, %v2837_v3  ;;  %v6444_v4 = vmul.f32 %v7040_v23, %v6270_v41  ;;  %3668 = vmatpush.bf16.msra.mxu3 %v4273_v39  ;;  %v4263_v39 = vld [vmem:[%s6987_s12] sm:$0xff] }
 0x2f1   : > { %v3279_v59 = vsel %vm1233_vm8, %v3123_v37, %v3271_v6  ;;  %7188 = vst [vmem:[#allocation19_spill] sm:$0xff] %v6427_v56  ;;  %v2955_v47 = vadd.f32 %v2954_v60, %v2908_v20  ;;  %v2964_v42 = vrot.slane %v2963_v51, 1  ;;  %v2844_v25 = vrot.slane %v6427_v56, 4 }
 0x2f2   : > { %v6447_v10 = vmul.f32 %v3279_v59, %v6375_v19  ;;  %v2911_v9 = vmul.f32 %v6427_v56, %v6427_v56  ;;  %v6454_v5 = vadd.f32 %v2720_v26, %v2691_v40  ;;  %v6457_v14 = vmul.f32 %v3310_v2, %v6278_v28 }
 0x2f3   : > { %v6459_v41 = vmul.f32 0.125, %v2947_v30  ;;  %v6462_v24 = vadd.f32 %v2826_v36, %v6406_v32  ;;  %v6464_v17 = vadd.f32 %v2780_v49, %v2751_v44  ;;  %v2965_v0 = vadd.f32 %v2964_v42, %v2963_v51  ;;  %v2693_v36 = vpop.f32.mrf.mxu2  ;;  %v2722_v60 = vpop.f32.mrf.mxu3  ;;  %3641 = vmatpush.bf16.msra.mxu2 %v4263_v39 }
 0x2f4   : > { %v3037_v38 = vmul.f32 %v6433_v33, %v6433_v33  ;;  %v2845_v53 = vadd.f32 %v2844_v25, %v6427_v56  ;;  %v2972_v58 = vrot.slane %v2911_v9, 4  ;;  %v3312_v54 = vperm.slane %v6447_v10, 0  ;;  %3669 = vmatpush.bf16.msra.mxu3 %v4272_v50 }
 0x2f5   : > { %4430 = vrsqrt.f32 %v6449_v27  ;;  %v2956_v12 = vrot.slane %v2955_v47, 2  ;;  %v3021_v46 = vmul.f32 0.125, %v2965_v0  ;;  %v2838_v63 = vrot.slane %v6454_v5, 4 }
 0x2f6   : > { %v2846_v15 = vrot.slane %v2845_v53, 2  ;;  %v2973_v31 = vadd.f32 %v2972_v58, %v2911_v9  ;;  %v7039_v45 = vperm.slane %v6447_v10, 1  ;;  %v2910_v2 = vmul.f32 %v6454_v5, %v6454_v5 }
 0x2f7   : > { %v2856_v6 = vrot.slane %v6464_v17, 4  ;;  %v2913_v13 = vmul.f32 %v6464_v17, %v6464_v17  ;;  %v3053_v29 = vsub.f32 %v3021_v46, %v3037_v38  ;;  %v2828_v37 = vrot.slane %v6462_v24, 2 }
 0x2f8   : > { %v2847_v8 = vadd.f32 %v2846_v15, %v2845_v53  ;;  %v2974_v20 = vrot.slane %v2973_v31, 2  ;;  %v2957_v59 = vadd.f32 %v2956_v12, %v2955_v47  ;;  %v2966_v3 = vrot.slane %v2910_v2, 4  ;;  %v2754_v49 = vpop.f32.mrf.mxu0  ;;  %v2783_v11 = vpop.f32.mrf.mxu1  ;;  %v4271_v47 = vld [vmem:[%s6987_s12 + $0x40] sm:$0xff] }
 0x2f9   : > { %v2857_v48 = vadd.f32 %v2856_v6, %v6464_v17  ;;  %v2984_v30 = vrot.slane %v2913_v13, 4  ;;  %v6488_v40 = vmul.f32 %v3312_v54, %v6268_v7  ;;  %v2839_v44 = vadd.f32 %v2838_v63, %v6454_v5  ;;  %3670 = vmatpush.bf16.msra.mxu3 %v4271_v47 }
 0x2fa   : > { %v2848_v26 = vrot.slane %v2847_v8, 1  ;;  %v2975_v51 = vadd.f32 %v2974_v20, %v2973_v31  ;;  %v3069_v25 = vmax.f32 %v3053_v29, 0.0  ;;  %v2967_v9 = vadd.f32 %v2966_v3, %v2910_v2 }
 0x2fb   : > { %v6497_v42 = vpop.eup %4430  ;;  %v2858_v7 = vrot.slane %v2857_v48, 2  ;;  %v2985_v0 = vadd.f32 %v2984_v30, %v2913_v13  ;;  %v6500_v38 = vmul.f32 %v3312_v54, %v6294_v18  ;;  %v6505_v53 = vmul.f32 %v7039_v45, %v6284_v16 }
 0x2fc   : > { %v2849_v58 = vadd.f32 %v2848_v26, %v2847_v8  ;;  %v2976_v34 = vrot.slane %v2975_v51, 1  ;;  %v2958_v12 = vrot.slane %v2957_v59, 1  ;;  %v2968_v46 = vrot.slane %v2967_v9, 2 }
 0x2fd   : > { %v2859_v15 = vadd.f32 %v2858_v7, %v2857_v48  ;;  %v2986_v31 = vrot.slane %v2985_v0, 2  ;;  %v2840_v2 = vrot.slane %v2839_v44, 2  ;;  %v6509_v6 = vadd.f32 %v2722_v60, %v2693_v36  ;;  %v2725_v7 = vpop.f32.mrf.mxu3 }
 0x2fe   : > { %v6507_v63 = vmul.f32 0.125, %v2849_v58  ;;  %v2977_v50 = vadd.f32 %v2976_v34, %v2975_v51  ;;  %v6511_v18 = vadd.f32 1e-05, %v3069_v25  ;;  %v6513_v16 = vadd.f32 %v2783_v11, %v2754_v49 }
 0x2ff   : > { %v2860_v54 = vrot.slane %v2859_v15, 1  ;;  %v2987_v13 = vadd.f32 %v2986_v31, %v2985_v0  ;;  %v2969_v20 = vadd.f32 %v2968_v46, %v2967_v9  ;;  %v2912_v3 = vmul.f32 %v6509_v6, %v6509_v6  ;;  %v2696_v9 = vpop.f32.mrf.mxu2 }
 0x300   : > { %7189 = vst [vmem:[#allocation18_spill] sm:$0xff] %v6513_v16  ;;  %v3023_v29 = vmul.f32 0.125, %v2977_v50  ;;  %v3039_v8 = vmul.f32 %v6507_v63, %v6507_v63  ;;  %v2850_v26 = vrot.slane %v6509_v6, 4  ;;  %v2868_v36 = vrot.slane %v6513_v16, 4 }
 0x301   : > { %v2861_v48 = vadd.f32 %v2860_v54, %v2859_v15  ;;  %v2988_v30 = vrot.slane %v2987_v13, 1  ;;  %v6522_v60 = vadd.f32 %v2828_v37, %v6462_v24  ;;  %v2959_v51 = vadd.f32 %v2958_v12, %v2957_v59  ;;  %v2756_v37 = vpop.f32.mrf.mxu0  ;;  %v2785_v59 = vpop.f32.mrf.mxu1 }
 0x302   : > { %v2978_v49 = vrot.slane %v2912_v3, 4  ;;  %v2915_v11 = vmul.f32 %v6513_v16, %v6513_v16  ;;  %4432 = vrsqrt.f32 %v6511_v18  ;;  %v2869_v25 = vadd.f32 %v2868_v36, %v6513_v16 }
 0x303   : > { %v6527_v39 = vmul.f32 0.125, %v2861_v48  ;;  %v2989_v47 = vadd.f32 %v2988_v30, %v2987_v13  ;;  %v6530_v0 = vadd.f32 %v2840_v2, %v2839_v44  ;;  %v2970_v58 = vrot.slane %v2969_v20, 1 }
 0x304   : > { %v2979_v34 = vadd.f32 %v2978_v49, %v2912_v3  ;;  %v2996_v24 = vrot.slane %v2915_v11, 4  ;;  %v6535_v46 = vmul.f32 %v6497_v42, %v6449_v27  ;;  %v3055_v15 = vsub.f32 %v3023_v29, %v3039_v8 }
 0x305   : > { %v2851_v31 = vadd.f32 %v2850_v26, %v6509_v6  ;;  %v3025_v54 = vmul.f32 0.125, %v2989_v47  ;;  %v3041_v44 = vmul.f32 %v6527_v39, %v6527_v39  ;;  %v2870_v2 = vrot.slane %v2869_v25, 2 }
 0x306   : > { %v2980_v13 = vrot.slane %v2979_v34, 2  ;;  %v2997_v3 = vadd.f32 %v2996_v24, %v2915_v11  ;;  %v6541_v48 = vadd.f32 %v2725_v7, %v2696_v9  ;;  %v6543_v30 = vadd.f32 %v2785_v59, %v2756_v37 }
 0x307   : > { %v6545_v36 = vmul.f32 0.125, %v2959_v51  ;;  %v2971_v29 = vadd.f32 %v2970_v58, %v2969_v20  ;;  %v2871_v8 = vadd.f32 %v2870_v2, %v2869_v25  ;;  %v3071_v50 = vmax.f32 %v3055_v15, 0.0  ;;  %v2698_v12 = vpop.f32.mrf.mxu2 }
 0x308   : > { %7190 = vst [vmem:[#allocation17_spill] sm:$0xff] %v6541_v48  ;;  %v6548_v26 = vpop.eup %4432  ;;  %v2852_v47 = vrot.slane %v2851_v31, 2  ;;  %v2998_v1 = vrot.slane %v2997_v3, 2  ;;  %v2914_v45 = vmul.f32 %v6541_v48, %v6541_v48  ;;  %v3057_v23 = vsub.f32 %v3025_v54, %v3041_v44 }
 0x309   : > { %7191 = vst [vmem:[#allocation36_spill] sm:$0xff] %v6543_v30  ;;  %v2872_v11 = vrot.slane %v2871_v8, 1  ;;  %v2880_v9 = vrot.slane %v6543_v30, 4  ;;  %v2917_v51 = vmul.f32 %v6543_v30, %v6543_v30  ;;  %v2981_v7 = vadd.f32 %v2980_v13, %v2979_v34  ;;  %v2727_v34 = vpop.f32.mrf.mxu3 }
 0x30a   : > { %v2999_v24 = vadd.f32 %v2998_v1, %v2997_v3  ;;  %v2862_v20 = vrot.slane %v6541_v48, 4  ;;  %v2990_v25 = vrot.slane %v2914_v45, 4  ;;  %v6558_v58 = vmul.f32 %v6548_v26, %v6511_v18 }
 0x30b   : > { %v2873_v37 = vadd.f32 %v2872_v11, %v2871_v8  ;;  %v2881_v59 = vadd.f32 %v2880_v9, %v6543_v30  ;;  %v3008_v15 = vrot.slane %v2917_v51, 4  ;;  %v6561_v54 = vadd.f32 1e-05, %v3071_v50 }
 0x30c   : > { %v6563_v44 = vmul.f32 0.125, %v2971_v29  ;;  %v3000_v2 = vrot.slane %v2999_v24, 1  ;;  %v2991_v49 = vadd.f32 %v2990_v25, %v2914_v45  ;;  %v3073_v1 = vmax.f32 %v3057_v23, 0.0  ;;  %v6577_v23 = vld [vmem:[%s6986_s11] sm:$0x3] }
 0x30d   : > { %v6565_v13 = vmul.f32 0.125, %v2873_v37  ;;  %v2882_v3 = vrot.slane %v2881_v59, 2  ;;  %v3009_v28 = vadd.f32 %v3008_v15, %v2917_v51  ;;  %v6567_v16 = vadd.f32 %v2852_v47, %v2851_v31 }
 0x30e   : > { %v2982_v56 = vrot.slane %v2981_v7, 1  ;;  %v3001_v8 = vadd.f32 %v3000_v2, %v2999_v24  ;;  %v2863_v11 = vadd.f32 %v2862_v20, %v6541_v48  ;;  %v6572_v30 = vadd.f32 %v2727_v34, %v2698_v12 }
 0x30f   : > { %v3043_v50 = vmul.f32 %v6565_v13, %v6565_v13  ;;  %v2883_v29 = vadd.f32 %v2882_v3, %v2881_v59  ;;  %v3010_v9 = vrot.slane %v3009_v28, 2  ;;  %4434 = vrsqrt.f32 %v6561_v54 }
 0x310   : > { %v3027_v45 = vmul.f32 0.125, %v3001_v8  ;;  %v2992_v31 = vrot.slane %v2991_v49, 2  ;;  %v7192_v47 = vrot.slane %v6444_v4, 7  ;;  %v6584_v24 = vadd.f32 1e-05, %v3073_v1 }
 0x311   : > { %v2884_v20 = vrot.slane %v2883_v29, 1  ;;  %v3011_v25 = vadd.f32 %v3010_v9, %v3009_v28  ;;  %v2916_v12 = vmul.f32 %v6572_v30, %v6572_v30  ;;  %v2983_v37 = vadd.f32 %v2982_v56, %v2981_v7 }
 0x312   : > { %v3398_v51 = vsel %vm1233_vm8, %v6457_v14, %v7192_v47  ;;  %v3059_v59 = vsub.f32 %v3027_v45, %v3043_v50  ;;  %v7193_v15 = vrot.slane %v6505_v53, 7  ;;  %v2864_v3 = vrot.slane %v2863_v11, 2 }
 0x313   : > { %v3414_v34 = vsub.f32 %v6577_v23, %v3398_v51  ;;  %v2885_v14 = vadd.f32 %v2884_v20, %v2883_v29  ;;  %v3012_v1 = vrot.slane %v3011_v25, 1  ;;  %v2993_v8 = vadd.f32 %v2992_v31, %v2991_v49 }
 0x314   : > { %v3399_v2 = vsel %vm1233_vm8, %v6500_v38, %v7193_v15  ;;  %v2874_v28 = vrot.slane %v6572_v30, 4  ;;  %v3002_v9 = vrot.slane %v2916_v12, 4  ;;  %v3075_v56 = vmax.f32 %v3059_v59, 0.0 }
 0x315   : > { %v3415_v47 = vsub.f32 %v6577_v23, %v3399_v2  ;;  %v6596_v7 = vmul.f32 0.125, %v2885_v14  ;;  %v3013_v53 = vadd.f32 %v3012_v1, %v3011_v25  ;;  %v3430_v50 = vperm.slane %v3414_v34, 0  ;;  %v6598_v45 = vpop.eup %4434 }
 0x316   : > { %4436 = vrsqrt.f32 %v6584_v24  ;;  %v6601_v38 = vmul.f32 0.125, %v2983_v37  ;;  %v3003_v51 = vadd.f32 %v3002_v9, %v2916_v12  ;;  %v6603_v20 = vadd.f32 %v2864_v3, %v2863_v11 }
 0x317   : > { %v3432_v29 = vperm.slane %v3415_v47, 0  ;;  %v3029_v49 = vmul.f32 0.125, %v3013_v53  ;;  %v3045_v31 = vmul.f32 %v6596_v7, %v6596_v7  ;;  %v3462_v59 = vadd.f32 %v3430_v50, %v6430_v55 }
 0x318   : > { %v2994_v15 = vrot.slane %v2993_v8, 1  ;;  %v2875_v25 = vadd.f32 %v2874_v28, %v6572_v30  ;;  %v3004_v2 = vrot.slane %v3003_v51, 2  ;;  %v6610_v1 = vadd.f32 1e-05, %v3075_v56 }
 0x319   : > { %v3464_v14 = vadd.f32 %v3432_v29, %v6488_v40  ;;  %v3061_v37 = vsub.f32 %v3029_v49, %v3045_v31  ;;  %v3478_v4 = vmax.f32 %v3462_v59, 0.0  ;;  %v7194_v11 = vperm.slane %v6392_v62, 1 }
 0x31a   : > { %v7195_v9 = vperm.slane %v6447_v10, 1  ;;  %v3431_v55 = vperm.slane %v3414_v34, 1  ;;  %v3433_v50 = vperm.slane %v3415_v47, 1  ;;  %v3005_v48 = vadd.f32 %v3004_v2, %v3003_v51 }
 0x31b   : > { %v3343_v12 = vmul.f32 %v7194_v11, %v6250_v21  ;;  %v3480_v3 = vmax.f32 %v3464_v14, 0.0  ;;  %v7196_v28 = vrot.slane %v6410_v57, 1  ;;  %v7197_v56 = vrot.slane %v6522_v60, 1 }
 0x31c   : > { %v3345_v53 = vmul.f32 %v7195_v9, %v6261_v43  ;;  %v3146_v62 = vmul.f32 %v6497_v42, %v6535_v46  ;;  %v6626_v21 = vpop.eup %4436  ;;  %v3077_v49 = vmax.f32 %v3061_v37, 0.0  ;;  %v2995_v34 = vadd.f32 %v2994_v15, %v2993_v8 }
 0x31d   : > { %v2819_v40 = vadd.f32 %v7196_v28, %v6410_v57  ;;  %v2831_v29 = vadd.f32 %v7197_v56, %v6522_v60  ;;  %v3494_v31 = vpack.c.bf16 %v3480_v3, %v3478_v4  ;;  %v3463_v10 = vadd.f32 %v3431_v55, %v3343_v12 }
 0x31e   : > { %v3465_v43 = vadd.f32 %v3433_v50, %v3345_v53  ;;  %v3147_v59 = vmul.f32 0.5, %v3146_v62  ;;  %4438 = vrsqrt.f32 %v6610_v1  ;;  %v2876_v57 = vrot.slane %v2875_v25, 2 }
 0x31f   : > { %v6628_v47 = vmul.f32 0.125, %v2819_v40  ;;  %v6630_v51 = vmul.f32 0.125, %v2831_v29  ;;  %3642 = vmatmul.bf16.vlgmr.msra.gmra.mxu2 %v3494_v31  ;;  %v3479_v60 = vmax.f32 %v3463_v10, 0.0  ;;  %v3185_v46 = vmul.f32 %v6598_v45, %v6561_v54 }
 0x320   : > { %v3481_v2 = vmax.f32 %v3465_v43, 0.0  ;;  %v2866_v14 = vrot.slane %v6603_v20, 1  ;;  %v3205_v15 = vmul.f32 %v6626_v21, %v6584_v24  ;;  %v6642_v37 = vadd.f32 1e-05, %v3077_v49 }
 0x321   : > { %v3034_v4 = vmul.f32 %v6628_v47, %v6628_v47  ;;  %v3036_v8 = vmul.f32 %v6630_v51, %v6630_v51  ;;  %v3006_v11 = vrot.slane %v3005_v48, 1  ;;  %v3148_v53 = vsub.f32 1.5, %v3147_v59 }
 0x322   : > { %v3495_v12 = vpack.c.bf16 %v3481_v2, %v3479_v60  ;;  %v3166_v55 = vmul.f32 %v6548_v26, %v6558_v58  ;;  %v6648_v50 = vmul.f32 0.125, %v2995_v34  ;;  %v2877_v28 = vadd.f32 %v2876_v57, %v2875_v25 }
 0x323   : > { %v3050_v3 = vsub.f32 %v6459_v41, %v3034_v4  ;;  %v3052_v9 = vsub.f32 %v6545_v36, %v3036_v8  ;;  %v7198_v40 = vrot.slane %v6530_v0, 1  ;;  %v7199_v29 = vrot.slane %v6567_v16, 1 }
 0x324   : > { %3671 = vmatmul.bf16.vlgmr.msra.gmra.mxu3 %v3495_v12  ;;  %v3167_v31 = vmul.f32 0.5, %v3166_v55  ;;  %v3186_v36 = vmul.f32 %v6598_v45, %v3185_v46  ;;  %v6657_v10 = vpop.eup %4438  ;;  %4440 = vrsqrt.f32 %v6642_v37  ;;  %v3007_v58 = vadd.f32 %v3006_v11, %v3005_v48 }
 0x325   : > { %v2843_v56 = vadd.f32 %v7198_v40, %v6530_v0  ;;  %v2855_v62 = vadd.f32 %v7199_v29, %v6567_v16  ;;  %v3066_v49 = vmax.f32 %v3050_v3, 0.0  ;;  %v3068_v41 = vmax.f32 %v3052_v9, 0.0 }
 0x326   : > { %v3149_v16 = vmul.f32 %v6497_v42, %v3148_v53  ;;  %vm3151_vm12 = vweird.f32 %v6497_v42  ;;  %v3168_v59 = vsub.f32 1.5, %v3167_v31  ;;  %v3187_v48 = vmul.f32 0.5, %v3186_v36 }
 0x327   : > { %v6660_v25 = vmul.f32 0.125, %v2843_v56  ;;  %v6662_v43 = vmul.f32 0.125, %v2855_v62  ;;  %v6664_v34 = vadd.f32 1e-05, %v3066_v49  ;;  %v6666_v0 = vadd.f32 1e-05, %v3068_v41 }
 0x328   : > { %v3225_v2 = vmul.f32 %v6657_v10, %v6610_v1  ;;  %v2878_v46 = vrot.slane %v2877_v28, 1  ;;  %vm3150_vm13 = vweird.f32 %v6449_v27  ;;  %v3188_v11 = vsub.f32 1.5, %v3187_v48 }
 0x329   : > { %v3038_v57 = vmul.f32 %v6660_v25, %v6660_v25  ;;  %v3040_v60 = vmul.f32 %v6662_v43, %v6662_v43  ;;  %4442 = vrsqrt.f32 %v6664_v34  ;;  %v3028_v12 = vmul.f32 0.125, %v3007_v58  ;;  %vm6681_vm14 = vmor %vm3150_vm13, %vm3151_vm12 }
 0x32a   : > { %4444 = vrsqrt.f32 %v6666_v0  ;;  %vm3170_vm15 = vweird.f32 %v6511_v18  ;;  %vm3171_vm1 = vweird.f32 %v6548_v26  ;;  %v3206_v9 = vmul.f32 %v6626_v21, %v3205_v15  ;;  %v6688_v53 = vpop.eup %4440 }
 0x32b   : > { %v3054_v4 = vsub.f32 %v6563_v44, %v3038_v57  ;;  %v3056_v8 = vsub.f32 %v6601_v38, %v3040_v60  ;;  %v3153_v27 = vsel %vm6681_vm14, %v6497_v42, %v3149_v16  ;;  %v3169_v44 = vmul.f32 %v6548_v26, %v3168_v59  ;;  %vm6708_vm4 = vmor %vm3170_vm15, %vm3171_vm1 }
 0x32c   : > { %v3189_v40 = vmul.f32 %v6598_v45, %v3188_v11  ;;  %vm3191_vm2 = vweird.f32 %v6598_v45  ;;  %v2867_v56 = vadd.f32 %v2866_v14, %v6603_v20  ;;  %v2879_v29 = vadd.f32 %v2878_v46, %v2877_v28 }
 0x32d   : > { %v3070_v38 = vmax.f32 %v3054_v4, 0.0  ;;  %v3072_v55 = vmax.f32 %v3056_v8, 0.0  ;;  %vm3190_vm3 = vweird.f32 %v6561_v54  ;;  %v3207_v49 = vmul.f32 0.5, %v3206_v9 }
 0x32e   : > { %v3245_v42 = vmul.f32 %v6688_v53, %v6642_v37  ;;  %v3272_v20 = vrot.slane %v3153_v27, 7  ;;  %v6712_v14 = vmul.f32 0.125, %v2867_v56  ;;  %v6714_v28 = vmul.f32 0.125, %v2879_v29  ;;  %vm6723_vm5 = vmor %vm3190_vm3, %vm3191_vm2 }
 0x32f   : > { %v6697_v62 = vadd.f32 1e-05, %v3070_v38  ;;  %v6699_v15 = vadd.f32 1e-05, %v3072_v55  ;;  %v4443_v41 = vpop.eup %4442  ;;  %v3173_v58 = vsel %vm6708_vm4, %v6548_v26, %v3169_v44  ;;  %v3226_v16 = vmul.f32 %v6657_v10, %v3225_v2 }
 0x330   : > { %v4445_v36 = vpop.eup %4444  ;;  %v3135_v54 = vmul.f32 %v4443_v41, %v6664_v34  ;;  %vm3140_vm6 = vweird.f32 %v6664_v34  ;;  %v3193_v57 = vsel %vm6723_vm5, %v6598_v45, %v3189_v40  ;;  %v3208_v60 = vsub.f32 1.5, %v3207_v49 }
 0x331   : > { %4446 = vrsqrt.f32 %v6697_v62  ;;  %v3155_v59 = vmul.f32 %v4445_v36, %v6666_v0  ;;  %v3042_v48 = vmul.f32 %v6712_v14, %v6712_v14  ;;  %v3044_v46 = vmul.f32 %v6714_v28, %v6714_v28 }
 0x332   : > { %4448 = vrsqrt.f32 %v6699_v15  ;;  %v3136_v26 = vmul.f32 %v4443_v41, %v3135_v54  ;;  %vm3160_vm7 = vweird.f32 %v6666_v0  ;;  %v3273_v2 = vrot.slane %v3173_v58, 7 }
 0x333   : > { %v3156_v4 = vmul.f32 %v4445_v36, %v3155_v59  ;;  %vm3210_vm9 = vweird.f32 %v6584_v24  ;;  %v3058_v11 = vsub.f32 %v6648_v50, %v3042_v48  ;;  %v3060_v45 = vsub.f32 %v3028_v12, %v3044_v46 }
 0x334   : > { %v3137_v8 = vmul.f32 0.5, %v3136_v26  ;;  %v3227_v3 = vmul.f32 0.5, %v3226_v16  ;;  %vm3141_vm10 = vweird.f32 %v4443_v41  ;;  %vm3211_vm11 = vweird.f32 %v6626_v21 }
 0x335   : > { %v3157_v9 = vmul.f32 0.5, %v3156_v4  ;;  %v6742_v27 = vrot.slane %v3193_v57, 7  ;;  %v3209_v55 = vmul.f32 %v6626_v21, %v3208_v60  ;;  %v3074_v40 = vmax.f32 %v3058_v11, 0.0  ;;  %vm6759_vm15 = vmor %vm3210_vm9, %vm3211_vm11 }
 0x336   : > { %v3138_v38 = vsub.f32 1.5, %v3137_v8  ;;  %v3076_v56 = vmax.f32 %v3060_v45, 0.0  ;;  %vm3161_vm12 = vweird.f32 %v4445_v36  ;;  %vm3231_vm13 = vweird.f32 %v6657_v10  ;;  %vm3142_vm1 = vmor %vm3140_vm6, %vm3141_vm10 }
 0x337   : > { %v6744_v44 = vpop.eup %4446  ;;  %v3158_v49 = vsub.f32 1.5, %v3157_v9  ;;  %vm3180_vm14 = vweird.f32 %v6697_v62  ;;  %v6763_v58 = vadd.f32 1e-05, %v3074_v40  ;;  %v3228_v18 = vsub.f32 1.5, %v3227_v3  ;;  %vm3162_vm2 = vmor %vm3160_vm7, %vm3161_vm12 }
 0x338   : > { %v6747_v29 = vpop.eup %4448  ;;  %v3175_v50 = vmul.f32 %v6744_v44, %v6697_v62  ;;  %v3139_v12 = vmul.f32 %v4443_v41, %v3138_v38  ;;  %v6769_v57 = vadd.f32 1e-05, %v3076_v56  ;;  %v3246_v26 = vmul.f32 %v6688_v53, %v3245_v42 }
 0x339   : > { %v3195_v31 = vmul.f32 %v6747_v29, %v6699_v15  ;;  %v3159_v16 = vmul.f32 %v4445_v36, %v3158_v49  ;;  %vm3200_vm3 = vweird.f32 %v6699_v15  ;;  %v3213_v34 = vsel %vm6759_vm15, %v6626_v21, %v3209_v55 }
 0x33a   : > { %v3176_v59 = vmul.f32 %v6744_v44, %v3175_v50  ;;  %v3143_v60 = vsel %vm3142_vm1, %v4443_v41, %v3139_v12  ;;  %4450 = vrsqrt.f32 %v6763_v58  ;;  %v6786_v8 = vmul.f32 %v6657_v10, %v3228_v18 }
 0x33b   : > { %v3196_v24 = vmul.f32 %v6747_v29, %v3195_v31  ;;  %v3163_v48 = vsel %vm3162_vm2, %v4445_v36, %v3159_v16  ;;  %v3280_v46 = vsel %vm1233_vm8, %v3143_v60, %v3272_v20  ;;  %4452 = vrsqrt.f32 %v6769_v57 }
 0x33c   : > { %v3177_v4 = vmul.f32 0.5, %v3176_v59  ;;  %v3281_v41 = vsel %vm1233_vm8, %v3163_v48, %v3273_v2  ;;  %v3296_v0 = vmul.f32 %v3280_v46, %v6375_v19  ;;  %vm3230_vm4 = vweird.f32 %v6610_v1 }
 0x33d   : > { %v3197_v42 = vmul.f32 0.5, %v3196_v24  ;;  %v3297_v11 = vmul.f32 %v3281_v41, %v6375_v19  ;;  %v6790_v21 = vmul.f32 0.5, %v3246_v26  ;;  %vm3181_vm5 = vweird.f32 %v6744_v44  ;;  %vm6796_vm6 = vmor %vm3230_vm4, %vm3231_vm13 }
 0x33e   : > { %v3178_v45 = vsub.f32 1.5, %v3177_v4  ;;  %v3314_v36 = vperm.slane %v3296_v0, 0  ;;  %v3315_v20 = vperm.slane %v3296_v0, 1  ;;  %v3275_v55 = vrot.slane %v3213_v34, 7  ;;  %vm3182_vm9 = vmor %vm3180_vm14, %vm3181_vm5 }
 0x33f   : > { %v3198_v3 = vsub.f32 1.5, %v3197_v42  ;;  %v3316_v9 = vperm.slane %v3297_v11, 0  ;;  %v3317_v2 = vperm.slane %v3297_v11, 1  ;;  %vm3201_vm7 = vweird.f32 %v6747_v29 }
 0x340   : > { %v3179_v38 = vmul.f32 %v6744_v44, %v3178_v45  ;;  %v6800_v56 = vpop.eup %4450  ;;  %v3363_v1 = vmul.f32 %v3315_v20, %v6367_v61  ;;  %v3233_v49 = vsel %vm6796_vm6, %v6657_v10, %v6786_v8  ;;  %v3248_v50 = vsub.f32 1.5, %v6790_v21  ;;  %vm3202_vm10 = vmor %vm3200_vm3, %vm3201_vm7 }
 0x341   : > { %v6809_v12 = vpop.eup %4452  ;;  %v3346_v31 = vmul.f32 %v3314_v36, %v6322_v22  ;;  %v3362_v54 = vmul.f32 %v3314_v36, %v6628_v47  ;;  %v3365_v18 = vmul.f32 %v3317_v2, %v6433_v33  ;;  %v3347_v16 = vmul.f32 %v3315_v20, %v6306_v52 }
 0x342   : > { %v3392_v61 = vrot.slane %v3363_v1, 7  ;;  %v3183_v59 = vsel %vm3182_vm9, %v6744_v44, %v3179_v38  ;;  %v3199_v26 = vmul.f32 %v6747_v29, %v3198_v3  ;;  %v3215_v60 = vmul.f32 %v6800_v56, %v6763_v58 }
 0x343   : > { %v3364_v22 = vmul.f32 %v3316_v9, %v6630_v51  ;;  %v3393_v47 = vrot.slane %v3365_v18, 7  ;;  %v3282_v52 = vsel %vm1233_vm8, %v3183_v59, %v6742_v27  ;;  %v3235_v33 = vmul.f32 %v6809_v12, %v6769_v57 }
 0x344   : > { %v3400_v62 = vsel %vm1233_vm8, %v3362_v54, %v3392_v61  ;;  %v3203_v44 = vsel %vm3202_vm10, %v6747_v29, %v3199_v26  ;;  %v6835_v24 = vmul.f32 %v3282_v52, %v6375_v19  ;;  %v3216_v51 = vmul.f32 %v6800_v56, %v3215_v60 }
 0x345   : > { %v3401_v34 = vsel %vm1233_vm8, %v3364_v22, %v3393_v47  ;;  %v3416_v15 = vsub.f32 %v6577_v23, %v3400_v62  ;;  %v3283_v48 = vsel %vm1233_vm8, %v3203_v44, %v3275_v55  ;;  %v3236_v27 = vmul.f32 %v6809_v12, %v3235_v33 }
 0x346   : > { %v3348_v46 = vmul.f32 %v3316_v9, %v6406_v32  ;;  %v3417_v4 = vsub.f32 %v6577_v23, %v3401_v34  ;;  %v3299_v41 = vmul.f32 %v3283_v48, %v6375_v19  ;;  %v3319_v29 = vperm.slane %v6835_v24, 1 }
 0x347   : > { %vm3220_vm11 = vweird.f32 %v6763_v58  ;;  %vm3251_vm12 = vweird.f32 %v6688_v53  ;;  %v3434_v0 = vperm.slane %v3416_v15, 0  ;;  %v3349_v42 = vmul.f32 %v3317_v2, %v6349_v35 }
 0x348   : > { %v3435_v11 = vperm.slane %v3416_v15, 1  ;;  %v3318_v45 = vperm.slane %v6835_v24, 0  ;;  %vm3240_vm13 = vweird.f32 %v6769_v57  ;;  %v3436_v36 = vperm.slane %v3417_v4, 0 }
 0x349   : > { %v3437_v32 = vperm.slane %v3417_v4, 1  ;;  %v3320_v20 = vperm.slane %v3299_v41, 0  ;;  %v3321_v3 = vperm.slane %v3299_v41, 1  ;;  %vm3250_vm14 = vweird.f32 %v6642_v37 }
 0x34a   : > { %v3466_v9 = vadd.f32 %v3434_v0, %v3346_v31  ;;  %v3467_v38 = vadd.f32 %v3435_v11, %v3347_v16  ;;  %v3217_v55 = vmul.f32 0.5, %v3216_v51  ;;  %v3237_v1 = vmul.f32 0.5, %v3236_v27  ;;  %vm3252_vm4 = vmor %vm3250_vm14, %vm3251_vm12  ;;  %v7214_v0 = vld [vmem:[#allocation19_spill] sm:$0xff] }
 0x34b   : > { %v3468_v54 = vadd.f32 %v3436_v36, %v3348_v46  ;;  %v3469_v18 = vadd.f32 %v3437_v32, %v3349_v42  ;;  %v3367_v61 = vmul.f32 %v3319_v29, %v6507_v63  ;;  %vm3221_vm15 = vweird.f32 %v6800_v56  ;;  %v4454_v32 = vld [vmem:[%s6985_s10] sm:$0x3] }
 0x34c   : > { %v3482_v35 = vmax.f32 %v3466_v9, 0.0  ;;  %v3352_v2 = vmul.f32 %v3320_v20, %v6509_v6  ;;  %v3366_v59 = vmul.f32 %v3318_v45, %v6660_v25  ;;  %v3369_v26 = vmul.f32 %v3321_v3, %v6527_v39  ;;  %vm6867_vm2 = vmor %vm3220_vm11, %vm3221_vm15 }
 0x34d   : > { %v3484_v60 = vmax.f32 %v3468_v54, 0.0  ;;  %v3483_v22 = vmax.f32 %v3467_v38, 0.0  ;;  %v3485_v47 = vmax.f32 %v3469_v18, 0.0  ;;  %v3394_v31 = vrot.slane %v3367_v61, 7 }
 0x34e   : > { %v3368_v16 = vmul.f32 %v3320_v20, %v6662_v43  ;;  %v3395_v52 = vrot.slane %v3369_v26, 7  ;;  %v3218_v33 = vsub.f32 1.5, %v3217_v55  ;;  %v3238_v62 = vsub.f32 1.5, %v3237_v1 }
 0x34f   : > { %v3496_v44 = vpack.c.bf16 %v3484_v60, %v3482_v35  ;;  %v3497_v63 = vpack.c.bf16 %v3485_v47, %v3483_v22  ;;  %v3402_v24 = vsel %vm1233_vm8, %v3366_v59, %v3394_v31  ;;  %vm3241_vm1 = vweird.f32 %v6809_v12 }
 0x350   : > { %v3403_v6 = vsel %vm1233_vm8, %v3368_v16, %v3395_v52  ;;  %v3418_v25 = vsub.f32 %v6577_v23, %v3402_v24  ;;  %v3219_v39 = vmul.f32 %v6800_v56, %v3218_v33  ;;  %v3239_v51 = vmul.f32 %v6809_v12, %v3238_v62  ;;  %vm6876_vm3 = vmor %vm3240_vm13, %vm3241_vm1  ;;  %v7215_v16 = vld [vmem:[#allocation36_spill] sm:$0xff] }
 0x351   : > { %3647 = vmatmul.bf16.gmra.mxu2 %v3496_v44  ;;  %3676 = vmatmul.bf16.gmra.mxu3 %v3497_v63  ;;  %v3419_v34 = vsub.f32 %v6577_v23, %v3403_v6  ;;  %v3353_v15 = vmul.f32 %v3321_v3, %v6464_v17  ;;  %v3249_v58 = vmul.f32 %v6688_v53, %v3248_v50  ;;  %v3276_v27 = vrot.slane %v3233_v49, 7  ;;  %v7217_v63 = vld [vmem:[#allocation18_spill] sm:$0xff] }
 0x352   : > { %v3438_v46 = vperm.slane %v3418_v25, 0  ;;  %v3439_v4 = vperm.slane %v3418_v25, 1  ;;  %v3223_v17 = vsel %vm6867_vm2, %v6800_v56, %v3219_v39  ;;  %v3243_v57 = vsel %vm6876_vm3, %v6809_v12, %v3239_v51 }
 0x353   : > { %v3440_v21 = vperm.slane %v3419_v34, 0  ;;  %v3441_v40 = vperm.slane %v3419_v34, 1  ;;  %v3253_v10 = vsel %vm3252_vm4, %v6688_v53, %v3249_v58  ;;  %v3284_v8 = vsel %vm1233_vm8, %v3223_v17, %v3276_v27 }
 0x354   : > { %v3277_v49 = vrot.slane %v3253_v10, 7  ;;  %v3300_v50 = vmul.f32 %v3284_v8, %v6375_v19  ;;  %v3350_v56 = vmul.f32 %v3318_v45, %v6454_v5  ;;  %v3351_v42 = vmul.f32 %v3319_v29, %v7214_v0 }
 0x355   : > { %v3472_v41 = vadd.f32 %v3440_v21, %v3352_v2  ;;  %v3473_v12 = vadd.f32 %v3441_v40, %v3353_v15 }
 0x356   : > { %v3285_v11 = vsel %vm1233_vm8, %v3243_v57, %v3277_v49  ;;  %v3470_v36 = vadd.f32 %v3438_v46, %v3350_v56  ;;  %v3471_v37 = vadd.f32 %v3439_v4, %v3351_v42  ;;  %v3323_v20 = vperm.slane %v3300_v50, 1 }
 0x357   : > { %v3301_v53 = vmul.f32 %v4454_v32, %v3285_v11  ;;  %v3322_v3 = vperm.slane %v3300_v50, 0  ;;  %v3488_v9 = vmax.f32 %v3472_v41, 0.0  ;;  %v3489_v38 = vmax.f32 %v3473_v12, 0.0 }
 0x358   : > { %v3371_v5 = vmul.f32 %v3323_v20, %v6565_v13  ;;  %v3486_v45 = vmax.f32 %v3470_v36, 0.0  ;;  %v3487_v29 = vmax.f32 %v3471_v37, 0.0  ;;  %v3355_v24 = vmul.f32 %v3323_v20, %v7217_v63 }
 0x359   : > { %v3324_v19 = vperm.slane %v3301_v53, 0  ;;  %v3325_v55 = vperm.slane %v3301_v53, 1  ;;  %v3370_v54 = vmul.f32 %v3322_v3, %v6712_v14 }
 0x35a   : > { %v3396_v18 = vrot.slane %v3371_v5, 7  ;;  %v3498_v61 = vpack.c.bf16 %v3488_v9, %v3486_v45  ;;  %v3499_v35 = vpack.c.bf16 %v3489_v38, %v3487_v29 }
 0x35b   : > { %v3373_v1 = vmul.f32 %v3325_v55, %v6596_v7  ;;  %v3372_v2 = vmul.f32 %v3324_v19, %v6714_v28  ;;  %v3356_v14 = vmul.f32 %v3324_v19, %v6572_v30  ;;  %v3357_v52 = vmul.f32 %v3325_v55, %v7215_v16  ;;  %v7216_v28 = vld [vmem:[#allocation17_spill] sm:$0xff]  ;;  %v4357_v30 = vld [vmem:[%s6988_s13] ss:$0 sm:$0xff] }
 0x35c   : > { %v3404_v26 = vsel %vm1233_vm8, %v3370_v54, %v3396_v18  ;;  %v3354_v62 = vmul.f32 %v3322_v3, %v7216_v28 }
 0x35d   : > { %v3397_v59 = vrot.slane %v3373_v1, 7  ;;  %v3420_v22 = vsub.f32 %v6577_v23, %v3404_v26 }
 0x35f   : > { %v3405_v60 = vsel %vm1233_vm8, %v3372_v2, %v3397_v59  ;;  %v3442_v31 = vperm.slane %v3420_v22, 0  ;;  %v3443_v33 = vperm.slane %v3420_v22, 1 }
 0x360   : > { %v3421_v13 = vsub.f32 %v6577_v23, %v3405_v60 }
 0x361   : > { %3652 = vmatmul.bf16.gmra.mxu2 %v3498_v61  ;;  %3681 = vmatmul.bf16.gmra.mxu3 %v3499_v35  ;;  %v3474_v25 = vadd.f32 %v3442_v31, %v3354_v62  ;;  %v3475_v39 = vadd.f32 %v3443_v33, %v3355_v24 }
 0x362   : > { %v3444_v47 = vperm.slane %v3421_v13, 0  ;;  %v3445_v7 = vperm.slane %v3421_v13, 1 }
 0x363   : > { %v3490_v51 = vmax.f32 %v3474_v25, 0.0  ;;  %v3491_v34 = vmax.f32 %v3475_v39, 0.0 }
 0x364   : > { %v3476_v44 = vadd.f32 %v3444_v47, %v3356_v14  ;;  %v3477_v6 = vadd.f32 %v3445_v7, %v3357_v52 }
 0x366   : > { %v3492_v23 = vmax.f32 %v3476_v44, 0.0  ;;  %v3493_v43 = vmax.f32 %v3477_v6, 0.0 }
 0x368   : > { %v3500_v15 = vpack.c.bf16 %v3492_v23, %v3490_v51  ;;  %v3501_v48 = vpack.c.bf16 %v3493_v43, %v3491_v34 }
 0x371   : > { %3657 = vmatmul.bf16.gmra.mxu2 %v3500_v15  ;;  %3686 = vmatmul.bf16.gmra.mxu3 %v3501_v48 }
 0x3a2   : > { %v3643_v58 = vpop.f32.mrf.mxu2 }
 0x3a3   : > { %v3644_v27 = vadd.f32 %v4357_v30, %v3643_v58 }
 0x3a7   : > { %v3672_v46 = vpop.f32.mrf.mxu3 }
 0x3a8   : > { %v3673_v4 = vadd.f32 %v3672_v46, %v3644_v27 }
 0x3aa   : > { %3692 = vst.msk [vmem:[%s6923_s24] sm:$0xff] %vm594_vm0, %v3673_v4  ;;  %v3645_v17 = vpop.f32.mrf.mxu2 }
 0x3ab   : > { %v3646_v57 = vadd.f32 %v4357_v30, %v3645_v17 }
 0x3af   : > { %v3674_v21 = vpop.f32.mrf.mxu3 }
 0x3b0   : > { %v3675_v40 = vadd.f32 %v3674_v21, %v3646_v57 }
 0x3b2   : > { %3693 = vst.msk [vmem:[%s6923_s24 + $0x8] sm:$0xff] %vm594_vm0, %v3675_v40 }
 0x3d4   : > { %v3648_v10 = vpop.f32.mrf.mxu2  ;;  %v3677_v8 = vpop.f32.mrf.mxu3 }
 0x3d5   : > { %v3649_v49 = vadd.f32 %v4357_v30, %v3648_v10 }
 0x3d7   : > { %v3678_v50 = vadd.f32 %v3677_v8, %v3649_v49 }
 0x3d9   : > { %3694 = vst.msk [vmem:[%s6923_s24 + $0x10] sm:$0xff] %vm594_vm0, %v3678_v50 }
 0x3dc   : > { %v3650_v56 = vpop.f32.mrf.mxu2  ;;  %v3679_v41 = vpop.f32.mrf.mxu3 }
 0x3dd   : > { %v3651_v0 = vadd.f32 %v4357_v30, %v3650_v56 }
 0x3df   : > { %v3680_v42 = vadd.f32 %v3679_v41, %v3651_v0 }
 0x3e1   : > { %3695 = vst.msk [vmem:[%s6923_s24 + $0x18] sm:$0xff] %vm594_vm0, %v3680_v42 }
 0x3e4   : > { %v3653_v12 = vpop.f32.mrf.mxu2  ;;  %v3682_v11 = vpop.f32.mrf.mxu3 }
 0x3e5   : > { %v3654_v36 = vadd.f32 %v4357_v30, %v3653_v12 }
 0x3e7   : > { %v3683_v37 = vadd.f32 %v3682_v11, %v3654_v36 }
 0x3e9   : > { %3696 = vst.msk [vmem:[%s6923_s24 + $0x20] sm:$0xff] %vm594_vm0, %v3683_v37 }
 0x3ec   : > { %v3655_v32 = vpop.f32.mrf.mxu2  ;;  %v3684_v53 = vpop.f32.mrf.mxu3 }
 0x3ed   : > { %v3656_v20 = vadd.f32 %v4357_v30, %v3655_v32 }
 0x3ef   : > { %v3685_v3 = vadd.f32 %v3684_v53, %v3656_v20 }
 0x3f1   : > { %3697 = vst.msk [vmem:[%s6923_s24 + $0x28] sm:$0xff] %vm594_vm0, %v3685_v3 }
 0x3f4   : > { %v3658_v9 = vpop.f32.mrf.mxu2  ;;  %v3687_v38 = vpop.f32.mrf.mxu3 }
 0x3f5   : > { %v3659_v19 = vadd.f32 %v4357_v30, %v3658_v9 }
 0x3f7   : > { %v3688_v55 = vadd.f32 %v3687_v38, %v3659_v19 }
 0x3f9   : > { %3698 = vst.msk [vmem:[%s6923_s24 + $0x30] sm:$0xff] %vm594_vm0, %v3688_v55 }
 0x3fc   : > { %v3660_v5 = vpop.f32.mrf.mxu2  ;;  %v3689_v29 = vpop.f32.mrf.mxu3 }
 0x3fd   : > { %v3661_v45 = vadd.f32 %v4357_v30, %v3660_v5 }
 0x3ff   : > { %v3690_v1 = vadd.f32 %v3689_v29, %v3661_v45 }
 0x401   : > { %3699 = vst.msk [vmem:[%s6923_s24 + $0x38] sm:$0xff] %vm594_vm0, %v3690_v1 }
 0x402   : > { %4572 = shalt.err (!%p4569_p12)
}
 0x403   : > { %s4624_s3 = smov 128   ;;  %s4625_s24 = smov 8  }
 0x404   : > { %4290 = dma.vmem_to_hbm [thread:$0]  (%p4767_p3), %s3714_s22, 1024, %s3716_s26, %s3701_s25, %s4624_s3, %s4624_s3, %s4625_s24  }
 0x405 PF: > { %s7219_s19 = sld [smem:[#allocation12_spill]]  ;;  %p7221_p13 = scmp.ge.s32.totalorder %s4615_s16, 2 }
 0x407   : > { %p4304_p0 = pnand %p7221_p13, %p4736_p6 }
 0x409   : > { %p4305_p5 = pneg %p4304_p0 }
 0x40b   : > { %s3730_s21 = sand.u32 1, %s7219_s19  }
 0x40c   : > { %s3731_s23 = scalar_lea.sflag [#allocation4], %s3730_s21 }
 0x40d   : > { %4598 = dma.done.wait (%p4305_p5), %s3731_s23, 1024  }
 0x40e   : > { %4600 = vsyncadd (%p4305_p5), %s3731_s23, 4294966272  ;;  %s7222_s16 = sld [smem:[#allocation15_spill]]  ;;  %s7225_s29 = smov %s4607_s30 }
 0x40f   : > { %s7223_s17 = sld [smem:[#allocation13_spill]] }
 0x410   : > { %s7224_s15 = sld [smem:[#allocation16_spill]] }
 0x414   : > { %p28_p7 = scmp.ge.s32.totalorder %s7222_s16, 4  }
 0x415   : > { %s7226_s30 = smov %s7223_s17 }
 0x416   :  { %30 = sbr.rel (!%p28_p7) target bundleno = 10 (0xa), region = 132 }
 0x41b   :  { %3737 = vsyncpa [#allocation3], 1 }
 0x41c   :  { %3739 = vsyncpa [#allocation3 + $0x1], 1 }
 0x41d   :  { %3740 = vsyncpa [#allocation6], 1 }
 0x41e   :  { %3741 = vsyncpa [#allocation4], 1 }
 0x41f   :  { %3743 = vsyncpa [#allocation4 + $0x1], 1 }

</bundles_post_ra>
